<compile_context>
chip_gen: v7x
topology: tpu7x:2x2x1
jax: 0.10.0
libtpu: 0.0.40
codegen_flags: <defaults>
</compile_context>

<pallas_src>
import jax
import jax.numpy as jnp
from jax import lax
from jax.experimental import pallas as pl
from jax.experimental.pallas import tpu as pltpu

_BN_EPS = 1e-5
_LANE = 128


def _round_up(v, m):
    return (v + m - 1) // m * m


def _pick_row_tile(H, cap):
    """Largest divisor of H that is <= cap (no M padding -> exact BN counts)."""
    th = max(1, min(H, cap))
    while H % th:
        th -= 1
    return th


def deconvlayer_forward(x, w_deconv, bias, gamma, beta, alpha,
                        *, k=4, p=1, s=2, tile_h=64):
    """Forward pass equivalent to deconvlayer(nIn, nOut, k, p, s)(x).

    x        : (N, Cin, H, W)    float32, NCHW
    w_deconv : (Cin, Cout, k, k) ConvTranspose2d weight (PyTorch layout)
    bias     : (Cout,)           ConvTranspose2d bias (cancelled by BN, unused)
    gamma    : (Cout,)           BatchNorm weight
    beta     : (Cout,)           BatchNorm bias
    alpha    : scalar            PReLU parameter (num_parameters=1)
    returns  : (N, Cout, 2H, 2W) float32, NCHW
    """
    if (k, p, s) != (4, 1, 2):
        raise NotImplementedError("deconvlayer_forward: only k=4, p=1, s=2 supported")
    # Training-mode BatchNorm subtracts the batch mean, which cancels the
    # ConvTranspose2d bias exactly -> the bias add is dead work and is dropped.
    # TODO(synk): eval-mode BatchNorm (running_mean/running_var) does NOT cancel
    # the bias; only the training-mode forward is implemented here.
    del bias

    N, Cin, H, W = x.shape
    Cout = w_deconv.shape[1]
    Ho, Wo = 2 * H, 2 * W

    th = _pick_row_tile(H, tile_h)        # input rows per grid step
    n_th = H // th
    G = N * n_th                          # single (parallel) grid axis
    TM = th * W                           # matmul rows per grid step
    Cl = _round_up(4 * Cout, _LANE)       # lane-packed (phase, Cout), 128-dense

    # ---- glue: pad + halo'd row tiling + bf16 cast (~1x the input bytes) ----
    x_nhwc = jnp.transpose(x, (0, 2, 3, 1))                       # (N,H,W,Cin)
    xp = jnp.pad(x_nhwc, ((0, 0), (1, 1), (1, 1), (0, 0)))        # (N,H+2,W+2,Cin)
    xt = jnp.stack([xp[:, t * th: t * th + th + 2] for t in range(n_th)], axis=1)
    xt = xt.reshape(G, th + 2, W + 2, Cin).astype(jnp.bfloat16)

    # ---- glue: 3x3-tap, phase-packed weight (9, Cin, Cl), zeros for the taps
    #      a given phase does not use; padded lanes are exactly zero. ---------
    w3 = jnp.zeros((3, 3, Cin, 4 * Cout), dtype=jnp.float32)
    wd = w_deconv.astype(jnp.float32)
    for ry in range(2):
        for rx in range(2):
            ph = ry * 2 + rx
            for dy in range(2):
                for dx in range(2):
                    w3 = w3.at[ry + dy, rx + dx, :, ph * Cout:(ph + 1) * Cout].set(
                        wd[:, :, 3 - ry - 2 * dy, 3 - rx - 2 * dx])
    w3 = w3.reshape(9, Cin, 4 * Cout)
    w3 = jnp.pad(w3, ((0, 0), (0, 0), (0, Cl - 4 * Cout))).astype(jnp.bfloat16)

    # ---- pass 1: in-kernel tap formation + MXU dots + BN partial stats ------
    def conv_stats_kernel(x_ref, w_ref, y_ref, stats_ref):
        # x_ref    : (1, th+2, W+2, Cin) bf16   input tile with 1-px halo
        # w_ref    : (9, Cin, Cl)        bf16   VMEM-resident across the grid
        # y_ref    : (1, TM, Cl)         bf16   pre-BN output (phase-packed lanes)
        # stats_ref: (1, 2, Cl)          f32    per-tile [sum ; sum-of-squares]
        acc = jnp.zeros((TM, Cl), jnp.float32)
        for oy in range(3):
            for ox in range(3):
                tap = x_ref[0, oy:oy + th, ox:ox + W, :].reshape(TM, Cin)
                acc = acc + jnp.dot(tap, w_ref[oy * 3 + ox],
                                    preferred_element_type=jnp.float32)
        y_ref[0] = acc.astype(y_ref.dtype)
        s = jnp.sum(acc, axis=0, keepdims=True)
        ss = jnp.sum(acc * acc, axis=0, keepdims=True)
        stats_ref[0] = jnp.concatenate([s, ss], axis=0)

    flops1 = 2 * G * TM * 9 * Cin * Cl
    bytes1 = xt.size * 2 + w3.size * 2 + G * TM * Cl * 2 + G * 2 * Cl * 4
    # vmem_limit: 48 MiB is safe on v7x (64 MiB physical); on v5e/v6e (128 MiB)
    # it can be raised to ~96 MiB together with a larger tile_h.
    y, stats = pl.pallas_call(
        conv_stats_kernel,
        out_shape=(jax.ShapeDtypeStruct((G, TM, Cl), jnp.bfloat16),
                   jax.ShapeDtypeStruct((G, 2, Cl), jnp.float32)),
        grid=(G,),
        in_specs=[
            pl.BlockSpec((1, th + 2, W + 2, Cin), lambda g: (g, 0, 0, 0)),
            pl.BlockSpec((9, Cin, Cl), lambda g: (0, 0, 0)),   # weight resident
        ],
        out_specs=(
            pl.BlockSpec((1, TM, Cl), lambda g: (g, 0, 0)),
            pl.BlockSpec((1, 2, Cl), lambda g: (g, 0, 0)),
        ),
        compiler_params=pltpu.CompilerParams(
            dimension_semantics=("parallel",),
            vmem_limit_bytes=48 * 1024 * 1024),
        cost_estimate=pl.CostEstimate(flops=flops1, transcendentals=0,
                                      bytes_accessed=bytes1),
    )(xt, w3)

    # ---- tiny host-side BN finalize: fold phases, mean/var -> scale & shift --
    count = jnp.float32(4 * N * H * W)                 # = N * Ho * Wo
    tot = jnp.sum(stats, axis=0)[:, :4 * Cout]         # (2, 4*Cout)
    tot = tot.reshape(2, 4, Cout).sum(axis=1)          # fold the 4 phase lanes
    mean = tot[0] / count
    var = tot[1] / count - mean * mean                 # biased variance
    # TODO(synk): E[x^2]-E[x]^2 in f32 can cancel when |mean| >> std; a
    # Welford-style merge of the per-tile partials would be more robust.
    scale_c = gamma.astype(jnp.float32) * lax.rsqrt(var + _BN_EPS)
    shift_c = beta.astype(jnp.float32) - mean * scale_c
    scale_l = jnp.pad(jnp.tile(scale_c, 4), (0, Cl - 4 * Cout)).reshape(1, Cl)
    shift_l = jnp.pad(jnp.tile(shift_c, 4), (0, Cl - 4 * Cout)).reshape(1, Cl)
    alpha_l = jnp.full((1, Cl), alpha, dtype=jnp.float32)

    # ---- pass 2: fused BN affine + PReLU (f32 math, f32 module output) ------
    def bn_prelu_kernel(y_ref, scale_ref, shift_ref, alpha_ref, o_ref):
        z = y_ref[0].astype(jnp.float32) * scale_ref[...] + shift_ref[...]
        o_ref[0] = jnp.where(z >= 0.0, z, alpha_ref[...] * z)

    flops2 = 4 * G * TM * Cl
    bytes2 = G * TM * Cl * (2 + 4) + 3 * Cl * 4
    z = pl.pallas_call(
        bn_prelu_kernel,
        out_shape=jax.ShapeDtypeStruct((G, TM, Cl), jnp.float32),
        grid=(G,),
        in_specs=[
            pl.BlockSpec((1, TM, Cl), lambda g: (g, 0, 0)),
            pl.BlockSpec((1, Cl), lambda g: (0, 0)),
            pl.BlockSpec((1, Cl), lambda g: (0, 0)),
            pl.BlockSpec((1, Cl), lambda g: (0, 0)),
        ],
        out_specs=pl.BlockSpec((1, TM, Cl), lambda g: (g, 0, 0)),
        compiler_params=pltpu.CompilerParams(
            dimension_semantics=("parallel",),
            vmem_limit_bytes=48 * 1024 * 1024),
        cost_estimate=pl.CostEstimate(flops=flops2, transcendentals=0,
                                      bytes_accessed=bytes2),
    )(y, scale_l, shift_l, alpha_l)

    # ---- glue: pixel shuffle (phase lanes -> spatial) and NCHW ---------------
    # TODO(synk): this is one full XLA read+write of the output; folding it into
    # pass-2 out_specs (or returning NHWC) would remove it but needs an
    # in-kernel channels-from-lanes transpose.
    z = z[:, :, :4 * Cout].reshape(N, n_th, th, W, 2, 2, Cout)
    z = jnp.transpose(z, (0, 6, 1, 2, 4, 3, 5))        # (n, co, t, i, ry, j, rx)
    return z.reshape(N, Cout, Ho, Wo)


def _reference(x, w_deconv, bias, gamma, beta, alpha, *, k=4, p=1, s=2):
    """Pure-JAX f32 reference (lax conv) for a correctness sanity check."""
    pad = k - 1 - p
    w_oihw = jnp.transpose(w_deconv[:, :, ::-1, ::-1], (1, 0, 2, 3))  # (Cout,Cin,K,K)
    y = lax.conv_general_dilated(
        x, w_oihw, window_strides=(1, 1),
        padding=[(pad, pad), (pad, pad)], lhs_dilation=(s, s),
        dimension_numbers=("NCHW", "OIHW", "NCHW"))
    y = y + bias[None, :, None, None]
    mean = y.mean(axis=(0, 2, 3), keepdims=True)
    var = ((y - mean) ** 2).mean(axis=(0, 2, 3), keepdims=True)
    y = (y - mean) / jnp.sqrt(var + _BN_EPS)
    y = y * gamma[None, :, None, None] + beta[None, :, None, None]
    return jnp.where(y >= 0, y, alpha * y)


if __name__ == "__main__":
    # small deterministic setup consistent with the module
    nIn, nOut, k, p, s = 4, 8, 4, 1, 2
    N, H, W = 2, 16, 16

    key = jax.random.PRNGKey(0)
    kx, kw, kb, kg, kbe = jax.random.split(key, 5)

    x = jax.random.normal(kx, (N, nIn, H, W), dtype=jnp.float32)

    fan = nOut * k * k
    bound = 1.0 / (fan ** 0.5)
    w_deconv = jax.random.uniform(kw, (nIn, nOut, k, k), jnp.float32, -bound, bound)
    bias = jax.random.uniform(kb, (nOut,), jnp.float32, -bound, bound)
    gamma = jax.random.uniform(kg, (nOut,), jnp.float32, 0.5, 1.5)   # BN weight
    beta = 0.1 * jax.random.normal(kbe, (nOut,), jnp.float32)        # BN bias
    alpha = jnp.float32(0.25)                                        # PReLU default

    fwd = jax.jit(deconvlayer_forward)
    out = jax.block_until_ready(fwd(x, w_deconv, bias, gamma, beta, alpha))

    Ho, Wo = 2 * H, 2 * W
    assert out.shape == (N, nOut, Ho, Wo)

    ref = jax.block_until_ready(
        _reference(x, w_deconv, bias, gamma, beta, alpha, k=k, p=p, s=s))
    err_max = float(jnp.max(jnp.abs(out - ref)))
    err_mean = float(jnp.mean(jnp.abs(out - ref)))
    # bf16 matmul operands + bf16 pre-BN intermediate bound the error at a few
    # parts per thousand (relative) on the ~unit-scale normalized output.
    assert err_max < 1e-1 and err_mean < 2e-2, (err_max, err_mean)

    print("KERNEL_OK")
</pallas_src>

<mosaic_0001>
module attributes {stable_mosaic.version = 11 : i64} {
  func.func @conv_stats_kernel(%arg0: i32, %arg1: memref<1x18x18x4xbf16, #tpu.memory_space<vmem>>, %arg2: memref<9x4x128xbf16, #tpu.memory_space<vmem>>, %arg3: memref<1x256x128xbf16, #tpu.memory_space<vmem>>, %arg4: memref<1x2x128xf32, #tpu.memory_space<vmem>>) attributes {dimension_semantics = [#tpu.dimension_semantics<parallel>], iteration_bounds = array<i64: 2>, scalar_prefetch = 0 : i64, scratch_operands = 0 : i64, tpu.core_type = #tpu.core_type<tc>, window_params = [{transform_indices = @transform_0, window_bounds = array<i64: 1, 18, 18, 4>}, {pipeline_mode = #tpu.pipeline_mode<synchronous>, transform_indices = @transform_1, window_bounds = array<i64: 9, 4, 128>}, {transform_indices = @transform_2, window_bounds = array<i64: 1, 256, 128>}, {transform_indices = @transform_3, window_bounds = array<i64: 1, 2, 128>}]} {
    %cst = arith.constant 0.000000e+00 : f32
    %0 = vector.broadcast %cst : f32 to vector<256x128xf32>
    %c0 = arith.constant 0 : index
    %c0_0 = arith.constant 0 : index
    %c0_1 = arith.constant 0 : index
    %c0_2 = arith.constant 0 : index
    %1 = vector.load %arg1[%c0, %c0_0, %c0_1, %c0_2] : memref<1x18x18x4xbf16, #tpu.memory_space<vmem>>, vector<1x16x16x4xbf16>
    %2 = vector.shape_cast %1 : vector<1x16x16x4xbf16> to vector<16x16x4xbf16>
    %3 = vector.shape_cast %2 : vector<16x16x4xbf16> to vector<256x4xbf16>
    %c0_3 = arith.constant 0 : index
    %c0_4 = arith.constant 0 : index
    %c0_5 = arith.constant 0 : index
    %4 = vector.load %arg2[%c0_3, %c0_4, %c0_5] : memref<9x4x128xbf16, #tpu.memory_space<vmem>>, vector<1x4x128xbf16>
    %5 = vector.shape_cast %4 : vector<1x4x128xbf16> to vector<4x128xbf16>
    %cst_6 = arith.constant dense<0.000000e+00> : vector<256x128xf32>
    %6 = tpu.matmul %3, %5, %cst_6 {dimension_numbers = #tpu.dot_dimension_numbers<[1], [0], [0], [1], [0, 0, 1, 1], [], []>} : vector<256x4xbf16>, vector<4x128xbf16>, vector<256x128xf32> -> vector<256x128xf32>
    %7 = arith.addf %0, %6 : vector<256x128xf32>
    %c0_7 = arith.constant 0 : index
    %c0_8 = arith.constant 0 : index
    %c1 = arith.constant 1 : index
    %c0_9 = arith.constant 0 : index
    %8 = vector.load %arg1[%c0_7, %c0_8, %c1, %c0_9] : memref<1x18x18x4xbf16, #tpu.memory_space<vmem>>, vector<1x16x16x4xbf16>
    %9 = vector.shape_cast %8 : vector<1x16x16x4xbf16> to vector<16x16x4xbf16>
    %10 = vector.shape_cast %9 : vector<16x16x4xbf16> to vector<256x4xbf16>
    %c1_10 = arith.constant 1 : index
    %c0_11 = arith.constant 0 : index
    %c0_12 = arith.constant 0 : index
    %11 = vector.load %arg2[%c1_10, %c0_11, %c0_12] : memref<9x4x128xbf16, #tpu.memory_space<vmem>>, vector<1x4x128xbf16>
    %12 = vector.shape_cast %11 : vector<1x4x128xbf16> to vector<4x128xbf16>
    %cst_13 = arith.constant dense<0.000000e+00> : vector<256x128xf32>
    %13 = tpu.matmul %10, %12, %cst_13 {dimension_numbers = #tpu.dot_dimension_numbers<[1], [0], [0], [1], [0, 0, 1, 1], [], []>} : vector<256x4xbf16>, vector<4x128xbf16>, vector<256x128xf32> -> vector<256x128xf32>
    %14 = arith.addf %7, %13 : vector<256x128xf32>
    %c0_14 = arith.constant 0 : index
    %c0_15 = arith.constant 0 : index
    %c2 = arith.constant 2 : index
    %c0_16 = arith.constant 0 : index
    %15 = vector.load %arg1[%c0_14, %c0_15, %c2, %c0_16] : memref<1x18x18x4xbf16, #tpu.memory_space<vmem>>, vector<1x16x16x4xbf16>
    %16 = vector.shape_cast %15 : vector<1x16x16x4xbf16> to vector<16x16x4xbf16>
    %17 = vector.shape_cast %16 : vector<16x16x4xbf16> to vector<256x4xbf16>
    %c2_17 = arith.constant 2 : index
    %c0_18 = arith.constant 0 : index
    %c0_19 = arith.constant 0 : index
    %18 = vector.load %arg2[%c2_17, %c0_18, %c0_19] : memref<9x4x128xbf16, #tpu.memory_space<vmem>>, vector<1x4x128xbf16>
    %19 = vector.shape_cast %18 : vector<1x4x128xbf16> to vector<4x128xbf16>
    %cst_20 = arith.constant dense<0.000000e+00> : vector<256x128xf32>
    %20 = tpu.matmul %17, %19, %cst_20 {dimension_numbers = #tpu.dot_dimension_numbers<[1], [0], [0], [1], [0, 0, 1, 1], [], []>} : vector<256x4xbf16>, vector<4x128xbf16>, vector<256x128xf32> -> vector<256x128xf32>
    %21 = arith.addf %14, %20 : vector<256x128xf32>
    %c0_21 = arith.constant 0 : index
    %c1_22 = arith.constant 1 : index
    %c0_23 = arith.constant 0 : index
    %c0_24 = arith.constant 0 : index
    %22 = vector.load %arg1[%c0_21, %c1_22, %c0_23, %c0_24] : memref<1x18x18x4xbf16, #tpu.memory_space<vmem>>, vector<1x16x16x4xbf16>
    %23 = vector.shape_cast %22 : vector<1x16x16x4xbf16> to vector<16x16x4xbf16>
    %24 = vector.shape_cast %23 : vector<16x16x4xbf16> to vector<256x4xbf16>
    %c3 = arith.constant 3 : index
    %c0_25 = arith.constant 0 : index
    %c0_26 = arith.constant 0 : index
    %25 = vector.load %arg2[%c3, %c0_25, %c0_26] : memref<9x4x128xbf16, #tpu.memory_space<vmem>>, vector<1x4x128xbf16>
    %26 = vector.shape_cast %25 : vector<1x4x128xbf16> to vector<4x128xbf16>
    %cst_27 = arith.constant dense<0.000000e+00> : vector<256x128xf32>
    %27 = tpu.matmul %24, %26, %cst_27 {dimension_numbers = #tpu.dot_dimension_numbers<[1], [0], [0], [1], [0, 0, 1, 1], [], []>} : vector<256x4xbf16>, vector<4x128xbf16>, vector<256x128xf32> -> vector<256x128xf32>
    %28 = arith.addf %21, %27 : vector<256x128xf32>
    %c0_28 = arith.constant 0 : index
    %c1_29 = arith.constant 1 : index
    %c1_30 = arith.constant 1 : index
    %c0_31 = arith.constant 0 : index
    %29 = vector.load %arg1[%c0_28, %c1_29, %c1_30, %c0_31] : memref<1x18x18x4xbf16, #tpu.memory_space<vmem>>, vector<1x16x16x4xbf16>
    %30 = vector.shape_cast %29 : vector<1x16x16x4xbf16> to vector<16x16x4xbf16>
    %31 = vector.shape_cast %30 : vector<16x16x4xbf16> to vector<256x4xbf16>
    %c4 = arith.constant 4 : index
    %c0_32 = arith.constant 0 : index
    %c0_33 = arith.constant 0 : index
    %32 = vector.load %arg2[%c4, %c0_32, %c0_33] : memref<9x4x128xbf16, #tpu.memory_space<vmem>>, vector<1x4x128xbf16>
    %33 = vector.shape_cast %32 : vector<1x4x128xbf16> to vector<4x128xbf16>
    %cst_34 = arith.constant dense<0.000000e+00> : vector<256x128xf32>
    %34 = tpu.matmul %31, %33, %cst_34 {dimension_numbers = #tpu.dot_dimension_numbers<[1], [0], [0], [1], [0, 0, 1, 1], [], []>} : vector<256x4xbf16>, vector<4x128xbf16>, vector<256x128xf32> -> vector<256x128xf32>
    %35 = arith.addf %28, %34 : vector<256x128xf32>
    %c0_35 = arith.constant 0 : index
    %c1_36 = arith.constant 1 : index
    %c2_37 = arith.constant 2 : index
    %c0_38 = arith.constant 0 : index
    %36 = vector.load %arg1[%c0_35, %c1_36, %c2_37, %c0_38] : memref<1x18x18x4xbf16, #tpu.memory_space<vmem>>, vector<1x16x16x4xbf16>
    %37 = vector.shape_cast %36 : vector<1x16x16x4xbf16> to vector<16x16x4xbf16>
    %38 = vector.shape_cast %37 : vector<16x16x4xbf16> to vector<256x4xbf16>
    %c5 = arith.constant 5 : index
    %c0_39 = arith.constant 0 : index
    %c0_40 = arith.constant 0 : index
    %39 = vector.load %arg2[%c5, %c0_39, %c0_40] : memref<9x4x128xbf16, #tpu.memory_space<vmem>>, vector<1x4x128xbf16>
    %40 = vector.shape_cast %39 : vector<1x4x128xbf16> to vector<4x128xbf16>
    %cst_41 = arith.constant dense<0.000000e+00> : vector<256x128xf32>
    %41 = tpu.matmul %38, %40, %cst_41 {dimension_numbers = #tpu.dot_dimension_numbers<[1], [0], [0], [1], [0, 0, 1, 1], [], []>} : vector<256x4xbf16>, vector<4x128xbf16>, vector<256x128xf32> -> vector<256x128xf32>
    %42 = arith.addf %35, %41 : vector<256x128xf32>
    %c0_42 = arith.constant 0 : index
    %c2_43 = arith.constant 2 : index
    %c0_44 = arith.constant 0 : index
    %c0_45 = arith.constant 0 : index
    %43 = vector.load %arg1[%c0_42, %c2_43, %c0_44, %c0_45] : memref<1x18x18x4xbf16, #tpu.memory_space<vmem>>, vector<1x16x16x4xbf16>
    %44 = vector.shape_cast %43 : vector<1x16x16x4xbf16> to vector<16x16x4xbf16>
    %45 = vector.shape_cast %44 : vector<16x16x4xbf16> to vector<256x4xbf16>
    %c6 = arith.constant 6 : index
    %c0_46 = arith.constant 0 : index
    %c0_47 = arith.constant 0 : index
    %46 = vector.load %arg2[%c6, %c0_46, %c0_47] : memref<9x4x128xbf16, #tpu.memory_space<vmem>>, vector<1x4x128xbf16>
    %47 = vector.shape_cast %46 : vector<1x4x128xbf16> to vector<4x128xbf16>
    %cst_48 = arith.constant dense<0.000000e+00> : vector<256x128xf32>
    %48 = tpu.matmul %45, %47, %cst_48 {dimension_numbers = #tpu.dot_dimension_numbers<[1], [0], [0], [1], [0, 0, 1, 1], [], []>} : vector<256x4xbf16>, vector<4x128xbf16>, vector<256x128xf32> -> vector<256x128xf32>
    %49 = arith.addf %42, %48 : vector<256x128xf32>
    %c0_49 = arith.constant 0 : index
    %c2_50 = arith.constant 2 : index
    %c1_51 = arith.constant 1 : index
    %c0_52 = arith.constant 0 : index
    %50 = vector.load %arg1[%c0_49, %c2_50, %c1_51, %c0_52] : memref<1x18x18x4xbf16, #tpu.memory_space<vmem>>, vector<1x16x16x4xbf16>
    %51 = vector.shape_cast %50 : vector<1x16x16x4xbf16> to vector<16x16x4xbf16>
    %52 = vector.shape_cast %51 : vector<16x16x4xbf16> to vector<256x4xbf16>
    %c7 = arith.constant 7 : index
    %c0_53 = arith.constant 0 : index
    %c0_54 = arith.constant 0 : index
    %53 = vector.load %arg2[%c7, %c0_53, %c0_54] : memref<9x4x128xbf16, #tpu.memory_space<vmem>>, vector<1x4x128xbf16>
    %54 = vector.shape_cast %53 : vector<1x4x128xbf16> to vector<4x128xbf16>
    %cst_55 = arith.constant dense<0.000000e+00> : vector<256x128xf32>
    %55 = tpu.matmul %52, %54, %cst_55 {dimension_numbers = #tpu.dot_dimension_numbers<[1], [0], [0], [1], [0, 0, 1, 1], [], []>} : vector<256x4xbf16>, vector<4x128xbf16>, vector<256x128xf32> -> vector<256x128xf32>
    %56 = arith.addf %49, %55 : vector<256x128xf32>
    %c0_56 = arith.constant 0 : index
    %c2_57 = arith.constant 2 : index
    %c2_58 = arith.constant 2 : index
    %c0_59 = arith.constant 0 : index
    %57 = vector.load %arg1[%c0_56, %c2_57, %c2_58, %c0_59] : memref<1x18x18x4xbf16, #tpu.memory_space<vmem>>, vector<1x16x16x4xbf16>
    %58 = vector.shape_cast %57 : vector<1x16x16x4xbf16> to vector<16x16x4xbf16>
    %59 = vector.shape_cast %58 : vector<16x16x4xbf16> to vector<256x4xbf16>
    %c8 = arith.constant 8 : index
    %c0_60 = arith.constant 0 : index
    %c0_61 = arith.constant 0 : index
    %60 = vector.load %arg2[%c8, %c0_60, %c0_61] : memref<9x4x128xbf16, #tpu.memory_space<vmem>>, vector<1x4x128xbf16>
    %61 = vector.shape_cast %60 : vector<1x4x128xbf16> to vector<4x128xbf16>
    %cst_62 = arith.constant dense<0.000000e+00> : vector<256x128xf32>
    %62 = tpu.matmul %59, %61, %cst_62 {dimension_numbers = #tpu.dot_dimension_numbers<[1], [0], [0], [1], [0, 0, 1, 1], [], []>} : vector<256x4xbf16>, vector<4x128xbf16>, vector<256x128xf32> -> vector<256x128xf32>
    %63 = arith.addf %56, %62 : vector<256x128xf32>
    %64 = arith.truncf %63 : vector<256x128xf32> to vector<256x128xbf16>
    %c0_63 = arith.constant 0 : index
    %c0_64 = arith.constant 0 : index
    %c0_65 = arith.constant 0 : index
    %65 = vector.load %arg3[%c0_63, %c0_64, %c0_65] : memref<1x256x128xbf16, #tpu.memory_space<vmem>>, vector<1x256x128xbf16>
    %66 = vector.shape_cast %65 : vector<1x256x128xbf16> to vector<256x128xbf16>
    %67 = vector.shape_cast %64 : vector<256x128xbf16> to vector<1x256x128xbf16>
    tpu.vector_store %arg3[%c0_63, %c0_64, %c0_65], %67 {strides = array<i32>} : memref<1x256x128xbf16, #tpu.memory_space<vmem>>, vector<1x256x128xbf16>,
    %cst_66 = arith.constant dense<0.000000e+00> : vector<128xf32>
    %68 = vector.multi_reduction <add>, %63, %cst_66 [0] : vector<256x128xf32> to vector<128xf32>
    %69 = vector.shape_cast %68 : vector<128xf32> to vector<1x128xf32>
    %70 = arith.mulf %63, %63 : vector<256x128xf32>
    %cst_67 = arith.constant dense<0.000000e+00> : vector<128xf32>
    %71 = vector.multi_reduction <add>, %70, %cst_67 [0] : vector<256x128xf32> to vector<128xf32>
    %72 = vector.shape_cast %71 : vector<128xf32> to vector<1x128xf32>
    %73 = tpu.concatenate %69, %72 in 0 : vector<1x128xf32>, vector<1x128xf32> -> vector<2x128xf32>
    %c0_68 = arith.constant 0 : index
    %c0_69 = arith.constant 0 : index
    %c0_70 = arith.constant 0 : index
    %74 = vector.load %arg4[%c0_68, %c0_69, %c0_70] : memref<1x2x128xf32, #tpu.memory_space<vmem>>, vector<1x2x128xf32>
    %75 = vector.shape_cast %74 : vector<1x2x128xf32> to vector<2x128xf32>
    %76 = vector.shape_cast %73 : vector<2x128xf32> to vector<1x2x128xf32>
    tpu.vector_store %arg4[%c0_68, %c0_69, %c0_70], %76 {strides = array<i32>} : memref<1x2x128xf32, #tpu.memory_space<vmem>>, vector<1x2x128xf32>,
    return
  }
  func.func @transform_0(%arg0: i32) -> (i32, i32, i32, i32) {
    %c0_i32 = arith.constant 0 : i32
    %c0_i32_0 = arith.constant 0 : i32
    %c0_i32_1 = arith.constant 0 : i32
    %c0_i32_2 = arith.constant 0 : i32
    return %arg0, %c0_i32, %c0_i32_0, %c0_i32_1 : i32, i32, i32, i32
  }
  func.func @transform_1(%arg0: i32) -> (i32, i32, i32) {
    %c0_i32 = arith.constant 0 : i32
    %c0_i32_0 = arith.constant 0 : i32
    %c0_i32_1 = arith.constant 0 : i32
    %c0_i32_2 = arith.constant 0 : i32
    return %c0_i32, %c0_i32_0, %c0_i32_1 : i32, i32, i32
  }
  func.func @transform_2(%arg0: i32) -> (i32, i32, i32) {
    %c0_i32 = arith.constant 0 : i32
    %c0_i32_0 = arith.constant 0 : i32
    %c0_i32_1 = arith.constant 0 : i32
    return %arg0, %c0_i32, %c0_i32_0 : i32, i32, i32
  }
  func.func @transform_3(%arg0: i32) -> (i32, i32, i32) {
    %c0_i32 = arith.constant 0 : i32
    %c0_i32_0 = arith.constant 0 : i32
    %c0_i32_1 = arith.constant 0 : i32
    return %arg0, %c0_i32, %c0_i32_0 : i32, i32, i32
  }
}

module attributes {stable_mosaic.version = 11 : i64} {
  func.func @bn_prelu_kernel(%arg0: i32, %arg1: memref<1x256x128xbf16, #tpu.memory_space<vmem>>, %arg2: memref<1x128xf32, #tpu.memory_space<vmem>>, %arg3: memref<1x128xf32, #tpu.memory_space<vmem>>, %arg4: memref<1x128xf32, #tpu.memory_space<vmem>>, %arg5: memref<1x256x128xf32, #tpu.memory_space<vmem>>) attributes {dimension_semantics = [#tpu.dimension_semantics<parallel>], iteration_bounds = array<i64: 2>, scalar_prefetch = 0 : i64, scratch_operands = 0 : i64, tpu.core_type = #tpu.core_type<tc>, window_params = [{transform_indices = @transform_0, window_bounds = array<i64: 1, 256, 128>}, {pipeline_mode = #tpu.pipeline_mode<synchronous>, transform_indices = @transform_1, window_bounds = array<i64: 1, 128>}, {pipeline_mode = #tpu.pipeline_mode<synchronous>, transform_indices = @transform_2, window_bounds = array<i64: 1, 128>}, {pipeline_mode = #tpu.pipeline_mode<synchronous>, transform_indices = @transform_3, window_bounds = array<i64: 1, 128>}, {transform_indices = @transform_4, window_bounds = array<i64: 1, 256, 128>}]} {
    %c0 = arith.constant 0 : index
    %c0_0 = arith.constant 0 : index
    %c0_1 = arith.constant 0 : index
    %0 = vector.load %arg1[%c0, %c0_0, %c0_1] : memref<1x256x128xbf16, #tpu.memory_space<vmem>>, vector<1x256x128xbf16>
    %1 = vector.shape_cast %0 : vector<1x256x128xbf16> to vector<256x128xbf16>
    %2 = arith.extf %1 : vector<256x128xbf16> to vector<256x128xf32>
    %c0_2 = arith.constant 0 : index
    %c0_3 = arith.constant 0 : index
    %3 = vector.load %arg2[%c0_2, %c0_3] : memref<1x128xf32, #tpu.memory_space<vmem>>, vector<1x128xf32>
    %4 = vector.broadcast %3 : vector<1x128xf32> to vector<256x128xf32>
    %5 = arith.mulf %2, %4 : vector<256x128xf32>
    %c0_4 = arith.constant 0 : index
    %c0_5 = arith.constant 0 : index
    %6 = vector.load %arg3[%c0_4, %c0_5] : memref<1x128xf32, #tpu.memory_space<vmem>>, vector<1x128xf32>
    %7 = vector.broadcast %6 : vector<1x128xf32> to vector<256x128xf32>
    %8 = arith.addf %5, %7 : vector<256x128xf32>
    %cst = arith.constant 0.000000e+00 : f32
    %9 = vector.broadcast %cst : f32 to vector<256x128xf32>
    %10 = arith.cmpf oge, %8, %9 : vector<256x128xf32>
    %c0_6 = arith.constant 0 : index
    %c0_7 = arith.constant 0 : index
    %11 = vector.load %arg4[%c0_6, %c0_7] : memref<1x128xf32, #tpu.memory_space<vmem>>, vector<1x128xf32>
    %12 = vector.broadcast %11 : vector<1x128xf32> to vector<256x128xf32>
    %13 = arith.mulf %12, %8 : vector<256x128xf32>
    %14 = arith.select %10, %8, %13 : vector<256x128xi1>, vector<256x128xf32>
    %c0_8 = arith.constant 0 : index
    %c0_9 = arith.constant 0 : index
    %c0_10 = arith.constant 0 : index
    %15 = vector.load %arg5[%c0_8, %c0_9, %c0_10] : memref<1x256x128xf32, #tpu.memory_space<vmem>>, vector<1x256x128xf32>
    %16 = vector.shape_cast %15 : vector<1x256x128xf32> to vector<256x128xf32>
    %17 = vector.shape_cast %14 : vector<256x128xf32> to vector<1x256x128xf32>
    tpu.vector_store %arg5[%c0_8, %c0_9, %c0_10], %17 {strides = array<i32>} : memref<1x256x128xf32, #tpu.memory_space<vmem>>, vector<1x256x128xf32>,
    return
  }
  func.func @transform_0(%arg0: i32) -> (i32, i32, i32) {
    %c0_i32 = arith.constant 0 : i32
    %c0_i32_0 = arith.constant 0 : i32
    %c0_i32_1 = arith.constant 0 : i32
    return %arg0, %c0_i32, %c0_i32_0 : i32, i32, i32
  }
  func.func @transform_1(%arg0: i32) -> (i32, i32) {
    %c0_i32 = arith.constant 0 : i32
    %c0_i32_0 = arith.constant 0 : i32
    %c0_i32_1 = arith.constant 0 : i32
    return %c0_i32, %c0_i32_0 : i32, i32
  }
  func.func @transform_2(%arg0: i32) -> (i32, i32) {
    %c0_i32 = arith.constant 0 : i32
    %c0_i32_0 = arith.constant 0 : i32
    %c0_i32_1 = arith.constant 0 : i32
    return %c0_i32, %c0_i32_0 : i32, i32
  }
  func.func @transform_3(%arg0: i32) -> (i32, i32) {
    %c0_i32 = arith.constant 0 : i32
    %c0_i32_0 = arith.constant 0 : i32
    %c0_i32_1 = arith.constant 0 : i32
    return %c0_i32, %c0_i32_0 : i32, i32
  }
  func.func @transform_4(%arg0: i32) -> (i32, i32, i32) {
    %c0_i32 = arith.constant 0 : i32
    %c0_i32_0 = arith.constant 0 : i32
    %c0_i32_1 = arith.constant 0 : i32
    return %arg0, %c0_i32, %c0_i32_0 : i32, i32, i32
  }
}

</mosaic_0001>

<bundles_post_ra>
// kernel: tile.18
= control target key start
LH: loop header
LB: loop body
LE: loop exit
PB: predicated region body
PF: predicated region fallthrough
CT: control target
= control target key end

     0   :  { %s22_s0 = inlined_call_operand.vmem [shape: f32[8], index: 0, kind: input, shape index: {}]   ;;  %s23_s1 = inlined_call_operand.vmem [shape: f32[4,8], index: 1, kind: output, shape index: {}]  }
   0x1   :  { %v4_v0 = vld [vmem:[%s22_s0] ss:$0 sm:$0xff] }
   0x2   :  { %5 = vst [vmem:[%s23_s1] sm:$0xf] %v4_v0 }

// kernel: tile.19
= control target key start
LH: loop header
LB: loop body
LE: loop exit
PB: predicated region body
PF: predicated region fallthrough
CT: control target
= control target key end

     0   :  { %vm7_vm0 = vcmask 64512   ;;  %s37_s8 = smov 8   ;;  %s38_s9 = smov 16   ;;  %vm13_vm1 = vcmask 261312   ;;  %vm19_vm2 = vcmask 195712   ;;  %vm25_vm3 = vcmask 130112   ;;  %s55_s0 = inlined_call_operand.vmem [shape: f32[4,8], index: 0, kind: input, shape index: {}]   ;;  %s56_s1 = inlined_call_operand.vmem [shape: f32[32], index: 1, kind: output, shape index: {}]  }
   0x1   :  { %v4_v0 = vld [vmem:[%s55_s0] sm:$0xf]  ;;  %s36_s0 = smov 24  }
   0x2   :  { %5 = vst [vmem:[#allocation1] sm:$0xf] %v4_v0 }
   0x9   :  { %v10_v1 = vld [vmem:[#allocation1 + $0x3] sm:$0x1]   ;;  %v22_v2 = vld [vmem:[#allocation1 + $0x1] sm:$0x1]   ;;  %v6_v3 = vld [vmem:[#allocation1] sm:$0x1]  }
   0xa   :  { %11 = vrot.lane.b32.xlu0 %v10_v1, %s36_s0  ;;  %23 = vrot.lane.b32.xlu1 %v22_v2, %s37_s8  ;;  %v16_v4 = vld [vmem:[#allocation1 + $0x2] sm:$0x1]   ;;  %8 = vst.msk [vmem:[#allocation0] sm:$0x1] %vm7_vm0, %v6_v3  }
   0xe   :  { %17 = vrot.lane.b32.xlu0 %v16_v4, %s38_s9 }
  0x7c   :  { %v12_v5 = vpop.permute.xlu0 %11   ;;  %v24_v6 = vpop.permute.xlu1 %23  }
  0x7d   :  { %14 = vst.msk [vmem:[#allocation0] sm:$0x1] %vm13_vm1, %v12_v5  }
  0x80   :  { %v18_v7 = vpop.permute.xlu0 %17  }
  0x81   :  { %20 = vst.msk [vmem:[#allocation0] sm:$0x1] %vm19_vm2, %v18_v7  }
  0x82   :  { %26 = vst.msk [vmem:[#allocation0] sm:$0x1] %vm25_vm3, %v24_v6  }
  0x89   :  { %v30_v8 = vld [vmem:[#allocation0] sm:$0x1] }
  0x8a   :  { %32 = vst [vmem:[%s56_s1] sm:$0x1] %v30_v8 }

// kernel: deconvlayer_forward.3
= control target key start
LH: loop header
LB: loop body
LE: loop exit
PB: predicated region body
PF: predicated region fallthrough
CT: control target
= control target key end

     0   :  { %s666_s15 = smov 0   ;;  %s850_s0 = inlined_call_operand.vmem [shape: bf16[2,256,128], index: 0, kind: input, shape index: {}]   ;;  %s851_s1 = inlined_call_operand.vmem [shape: f32[1,128], index: 1, kind: input, shape index: {}]   ;;  %s852_s2 = inlined_call_operand.vmem [shape: f32[1,128], index: 2, kind: input, shape index: {}]   ;;  %s853_s3 = inlined_call_operand.vmem [shape: f32[1,128], index: 3, kind: input, shape index: {}]   ;;  %s854_s4 = inlined_call_operand.vmem [shape: f32[2,256,128], index: 4, kind: output, shape index: {}]  }
   0x1 LB: > { %s530_s16 = sadd.s32 4294967295, %s639_s15   ;;  %p534_p0 = scmp.ge.s32.totalorder %s639_s15, 1  ;;  %s639_s15 = sphi %s666_s15, %s14_s15  }
   0x2   : > { %p162_p1 = scmp.lt.s32.totalorder %s639_s15, 3 }
   0x4   : > { %p163_p2 = pnand %p534_p0, %p162_p1 }
   0x5   : > { %p188_p3 = scmp.lt.s32.totalorder (!%p163_p2), %s530_s16, 1  ;;  %v685_v0 = vld [vmem:[%s851_s1] ss:$0 sm:$0xff] (!%p163_p2) }
   0x6   : > { %166 = sbr.rel (%p163_p2) target bundleno = 71 (0x47), region = 36  ;;  %v694_v9 = vld [vmem:[%s852_s2] ss:$0 sm:$0xff] (!%p163_p2) }
   0x7   : > { %v704_v18 = vld [vmem:[%s853_s3] ss:$0 sm:$0xff] (!%p163_p2) }
   0xd   : > { %s856_s16 = smov (!%p188_p3, %s530_s16), 1 }
   0xe   : > { %s544_s17 = sshll.u32 %s856_s16, 7  ;;  %s545_s25 = sshll.u32 %s856_s16, 8 }
   0xf   : > { %s680_s20 = scalar_lea.vmem %s850_s0, %s544_s17  ;;  %s721_s30 = scalar_lea.vmem %s854_s4, %s545_s25 }
  0x10   : > { %v547_v1 = vld [vmem:[%s680_s20] sm:$0xff]   ;;  %v610_v2 = vld [vmem:[%s680_s20 + $0x8] sm:$0xff]   ;;  %v611_v3 = vld [vmem:[%s680_s20 + $0x10] sm:$0xff]  }
  0x11   : > { %v548_v4 = vunpack.c.l.bf16 %v547_v1  ;;  %v549_v5 = vunpack.c.h.bf16 %v547_v1  ;;  %v552_v6 = vunpack.c.l.bf16 %v610_v2  ;;  %v553_v7 = vunpack.c.h.bf16 %v610_v2  ;;  %v612_v8 = vld [vmem:[%s680_s20 + $0x18] sm:$0xff]   ;;  %v613_v38 = vld [vmem:[%s680_s20 + $0x20] sm:$0xff]   ;;  %v614_v42 = vld [vmem:[%s680_s20 + $0x28] sm:$0xff]  }
  0x12   : > { %v556_v10 = vunpack.c.l.bf16 %v611_v3  ;;  %v557_v11 = vunpack.c.h.bf16 %v611_v3  ;;  %v560_v12 = vunpack.c.l.bf16 %v612_v8  ;;  %v561_v13 = vunpack.c.h.bf16 %v612_v8  ;;  %v615_v43 = vld [vmem:[%s680_s20 + $0x30] sm:$0xff]   ;;  %v616_v50 = vld [vmem:[%s680_s20 + $0x38] sm:$0xff]  }
  0x13   : > { %v269_v14 = vmul.f32 %v548_v4, %v685_v0  ;;  %v270_v15 = vmul.f32 %v549_v5, %v685_v0  ;;  %v271_v16 = vmul.f32 %v552_v6, %v685_v0  ;;  %v272_v17 = vmul.f32 %v553_v7, %v685_v0 }
  0x14   : > { %v273_v19 = vmul.f32 %v556_v10, %v685_v0  ;;  %v274_v20 = vmul.f32 %v557_v11, %v685_v0  ;;  %v275_v21 = vmul.f32 %v560_v12, %v685_v0  ;;  %v276_v22 = vmul.f32 %v561_v13, %v685_v0  ;;  %v617_v13 = vld [vmem:[%s680_s20 + $0x40] sm:$0xff]  }
  0x15   : > { %v308_v23 = vadd.f32 %v694_v9, %v269_v14  ;;  %v309_v24 = vadd.f32 %v694_v9, %v270_v15  ;;  %v310_v25 = vadd.f32 %v694_v9, %v271_v16  ;;  %v311_v26 = vadd.f32 %v694_v9, %v272_v17 }
  0x16   : > { %v312_v27 = vadd.f32 %v694_v9, %v273_v19  ;;  %v313_v28 = vadd.f32 %v694_v9, %v274_v20  ;;  %v314_v29 = vadd.f32 %v694_v9, %v275_v21  ;;  %v315_v30 = vadd.f32 %v694_v9, %v276_v22  ;;  %v618_v22 = vld [vmem:[%s680_s20 + $0x48] sm:$0xff]  }
  0x17   : > { %vm340_vm0 = vcmp.ge.f32.partialorder %v308_v23, 0.0  ;;  %v379_v31 = vmul.f32 %v704_v18, %v308_v23  ;;  %vm341_vm1 = vcmp.ge.f32.partialorder %v309_v24, 0.0  ;;  %v380_v32 = vmul.f32 %v704_v18, %v309_v24 }
  0x18   : > { %vm342_vm2 = vcmp.ge.f32.partialorder %v310_v25, 0.0  ;;  %v381_v33 = vmul.f32 %v704_v18, %v310_v25  ;;  %vm343_vm3 = vcmp.ge.f32.partialorder %v311_v26, 0.0  ;;  %v382_v34 = vmul.f32 %v704_v18, %v311_v26 }
  0x19   : > { %v411_v35 = vsel %vm340_vm0, %v308_v23, %v379_v31  ;;  %v412_v36 = vsel %vm341_vm1, %v309_v24, %v380_v32  ;;  %vm344_vm4 = vcmp.ge.f32.partialorder %v312_v27, 0.0  ;;  %v383_v37 = vmul.f32 %v704_v18, %v312_v27 }
  0x1a   : > { %443 = vst [vmem:[%s721_s30] sm:$0xff] %v411_v35  ;;  %444 = vst [vmem:[%s721_s30 + $0x8] sm:$0xff] %v412_v36  ;;  %v413_v39 = vsel %vm342_vm2, %v310_v25, %v381_v33  ;;  %v414_v40 = vsel %vm343_vm3, %v311_v26, %v382_v34  ;;  %vm345_vm5 = vcmp.ge.f32.partialorder %v313_v28, 0.0  ;;  %v384_v41 = vmul.f32 %v704_v18, %v313_v28 }
  0x1b   : > { %445 = vst [vmem:[%s721_s30 + $0x10] sm:$0xff] %v413_v39  ;;  %446 = vst [vmem:[%s721_s30 + $0x18] sm:$0xff] %v414_v40  ;;  %v415_v44 = vsel %vm344_vm4, %v312_v27, %v383_v37  ;;  %vm346_vm6 = vcmp.ge.f32.partialorder %v314_v29, 0.0  ;;  %v385_v45 = vmul.f32 %v704_v18, %v314_v29  ;;  %vm347_vm7 = vcmp.ge.f32.partialorder %v315_v30, 0.0  ;;  %v619_v27 = vld [vmem:[%s680_s20 + $0x50] sm:$0xff]  }
  0x1c   : > { %447 = vst [vmem:[%s721_s30 + $0x20] sm:$0xff] %v415_v44  ;;  %v416_v46 = vsel %vm345_vm5, %v313_v28, %v384_v41  ;;  %v386_v47 = vmul.f32 %v704_v18, %v315_v30  ;;  %v564_v48 = vunpack.c.l.bf16 %v613_v38  ;;  %v565_v49 = vunpack.c.h.bf16 %v613_v38 }
  0x1d   : > { %448 = vst [vmem:[%s721_s30 + $0x28] sm:$0xff] %v416_v46  ;;  %v417_v51 = vsel %vm346_vm6, %v314_v29, %v385_v45  ;;  %v568_v52 = vunpack.c.l.bf16 %v614_v42  ;;  %v569_v53 = vunpack.c.h.bf16 %v614_v42  ;;  %v572_v54 = vunpack.c.l.bf16 %v615_v43  ;;  %v620_v45 = vld [vmem:[%s680_s20 + $0x58] sm:$0xff]  }
  0x1e   : > { %449 = vst [vmem:[%s721_s30 + $0x30] sm:$0xff] %v417_v51  ;;  %v418_v55 = vsel %vm347_vm7, %v315_v30, %v386_v47  ;;  %v277_v56 = vmul.f32 %v564_v48, %v685_v0  ;;  %v278_v57 = vmul.f32 %v565_v49, %v685_v0  ;;  %v573_v58 = vunpack.c.h.bf16 %v615_v43 }
  0x1f   : > { %450 = vst [vmem:[%s721_s30 + $0x38] sm:$0xff] %v418_v55  ;;  %v279_v59 = vmul.f32 %v568_v52, %v685_v0  ;;  %v280_v60 = vmul.f32 %v569_v53, %v685_v0  ;;  %v281_v61 = vmul.f32 %v572_v54, %v685_v0  ;;  %v576_v62 = vunpack.c.l.bf16 %v616_v50 }
  0x20   : > { %v316_v63 = vadd.f32 %v694_v9, %v277_v56  ;;  %v317_v1 = vadd.f32 %v694_v9, %v278_v57  ;;  %v282_v2 = vmul.f32 %v573_v58, %v685_v0  ;;  %v577_v3 = vunpack.c.h.bf16 %v616_v50  ;;  %v621_v56 = vld [vmem:[%s680_s20 + $0x60] sm:$0xff]  }
  0x21   : > { %v318_v4 = vadd.f32 %v694_v9, %v279_v59  ;;  %v319_v5 = vadd.f32 %v694_v9, %v280_v60  ;;  %v320_v6 = vadd.f32 %v694_v9, %v281_v61  ;;  %v283_v7 = vmul.f32 %v576_v62, %v685_v0 }
  0x22   : > { %vm348_vm8 = vcmp.ge.f32.partialorder %v316_v63, 0.0  ;;  %v387_v8 = vmul.f32 %v704_v18, %v316_v63  ;;  %vm349_vm9 = vcmp.ge.f32.partialorder %v317_v1, 0.0  ;;  %v388_v10 = vmul.f32 %v704_v18, %v317_v1 }
  0x23   : > { %vm350_vm10 = vcmp.ge.f32.partialorder %v318_v4, 0.0  ;;  %v389_v11 = vmul.f32 %v704_v18, %v318_v4  ;;  %vm351_vm11 = vcmp.ge.f32.partialorder %v319_v5, 0.0  ;;  %v390_v12 = vmul.f32 %v704_v18, %v319_v5 }
  0x24   : > { %v419_v14 = vsel %vm348_vm8, %v316_v63, %v387_v8  ;;  %v420_v15 = vsel %vm349_vm9, %v317_v1, %v388_v10  ;;  %vm352_vm12 = vcmp.ge.f32.partialorder %v320_v6, 0.0  ;;  %v391_v16 = vmul.f32 %v704_v18, %v320_v6 }
  0x25   : > { %451 = vst [vmem:[%s721_s30 + $0x40] sm:$0xff] %v419_v14  ;;  %452 = vst [vmem:[%s721_s30 + $0x48] sm:$0xff] %v420_v15  ;;  %v421_v17 = vsel %vm350_vm10, %v318_v4, %v389_v11  ;;  %v422_v19 = vsel %vm351_vm11, %v319_v5, %v390_v12  ;;  %v321_v20 = vadd.f32 %v694_v9, %v282_v2  ;;  %v580_v25 = vunpack.c.l.bf16 %v617_v13  ;;  %v623_v4 = vld [vmem:[%s680_s20 + $0x70] sm:$0xff]  }
  0x26   : > { %v322_v21 = vadd.f32 %v694_v9, %v283_v7  ;;  %453 = vst [vmem:[%s721_s30 + $0x50] sm:$0xff] %v421_v17  ;;  %454 = vst [vmem:[%s721_s30 + $0x58] sm:$0xff] %v422_v19  ;;  %v423_v23 = vsel %vm352_vm12, %v320_v6, %v391_v16  ;;  %v284_v24 = vmul.f32 %v577_v3, %v685_v0  ;;  %v581_v26 = vunpack.c.h.bf16 %v617_v13  ;;  %v622_v3 = vld [vmem:[%s680_s20 + $0x68] sm:$0xff]  }
  0x27   : > { %455 = vst [vmem:[%s721_s30 + $0x60] sm:$0xff] %v423_v23  ;;  %vm353_vm13 = vcmp.ge.f32.partialorder %v321_v20, 0.0  ;;  %v392_v28 = vmul.f32 %v704_v18, %v321_v20  ;;  %v285_v31 = vmul.f32 %v580_v25, %v685_v0  ;;  %v584_v33 = vunpack.c.l.bf16 %v618_v22 }
  0x28   : > { %vm354_vm14 = vcmp.ge.f32.partialorder %v322_v21, 0.0  ;;  %v393_v29 = vmul.f32 %v704_v18, %v322_v21  ;;  %v323_v30 = vadd.f32 %v694_v9, %v284_v24  ;;  %v286_v32 = vmul.f32 %v581_v26, %v685_v0  ;;  %v624_v24 = vld [vmem:[%s680_s20 + $0x78] sm:$0xff]  }
  0x29   : > { %v424_v34 = vsel %vm353_vm13, %v321_v20, %v392_v28  ;;  %v585_v36 = vunpack.c.h.bf16 %v618_v22  ;;  %v588_v37 = vunpack.c.l.bf16 %v619_v27  ;;  %v324_v39 = vadd.f32 %v694_v9, %v285_v31 }
  0x2a   : > { %v425_v35 = vsel %vm354_vm14, %v322_v21, %v393_v29  ;;  %456 = vst [vmem:[%s721_s30 + $0x68] sm:$0xff] %v424_v34  ;;  %vm355_vm15 = vcmp.ge.f32.partialorder %v323_v30, 0.0  ;;  %v394_v38 = vmul.f32 %v704_v18, %v323_v30  ;;  %v325_v40 = vadd.f32 %v694_v9, %v286_v32 }
  0x2b   : > { %457 = vst [vmem:[%s721_s30 + $0x70] sm:$0xff] %v425_v35  ;;  %v287_v41 = vmul.f32 %v584_v33, %v685_v0  ;;  %v288_v42 = vmul.f32 %v585_v36, %v685_v0  ;;  %v289_v43 = vmul.f32 %v588_v37, %v685_v0  ;;  %v589_v44 = vunpack.c.h.bf16 %v619_v27 }
  0x2c   : > { %v426_v46 = vsel %vm355_vm15, %v323_v30, %v394_v38  ;;  %vm356_vm0 = vcmp.ge.f32.partialorder %v324_v39, 0.0  ;;  %v395_v47 = vmul.f32 %v704_v18, %v324_v39  ;;  %vm357_vm1 = vcmp.ge.f32.partialorder %v325_v40, 0.0 }
  0x2d   : > { %458 = vst [vmem:[%s721_s30 + $0x78] sm:$0xff] %v426_v46  ;;  %v396_v48 = vmul.f32 %v704_v18, %v325_v40  ;;  %v326_v49 = vadd.f32 %v694_v9, %v287_v41  ;;  %v327_v50 = vadd.f32 %v694_v9, %v288_v42  ;;  %v328_v51 = vadd.f32 %v694_v9, %v289_v43 }
  0x2e   : > { %v427_v52 = vsel %vm356_vm0, %v324_v39, %v395_v47  ;;  %v290_v53 = vmul.f32 %v589_v44, %v685_v0  ;;  %v592_v54 = vunpack.c.l.bf16 %v620_v45  ;;  %v593_v55 = vunpack.c.h.bf16 %v620_v45 }
  0x2f   : > { %459 = vst [vmem:[%s721_s30 + $0x80] sm:$0xff] %v427_v52  ;;  %v428_v57 = vsel %vm357_vm1, %v325_v40, %v396_v48  ;;  %vm358_vm2 = vcmp.ge.f32.partialorder %v326_v49, 0.0  ;;  %v397_v58 = vmul.f32 %v704_v18, %v326_v49  ;;  %vm359_vm3 = vcmp.ge.f32.partialorder %v327_v50, 0.0 }
  0x30   : > { %460 = vst [vmem:[%s721_s30 + $0x88] sm:$0xff] %v428_v57  ;;  %v398_v59 = vmul.f32 %v704_v18, %v327_v50  ;;  %vm360_vm4 = vcmp.ge.f32.partialorder %v328_v51, 0.0  ;;  %v399_v60 = vmul.f32 %v704_v18, %v328_v51  ;;  %v329_v61 = vadd.f32 %v694_v9, %v290_v53 }
  0x31   : > { %v429_v62 = vsel %vm358_vm2, %v326_v49, %v397_v58  ;;  %v291_v63 = vmul.f32 %v592_v54, %v685_v0  ;;  %v292_v1 = vmul.f32 %v593_v55, %v685_v0  ;;  %v596_v2 = vunpack.c.l.bf16 %v621_v56 }
  0x32   : > { %461 = vst [vmem:[%s721_s30 + $0x90] sm:$0xff] %v429_v62  ;;  %v430_v5 = vsel %vm359_vm3, %v327_v50, %v398_v59  ;;  %v431_v6 = vsel %vm360_vm4, %v328_v51, %v399_v60  ;;  %vm361_vm5 = vcmp.ge.f32.partialorder %v329_v61, 0.0  ;;  %v400_v7 = vmul.f32 %v704_v18, %v329_v61 }
  0x33   : > { %462 = vst [vmem:[%s721_s30 + $0x98] sm:$0xff] %v430_v5  ;;  %463 = vst [vmem:[%s721_s30 + $0xa0] sm:$0xff] %v431_v6  ;;  %v330_v8 = vadd.f32 %v694_v9, %v291_v63  ;;  %v331_v10 = vadd.f32 %v694_v9, %v292_v1  ;;  %v293_v11 = vmul.f32 %v596_v2, %v685_v0  ;;  %v597_v12 = vunpack.c.h.bf16 %v621_v56 }
  0x34   : > { %v432_v13 = vsel %vm361_vm5, %v329_v61, %v400_v7  ;;  %v600_v14 = vunpack.c.l.bf16 %v622_v3  ;;  %v601_v15 = vunpack.c.h.bf16 %v622_v3  ;;  %v604_v16 = vunpack.c.l.bf16 %v623_v4 }
  0x35   : > { %464 = vst [vmem:[%s721_s30 + $0xa8] sm:$0xff] %v432_v13  ;;  %vm362_vm6 = vcmp.ge.f32.partialorder %v330_v8, 0.0  ;;  %v401_v17 = vmul.f32 %v704_v18, %v330_v8  ;;  %vm363_vm7 = vcmp.ge.f32.partialorder %v331_v10, 0.0  ;;  %v402_v19 = vmul.f32 %v704_v18, %v331_v10 }
  0x36   : > { %v332_v20 = vadd.f32 %v694_v9, %v293_v11  ;;  %v294_v21 = vmul.f32 %v597_v12, %v685_v0  ;;  %v295_v22 = vmul.f32 %v600_v14, %v685_v0  ;;  %v296_v23 = vmul.f32 %v601_v15, %v685_v0 }
  0x37   : > { %v433_v25 = vsel %vm362_vm6, %v330_v8, %v401_v17  ;;  %v434_v26 = vsel %vm363_vm7, %v331_v10, %v402_v19  ;;  %v297_v27 = vmul.f32 %v604_v16, %v685_v0  ;;  %v605_v28 = vunpack.c.h.bf16 %v623_v4 }
  0x38   : > { %465 = vst [vmem:[%s721_s30 + $0xb0] sm:$0xff] %v433_v25  ;;  %466 = vst [vmem:[%s721_s30 + $0xb8] sm:$0xff] %v434_v26  ;;  %vm364_vm8 = vcmp.ge.f32.partialorder %v332_v20, 0.0  ;;  %v403_v29 = vmul.f32 %v704_v18, %v332_v20  ;;  %v333_v30 = vadd.f32 %v694_v9, %v294_v21  ;;  %v334_v31 = vadd.f32 %v694_v9, %v295_v22 }
  0x39   : > { %v335_v32 = vadd.f32 %v694_v9, %v296_v23  ;;  %v336_v33 = vadd.f32 %v694_v9, %v297_v27  ;;  %v298_v34 = vmul.f32 %v605_v28, %v685_v0  ;;  %v608_v35 = vunpack.c.l.bf16 %v624_v24 }
  0x3a   : > { %v435_v36 = vsel %vm364_vm8, %v332_v20, %v403_v29  ;;  %vm365_vm9 = vcmp.ge.f32.partialorder %v333_v30, 0.0  ;;  %v404_v37 = vmul.f32 %v704_v18, %v333_v30  ;;  %vm366_vm10 = vcmp.ge.f32.partialorder %v334_v31, 0.0 }
  0x3b   : > { %467 = vst [vmem:[%s721_s30 + $0xc0] sm:$0xff] %v435_v36  ;;  %v405_v38 = vmul.f32 %v704_v18, %v334_v31  ;;  %vm367_vm11 = vcmp.ge.f32.partialorder %v335_v32, 0.0  ;;  %v406_v39 = vmul.f32 %v704_v18, %v335_v32  ;;  %vm368_vm12 = vcmp.ge.f32.partialorder %v336_v33, 0.0 }
  0x3c   : > { %v436_v40 = vsel %vm365_vm9, %v333_v30, %v404_v37  ;;  %v407_v41 = vmul.f32 %v704_v18, %v336_v33  ;;  %v337_v42 = vadd.f32 %v694_v9, %v298_v34  ;;  %v299_v43 = vmul.f32 %v608_v35, %v685_v0 }
  0x3d   : > { %468 = vst [vmem:[%s721_s30 + $0xc8] sm:$0xff] %v436_v40  ;;  %v437_v44 = vsel %vm366_vm10, %v334_v31, %v405_v38  ;;  %v438_v45 = vsel %vm367_vm11, %v335_v32, %v406_v39  ;;  %v609_v46 = vunpack.c.h.bf16 %v624_v24 }
  0x3e   : > { %469 = vst [vmem:[%s721_s30 + $0xd0] sm:$0xff] %v437_v44  ;;  %470 = vst [vmem:[%s721_s30 + $0xd8] sm:$0xff] %v438_v45  ;;  %v439_v47 = vsel %vm368_vm12, %v336_v33, %v407_v41  ;;  %vm369_vm13 = vcmp.ge.f32.partialorder %v337_v42, 0.0  ;;  %v408_v48 = vmul.f32 %v704_v18, %v337_v42  ;;  %v338_v49 = vadd.f32 %v694_v9, %v299_v43 }
  0x3f   : > { %471 = vst [vmem:[%s721_s30 + $0xe0] sm:$0xff] %v439_v47  ;;  %v300_v50 = vmul.f32 %v609_v46, %v685_v0 }
  0x40   : > { %v440_v51 = vsel %vm369_vm13, %v337_v42, %v408_v48  ;;  %vm370_vm14 = vcmp.ge.f32.partialorder %v338_v49, 0.0  ;;  %v409_v52 = vmul.f32 %v704_v18, %v338_v49 }
  0x41   : > { %472 = vst [vmem:[%s721_s30 + $0xe8] sm:$0xff] %v440_v51  ;;  %v339_v53 = vadd.f32 %v694_v9, %v300_v50 }
  0x42   : > { %v441_v54 = vsel %vm370_vm14, %v338_v49, %v409_v52 }
  0x43   : > { %473 = vst [vmem:[%s721_s30 + $0xf0] sm:$0xff] %v441_v54  ;;  %vm371_vm15 = vcmp.ge.f32.partialorder %v339_v53, 0.0  ;;  %v410_v55 = vmul.f32 %v704_v18, %v339_v53 }
  0x45   : > { %v442_v56 = vsel %vm371_vm15, %v339_v53, %v410_v55 }
  0x46   : > { %474 = vst [vmem:[%s721_s30 + $0xf8] sm:$0xff] %v442_v56 }
  0x47 PF: > { %s14_s15 = sadd.s32 1, %s639_s15  }
  0x48   : > { %p11_p4 = scmp.ge.s32.totalorder %s14_s15, 4  }
  0x4a   :  { %13 = sbr.rel (!%p11_p4) target bundleno = 1 (0x1), region = 66 }

// kernel: deconvlayer_forward.2
= control target key start
LH: loop header
LB: loop body
LE: loop exit
PB: predicated region body
PF: predicated region fallthrough
CT: control target
= control target key end

     0   :  { %s6673_s12 = smov 0   ;;  %s8425_s0 = inlined_call_operand.vmem [shape: bf16[2,18,18,4], index: 0, kind: input, shape index: {}]   ;;  %s8426_s1 = inlined_call_operand.vmem [shape: bf16[9,4,128], index: 1, kind: input, shape index: {}]   ;;  %s8427_s2 = inlined_call_operand.vmem [shape: bf16[2,256,128], index: 2, kind: output, shape index: {0}]   ;;  %s8428_s3 = inlined_call_operand.vmem [shape: f32[2,2,128], index: 3, kind: output, shape index: {1}]  }
   0x1 LB: > { %s5097_s13 = sadd.s32 4294967295, %s6651_s12   ;;  %p5101_p0 = scmp.ge.s32.totalorder %s6651_s12, 1  ;;  %s6651_s12 = sphi %s6673_s12, %s14_s12  }
   0x2   : > { %p140_p1 = scmp.lt.s32.totalorder %s6651_s12, 3 }
   0x4   : > { %p141_p2 = pnand %p5101_p0, %p140_p1 }
   0x6   : > { %144 = sbr.rel (%p141_p2) target bundleno = 604 (0x25c), region = 28 }
   0xd   : > { %v5106_v0 = vld [vmem:[%s8426_s1 + $0x2] sm:$0x3]  ;;  %vm718_vm0 = vcmask 1041408   ;;  %v5333_v1 = vld [vmem:[%s8426_s1 + $0x8] sm:$0x3]  ;;  %p168_p3 = scmp.lt.s32.totalorder %s5097_s13, 1 }
   0xe   : > { %6521 = vmatprep.subr.msk.bf16.mxu1 %vm718_vm0, %v5106_v0  ;;  %6525 = vmatprep.subr.msk.bf16.mxu0 %vm718_vm0, %v5333_v1  ;;  %v720_v2 = vsel %vm718_vm0, %v5106_v0, 0  ;;  %v6691_v3 = vsel %vm718_vm0, %v5333_v1, 0  ;;  %v215_v4 = vld [vmem:[%s8426_s1] sm:$0x3]  ;;  %v5398_v5 = vld [vmem:[%s8426_s1 + $0xa] sm:$0x3] }
   0xf   : > { %8442 = vst [vmem:[#allocation2_spill] sm:$0xff] %v6691_v3  ;;  %5958 = vmatpush3.bf16.msra.mxu1 %v720_v2  ;;  %6094 = vmatpush3.bf16.msra.mxu0 %v6691_v3  ;;  %s8497_s13 = smov (!%p168_p3, %s5097_s13), 1  ;;  %vm232_vm1 = vsmask.f32 3328  ;;  %vm233_vm2 = vsmask.f32 7440 }
  0x10   : > { %6522 = vmatprep.subr.msk.bf16.mxu1 %vm718_vm0, %v215_v4  ;;  %6527 = vmatprep.subr.msk.bf16.mxu0 %vm718_vm0, %v5398_v5  ;;  %s6531_s22 = smul.u32 216, %s8497_s13  ;;  %vm669_vm3 = vcmask 31744   ;;  %v6721_v17 = vsel %vm718_vm0, %v215_v4, 0  ;;  %v6727_v26 = vld [vmem:[%s8426_s1 + $0xc] sm:$0x3]  ;;  %vm6734_vm4 = vmor %vm232_vm1, %vm233_vm2  ;;  %v6740_v37 = vsel %vm718_vm0, %v5398_v5, 0 }
  0x11   : > { %v6744_v41 = vsel %vm718_vm0, %v6727_v26, 0  ;;  %vm1223_vm5 = vcmask 1042432   ;;  %vm1224_vm6 = vcmask 1046532   ;;  %s5676_s15 = sshll.u32 %s8497_s13, 7  ;;  %s5105_s19 = sshll.u32 %s8497_s13, 1  ;;  %vm5008_vm8 = vcmask 1040384  }
  0x12   : > { %s6708_s25 = scalar_lea.vmem %s8425_s0, %s6531_s22  ;;  %vm6960_vm7 = vmor %vm1223_vm5, %vm1224_vm6  ;;  %s8396_s18 = scalar_lea.vmem %s8427_s2, %s5676_s15 }
  0x13   : > { %v183_v6 = vld [vmem:[%s6708_s25] sm:$0xf]  ;;  %v184_v7 = vld [vmem:[%s6708_s25 + $0x4] sm:$0xf]  ;;  %v216_v8 = vld [vmem:[%s6708_s25 + $0x8] sm:$0x1]  ;;  %s181_s22 = scalar_lea.vmem %s8428_s3, %s5105_s19 }
  0x14   : > { %v236_v9 = vshrl.u32 %v183_v6, 16  ;;  %v239_v10 = vshll.u32 %v183_v6, 16  ;;  %v245_v11 = vshll.u32 %v184_v7, 16  ;;  %v249_v12 = vshrl.u32 %v184_v7, 16  ;;  %v5285_v13 = vld [vmem:[%s6708_s25 + $0xc] sm:$0xf] }
  0x15   : > { %v255_v14 = vshll.u32 %v216_v8, 16  ;;  %v6715_v15 = vld [vmem:[%s6708_s25 + $0x10] sm:$0xf]  ;;  %v6718_v16 = vld [vmem:[%s6708_s25 + $0x14] sm:$0x1]  ;;  %v2040_v23 = vshrl.u32 %v5285_v13, 16 }
  0x16   : > { %v238_v18 = vrot.slane %v236_v9, 4  ;;  %v241_v19 = vrot.slane %v239_v10, 5  ;;  %v247_v20 = vrot.slane %v245_v11, 5  ;;  %v251_v21 = vrot.slane %v249_v12, 4  ;;  %v185_v31 = vld [vmem:[%s6708_s25 + $0xc] sm:$0xf] }
  0x17   : > { %v257_v22 = vrot.slane %v255_v14, 5  ;;  %v2043_v24 = vshll.u32 %v5285_v13, 16  ;;  %v2049_v25 = vshll.u32 %v6715_v15, 16  ;;  %v2053_v29 = vshrl.u32 %v6715_v15, 16  ;;  %v186_v36 = vld [vmem:[%s6708_s25 + $0x10] sm:$0xf] }
  0x18   : > { %v242_v27 = vor.u32 %v241_v19, %v238_v18  ;;  %v252_v28 = vor.u32 %v251_v21, %v247_v20  ;;  %v2059_v30 = vshll.u32 %v6718_v16, 16  ;;  %v2042_v33 = vrot.slane %v2040_v23, 4  ;;  %v217_v44 = vld [vmem:[%s6708_s25 + $0x14] sm:$0x1]  ;;  %v5288_v55 = vld [vmem:[%s6708_s25 + $0x18] sm:$0xf] }
  0x19   : > { %v2045_v34 = vrot.slane %v2043_v24, 5  ;;  %v2051_v35 = vrot.slane %v2049_v25, 5  ;;  %v2055_v40 = vrot.slane %v2053_v29, 4  ;;  %v260_v45 = vshrl.u32 %v185_v31, 16  ;;  %v6753_v60 = vld [vmem:[%s6708_s25 + $0x1c] sm:$0xf] }
  0x1a   : > { %v243_v38 = vrot.slane %v242_v27, 4  ;;  %v253_v39 = vrot.slane %v252_v28, 4  ;;  %v2061_v43 = vrot.slane %v2059_v30, 5  ;;  %v263_v46 = vshll.u32 %v185_v31, 16  ;;  %v6761_v1 = vld [vmem:[%s6708_s25 + $0x20] sm:$0x1] }
  0x1b   : > { %v2046_v42 = vor.u32 %v2045_v34, %v2042_v33  ;;  %v2056_v49 = vor.u32 %v2055_v40, %v2051_v35  ;;  %v269_v50 = vshll.u32 %v186_v36, 16  ;;  %v262_v53 = vrot.slane %v260_v45, 4  ;;  %v187_v18 = vld [vmem:[%s6708_s25 + $0x18] sm:$0xf]  ;;  %v188_v23 = vld [vmem:[%s6708_s25 + $0x1c] sm:$0xf] }
  0x1c   : > { %v248_v47 = vsel %vm6734_vm4, %v243_v38, %v247_v20  ;;  %v258_v48 = vsel %vm6734_vm4, %v253_v39, %v257_v22  ;;  %v265_v54 = vrot.slane %v263_v46, 5  ;;  %v273_v58 = vshrl.u32 %v186_v36, 16  ;;  %v218_v31 = vld [vmem:[%s6708_s25 + $0x20] sm:$0x1]  ;;  %v5291_v40 = vld [vmem:[%s6708_s25 + $0x24] sm:$0xf] }
  0x1d   : > { %v5107_v51 = vcombine.low %v248_v47, %v258_v48  ;;  %v2047_v52 = vrot.slane %v2046_v42, 4  ;;  %v2057_v56 = vrot.slane %v2056_v49, 4  ;;  %v271_v57 = vrot.slane %v269_v50, 5  ;;  %v6784_v46 = vld [vmem:[%s6708_s25 + $0x28] sm:$0xf] }
  0x1e   : > { %v279_v59 = vshll.u32 %v217_v44, 16  ;;  %v2783_v62 = vrot.slane %v6715_v15, 5  ;;  %v2786_v63 = vrot.slane %v6718_v16, 5  ;;  %v266_v0 = vor.u32 %v265_v54, %v262_v53  ;;  %v6793_v54 = vld [vmem:[%s6708_s25 + $0x2c] sm:$0x1] }
  0x1f   : > { %5959 = vmatprep.mubr.msk.bf16.mxu1 %vm669_vm3, %v5107_v51  ;;  %v2052_v61 = vsel %vm6734_vm4, %v2047_v52, %v2051_v35  ;;  %v2062_v2 = vsel %vm6734_vm4, %v2057_v56, %v2061_v43  ;;  %v275_v4 = vrot.slane %v273_v58, 4  ;;  %v2064_v6 = vshrl.u32 %v5288_v55, 16  ;;  %v5187_v51 = vld [vmem:[%s8426_s1 + $0x4] sm:$0x3]  ;;  %v6993_v16 = vld [vmem:[%s6708_s25 + $0x7c] sm:$0xf] }
  0x20   : > { %v281_v5 = vrot.slane %v279_v59, 5  ;;  %v5334_v7 = vcombine.low %v2052_v61, %v2062_v2  ;;  %v267_v8 = vrot.slane %v266_v0, 4  ;;  %v2067_v9 = vshll.u32 %v5288_v55, 16  ;;  %v189_v0 = vld [vmem:[%s6708_s25 + $0x24] sm:$0xf] }
  0x21   : > { %v2073_v10 = vshll.u32 %v6753_v60, 16  ;;  %v276_v11 = vor.u32 %v275_v4, %v271_v57  ;;  %v2066_v12 = vrot.slane %v2064_v6, 4  ;;  %v2077_v13 = vshrl.u32 %v6753_v60, 16 }
  0x22   : > { %v2083_v14 = vshll.u32 %v6761_v1, 16  ;;  %6095 = vmatprep.mubr.msk.bf16.mxu0 %vm669_vm3, %v5334_v7  ;;  %v272_v19 = vsel %vm6734_vm4, %v267_v8, %v271_v57  ;;  %v2069_v20 = vrot.slane %v2067_v9, 5  ;;  %v2790_v22 = vrot.slane %v6753_v60, 5  ;;  %v190_v7 = vld [vmem:[%s6708_s25 + $0x28] sm:$0xf] }
  0x23   : > { %v2075_v21 = vrot.slane %v2073_v10, 5  ;;  %v277_v24 = vrot.slane %v276_v11, 4  ;;  %v2079_v25 = vrot.slane %v2077_v13, 4  ;;  %v2793_v28 = vrot.slane %v6761_v1, 5  ;;  %v219_v13 = vld [vmem:[%s6708_s25 + $0x2c] sm:$0x1] }
  0x24   : > { %v2085_v27 = vrot.slane %v2083_v14, 5  ;;  %v2070_v29 = vor.u32 %v2069_v20, %v2066_v12  ;;  %v6777_v30 = vrot.slane %v2790_v22, 4  ;;  %v284_v33 = vshrl.u32 %v187_v18, 16 }
  0x25   : > { %v287_v34 = vshll.u32 %v187_v18, 16  ;;  %v282_v35 = vsel %vm6734_vm4, %v277_v24, %v281_v5  ;;  %v2080_v36 = vor.u32 %v2079_v25, %v2075_v21  ;;  %v293_v38 = vshll.u32 %v188_v23, 16  ;;  %v5294_v24 = vld [vmem:[%s6708_s25 + $0x30] sm:$0xf] }
  0x26   : > { %v297_v39 = vshrl.u32 %v188_v23, 16  ;;  %v5108_v42 = vcombine.low %v272_v19, %v282_v35  ;;  %v2071_v43 = vrot.slane %v2070_v29, 4  ;;  %v286_v44 = vrot.slane %v284_v33, 4  ;;  %v6813_v33 = vld [vmem:[%s6708_s25 + $0x34] sm:$0xf] }
  0x27   : > { %v289_v45 = vrot.slane %v287_v34, 5  ;;  %v2081_v47 = vrot.slane %v2080_v36, 4  ;;  %v295_v48 = vrot.slane %v293_v38, 5  ;;  %v303_v50 = vshll.u32 %v218_v31, 16 }
  0x28   : > { %v299_v49 = vrot.slane %v297_v39, 4  ;;  %5960 = vmatmul.mubr.msk.bf16.vlgmr.msra.gmra.mrb[0].mxu1 %vm669_vm3, %v5108_v42  ;;  %v2076_v52 = vsel %vm6734_vm4, %v2071_v43, %v2075_v21  ;;  %v2088_v55 = vshrl.u32 %v5291_v40, 16  ;;  %v2091_v56 = vshll.u32 %v5291_v40, 16  ;;  %v6821_v40 = vld [vmem:[%s6708_s25 + $0x38] sm:$0x1] }
  0x29   : > { %v290_v53 = vor.u32 %v289_v45, %v286_v44  ;;  %5992 = vmatpush3.bf16.msra.mxu1 %v6721_v17  ;;  %v2086_v57 = vsel %vm6734_vm4, %v2081_v47, %v2085_v27  ;;  %v305_v59 = vrot.slane %v303_v50, 5  ;;  %v2097_v61 = vshll.u32 %v6784_v46, 16 }
  0x2a   : > { %v300_v58 = vor.u32 %v299_v49, %v295_v48  ;;  %v5335_v2 = vcombine.low %v2076_v52, %v2086_v57  ;;  %v2090_v5 = vrot.slane %v2088_v55, 4  ;;  %v2093_v6 = vrot.slane %v2091_v56, 5  ;;  %6523 = vmatprep.subr.msk.bf16.mxu1 %vm718_vm0, %v5187_v51  ;;  %v191_v52 = vld [vmem:[%s6708_s25 + $0x30] sm:$0xf] }
  0x2b   : > { %v291_v4 = vrot.slane %v290_v53, 4  ;;  %v2099_v9 = vrot.slane %v2097_v61, 5  ;;  %v2101_v17 = vshrl.u32 %v6784_v46, 16  ;;  %v2107_v10 = vshll.u32 %v6793_v54, 16 }
  0x2c   : > { %v301_v8 = vrot.slane %v300_v58, 4  ;;  %6096 = vmatmul.mubr.msk.bf16.vlgmr.msra.gmra.mrb[0].mxu0 %vm669_vm3, %v5335_v2  ;;  %v2094_v12 = vor.u32 %v2093_v6, %v2090_v5  ;;  %v308_v14 = vshrl.u32 %v189_v0, 16  ;;  %v311_v18 = vshll.u32 %v189_v0, 16  ;;  %v192_v58 = vld [vmem:[%s6708_s25 + $0x34] sm:$0xf] }
  0x2d   : > { %v296_v11 = vsel %vm6734_vm4, %v291_v4, %v295_v48  ;;  %6128 = vmatpush3.bf16.msra.mxu0 %v6740_v37  ;;  %v2103_v20 = vrot.slane %v2101_v17, 4  ;;  %v2109_v21 = vrot.slane %v2107_v10, 5  ;;  %v317_v23 = vshll.u32 %v190_v7, 16  ;;  %v220_v4 = vld [vmem:[%s6708_s25 + $0x38] sm:$0x1] }
  0x2e   : > { %v306_v19 = vsel %vm6734_vm4, %v301_v8, %v305_v59  ;;  %v2095_v27 = vrot.slane %v2094_v12, 4  ;;  %v310_v29 = vrot.slane %v308_v14, 4  ;;  %v313_v31 = vrot.slane %v311_v18, 5  ;;  %6528 = vmatprep.subr.msk.bf16.mxu0 %vm718_vm0, %v6727_v26  ;;  %v5297_v12 = vld [vmem:[%s6708_s25 + $0x3c] sm:$0xf] }
  0x2f   : > { %v5109_v25 = vcombine.low %v296_v11, %v306_v19  ;;  %v2104_v34 = vor.u32 %v2103_v20, %v2099_v9  ;;  %v319_v35 = vrot.slane %v317_v23, 5  ;;  %v321_v37 = vshrl.u32 %v190_v7, 16  ;;  %v6838_v20 = vld [vmem:[%s6708_s25 + $0x40] sm:$0xf] }
  0x30   : > { %v327_v36 = vshll.u32 %v219_v13, 16  ;;  %v2100_v38 = vsel %vm6734_vm4, %v2095_v27, %v2099_v9  ;;  %v314_v39 = vor.u32 %v313_v31, %v310_v29  ;;  %v2112_v42 = vshrl.u32 %v5294_v24, 16 }
  0x31   : > { %5963 = vmatprep.mubr.msk.bf16.mxu1 %vm669_vm3, %v5109_v25  ;;  %v2115_v43 = vshll.u32 %v5294_v24, 16  ;;  %v2105_v44 = vrot.slane %v2104_v34, 4  ;;  %v323_v45 = vrot.slane %v321_v37, 4  ;;  %v2121_v26 = vshll.u32 %v6813_v33, 16  ;;  %v6843_v34 = vld [vmem:[%s6708_s25 + $0x44] sm:$0x1] }
  0x32   : > { %v329_v47 = vrot.slane %v327_v36, 5  ;;  %v315_v48 = vrot.slane %v314_v39, 4  ;;  %v2114_v49 = vrot.slane %v2112_v42, 4  ;;  %v2125_v51 = vshrl.u32 %v6813_v33, 16  ;;  %v193_v42 = vld [vmem:[%s6708_s25 + $0x3c] sm:$0xf] }
  0x33   : > { %v2117_v50 = vrot.slane %v2115_v43, 5  ;;  %v2110_v53 = vsel %vm6734_vm4, %v2105_v44, %v2109_v21  ;;  %v324_v55 = vor.u32 %v323_v45, %v319_v35  ;;  %v2123_v56 = vrot.slane %v2121_v26, 5  ;;  %v194_v26 = vld [vmem:[%s6708_s25 + $0x40] sm:$0xf] }
  0x34   : > { %v2131_v57 = vshll.u32 %v6821_v40, 16  ;;  %v5336_v59 = vcombine.low %v2100_v38, %v2110_v53  ;;  %v320_v61 = vsel %vm6734_vm4, %v315_v48, %v319_v35  ;;  %v2127_v2 = vrot.slane %v2125_v51, 4 }
  0x35   : > { %v2118_v0 = vor.u32 %v2117_v50, %v2114_v49  ;;  %v325_v5 = vrot.slane %v324_v55, 4  ;;  %v332_v7 = vshrl.u32 %v191_v52, 16  ;;  %v335_v8 = vshll.u32 %v191_v52, 16 }
  0x36   : > { %v2133_v6 = vrot.slane %v2131_v57, 5  ;;  %6099 = vmatprep.mubr.msk.bf16.mxu0 %vm669_vm3, %v5336_v59  ;;  %v2128_v17 = vor.u32 %v2127_v2, %v2123_v56  ;;  %v341_v10 = vshll.u32 %v192_v58, 16  ;;  %v345_v11 = vshrl.u32 %v192_v58, 16  ;;  %v5300_v2 = vld [vmem:[%s6708_s25 + $0x48] sm:$0xf] }
  0x37   : > { %v2119_v9 = vrot.slane %v2118_v0, 4  ;;  %v330_v13 = vsel %vm6734_vm4, %v325_v5, %v329_v47  ;;  %v334_v14 = vrot.slane %v332_v7, 4  ;;  %v337_v18 = vrot.slane %v335_v8, 5  ;;  %v6861_v8 = vld [vmem:[%s6708_s25 + $0x4c] sm:$0xf] }
  0x38   : > { %v351_v19 = vshll.u32 %v220_v4, 16  ;;  %v5110_v21 = vcombine.low %v320_v61, %v330_v13  ;;  %v2129_v24 = vrot.slane %v2128_v17, 4  ;;  %v343_v25 = vrot.slane %v341_v10, 5  ;;  %v221_v61 = vld [vmem:[%s6708_s25 + $0x44] sm:$0x1] }
  0x39   : > { %v2124_v23 = vsel %vm6734_vm4, %v2119_v9, %v2123_v56  ;;  %v338_v27 = vor.u32 %v337_v18, %v334_v14  ;;  %v347_v29 = vrot.slane %v345_v11, 4  ;;  %v2136_v35 = vshrl.u32 %v5297_v12, 16 }
  0x3a   : > { %v353_v31 = vrot.slane %v351_v19, 5  ;;  %5964 = vmatmul.mubr.msk.bf16.gmra.mrb[4].mxu1 %vm669_vm3, %v5110_v21  ;;  %v2134_v37 = vsel %vm6734_vm4, %v2129_v24, %v2133_v6  ;;  %v2139_v36 = vshll.u32 %v5297_v12, 16  ;;  %v2145_v38 = vshll.u32 %v6838_v20, 16 }
  0x3b   : > { %v2149_v39 = vshrl.u32 %v6838_v20, 16  ;;  %v5337_v43 = vcombine.low %v2124_v23, %v2134_v37  ;;  %v339_v44 = vrot.slane %v338_v27, 4  ;;  %v348_v45 = vor.u32 %v347_v29, %v343_v25  ;;  %v6869_v23 = vld [vmem:[%s6708_s25 + $0x50] sm:$0x1]  ;;  %v6873_v27 = vld [vmem:[%s6708_s25 + $0x48] sm:$0xf] }
  0x3c   : > { %v2138_v47 = vrot.slane %v2136_v35, 4  ;;  %v2141_v48 = vrot.slane %v2139_v36, 5  ;;  %v2147_v49 = vrot.slane %v2145_v38, 5  ;;  %v2155_v51 = vshll.u32 %v6843_v34, 16  ;;  %v6876_v36 = vld [vmem:[%s6708_s25 + $0x4c] sm:$0xf] }
  0x3d   : > { %v2151_v50 = vrot.slane %v2149_v39, 4  ;;  %6100 = vmatmul.mubr.msk.bf16.gmra.mrb[4].mxu0 %vm669_vm3, %v5337_v43  ;;  %v344_v52 = vsel %vm6734_vm4, %v339_v44, %v343_v25  ;;  %v349_v53 = vrot.slane %v348_v45, 4  ;;  %v356_v55 = vshrl.u32 %v193_v42, 16 }
  0x3e   : > { %v359_v56 = vshll.u32 %v193_v42, 16  ;;  %v2142_v57 = vor.u32 %v2141_v48, %v2138_v47  ;;  %v2157_v59 = vrot.slane %v2155_v51, 5  ;;  %v365_v0 = vshll.u32 %v194_v26, 16 }
  0x3f   : > { %v2152_v58 = vor.u32 %v2151_v50, %v2147_v49  ;;  %v354_v4 = vsel %vm6734_vm4, %v349_v53, %v353_v31  ;;  %v358_v5 = vrot.slane %v356_v55, 4  ;;  %v369_v7 = vshrl.u32 %v194_v26, 16  ;;  %v222_v26 = vld [vmem:[%s6708_s25 + $0x50] sm:$0x1]  ;;  %v5303_v53 = vld [vmem:[%s6708_s25 + $0x54] sm:$0xf] }
  0x40   : > { %v361_v6 = vrot.slane %v359_v56, 5  ;;  %v5111_v9 = vcombine.low %v344_v52, %v354_v4  ;;  %v2143_v17 = vrot.slane %v2142_v57, 4  ;;  %v367_v11 = vrot.slane %v365_v0, 5  ;;  %v6892_v4 = vld [vmem:[%s6708_s25 + $0x58] sm:$0xf] }
  0x41   : > { %v2153_v10 = vrot.slane %v2152_v58, 4  ;;  %v371_v13 = vrot.slane %v369_v7, 4  ;;  %v375_v14 = vshll.u32 %v221_v61, 16  ;;  %v2160_v18 = vshrl.u32 %v5300_v2, 16 }
  0x42   : > { %v362_v12 = vor.u32 %v361_v6, %v358_v5  ;;  %5967 = vmatprep.mubr.msk.bf16.mxu1 %vm669_vm3, %v5111_v9  ;;  %v2148_v19 = vsel %vm6734_vm4, %v2143_v17, %v2147_v49  ;;  %v2163_v24 = vshll.u32 %v5300_v2, 16  ;;  %v2169_v25 = vshll.u32 %v6861_v8, 16 }
  0x43   : > { %v2158_v21 = vsel %vm6734_vm4, %v2153_v10, %v2157_v59  ;;  %v372_v35 = vor.u32 %v371_v13, %v367_v11  ;;  %v377_v37 = vrot.slane %v375_v14, 5  ;;  %v2162_v38 = vrot.slane %v2160_v18, 4 }
  0x44   : > { %v5338_v29 = vcombine.low %v2148_v19, %v2158_v21  ;;  %v363_v31 = vrot.slane %v362_v12, 4  ;;  %v2165_v39 = vrot.slane %v2163_v24, 5  ;;  %v2171_v42 = vrot.slane %v2169_v25, 5  ;;  %v6898_v12 = vld [vmem:[%s6708_s25 + $0x5c] sm:$0x1] }
  0x45   : > { %v2173_v43 = vshrl.u32 %v6861_v8, 16  ;;  %v373_v45 = vrot.slane %v372_v35, 4  ;;  %v2179_v47 = vshll.u32 %v6869_v23, 16  ;;  %v380_v48 = vshrl.u32 %v6873_v27, 16  ;;  %v6902_v24 = vld [vmem:[%s6708_s25 + $0x54] sm:$0xf] }
  0x46   : > { %6103 = vmatprep.mubr.msk.bf16.mxu0 %vm669_vm3, %v5338_v29  ;;  %v368_v44 = vsel %vm6734_vm4, %v363_v31, %v367_v11  ;;  %v2166_v49 = vor.u32 %v2165_v39, %v2162_v38  ;;  %v383_v51 = vshll.u32 %v6873_v27, 16  ;;  %v389_v52 = vshll.u32 %v6876_v36, 16 }
  0x47   : > { %v2175_v50 = vrot.slane %v2173_v43, 4  ;;  %v378_v55 = vsel %vm6734_vm4, %v373_v45, %v377_v37  ;;  %v2181_v56 = vrot.slane %v2179_v47, 5  ;;  %v382_v57 = vrot.slane %v380_v48, 4  ;;  %v6908_v37 = vld [vmem:[%s6708_s25 + $0x58] sm:$0xf] }
  0x48   : > { %v393_v58 = vshrl.u32 %v6876_v36, 16  ;;  %v5112_v59 = vcombine.low %v368_v44, %v378_v55  ;;  %v2167_v61 = vrot.slane %v2166_v49, 4  ;;  %v385_v2 = vrot.slane %v383_v51, 5 }
  0x49   : > { %v2176_v0 = vor.u32 %v2175_v50, %v2171_v42  ;;  %v391_v5 = vrot.slane %v389_v52, 5  ;;  %v399_v7 = vshll.u32 %v222_v26, 16  ;;  %v2184_v9 = vshrl.u32 %v5303_v53, 16  ;;  %v223_v26 = vld [vmem:[%s6708_s25 + $0x5c] sm:$0x1] }
  0x4a   : > { %v395_v6 = vrot.slane %v393_v58, 4  ;;  %5968 = vmatmul.mubr.msk.bf16.gmra.mrb[8].mxu1 %vm669_vm3, %v5112_v59  ;;  %v2172_v17 = vsel %vm6734_vm4, %v2167_v61, %v2171_v42  ;;  %v386_v11 = vor.u32 %v385_v2, %v382_v57  ;;  %v2187_v13 = vshll.u32 %v5303_v53, 16  ;;  %v5306_v53 = vld [vmem:[%s6708_s25 + $0x60] sm:$0xf]  ;;  %v6922_v59 = vld [vmem:[%s6708_s25 + $0x64] sm:$0xf] }
  0x4b   : > { %v2177_v10 = vrot.slane %v2176_v0, 4  ;;  %v401_v18 = vrot.slane %v399_v7, 5  ;;  %v2186_v19 = vrot.slane %v2184_v9, 4  ;;  %v2193_v21 = vshll.u32 %v6892_v4, 16  ;;  %v6929_v9 = vld [vmem:[%s6708_s25 + $0x68] sm:$0x1] }
  0x4c   : > { %v396_v14 = vor.u32 %v395_v6, %v391_v5  ;;  %v387_v29 = vrot.slane %v386_v11, 4  ;;  %v2189_v31 = vrot.slane %v2187_v13, 5  ;;  %v2197_v35 = vshrl.u32 %v6892_v4, 16 }
  0x4d   : > { %v2182_v25 = vsel %vm6734_vm4, %v2177_v10, %v2181_v56  ;;  %v2195_v42 = vrot.slane %v2193_v21, 5  ;;  %v2203_v43 = vshll.u32 %v6898_v12, 16  ;;  %v404_v48 = vshrl.u32 %v6902_v24, 16 }
  0x4e   : > { %v5339_v38 = vcombine.low %v2172_v17, %v2182_v25  ;;  %v397_v39 = vrot.slane %v396_v14, 4  ;;  %v392_v44 = vsel %vm6734_vm4, %v387_v29, %v391_v5  ;;  %v2190_v45 = vor.u32 %v2189_v31, %v2186_v19  ;;  %v6933_v19 = vld [vmem:[%s6708_s25 + $0x60] sm:$0xf] }
  0x4f   : > { %v2199_v47 = vrot.slane %v2197_v35, 4  ;;  %v2205_v50 = vrot.slane %v2203_v43, 5  ;;  %v407_v51 = vshll.u32 %v6902_v24, 16  ;;  %v413_v52 = vshll.u32 %v6908_v37, 16  ;;  %v6939_v35 = vld [vmem:[%s6708_s25 + $0x64] sm:$0xf] }
  0x50   : > { %6104 = vmatmul.mubr.msk.bf16.gmra.mrb[8].mxu0 %vm669_vm3, %v5339_v38  ;;  %v402_v49 = vsel %vm6734_vm4, %v397_v39, %v401_v18  ;;  %v2191_v56 = vrot.slane %v2190_v45, 4  ;;  %v406_v58 = vrot.slane %v404_v48, 4  ;;  %v417_v2 = vshrl.u32 %v6908_v37, 16 }
  0x51   : > { %v5113_v55 = vcombine.low %v392_v44, %v402_v49  ;;  %v2200_v57 = vor.u32 %v2199_v47, %v2195_v42  ;;  %v409_v61 = vrot.slane %v407_v51, 5  ;;  %v415_v0 = vrot.slane %v413_v52, 5 }
  0x52   : > { %v423_v5 = vshll.u32 %v223_v26, 16  ;;  %v2196_v6 = vsel %vm6734_vm4, %v2191_v56, %v2195_v42  ;;  %v2208_v17 = vshrl.u32 %v5306_v53, 16  ;;  %v2211_v10 = vshll.u32 %v5306_v53, 16 }
  0x53   : > { %5971 = vmatprep.mubr.msk.bf16.mxu1 %vm669_vm3, %v5113_v55  ;;  %v2201_v7 = vrot.slane %v2200_v57, 4  ;;  %v410_v11 = vor.u32 %v409_v61, %v406_v58  ;;  %v419_v13 = vrot.slane %v417_v2, 4  ;;  %v2217_v18 = vshll.u32 %v6922_v59, 16  ;;  %v5366_v58 = vld [vmem:[%s6708_s25 + $0xc] sm:$0xe] }
  0x54   : > { %v425_v14 = vrot.slane %v423_v5, 5  ;;  %v2210_v25 = vrot.slane %v2208_v17, 4  ;;  %v2213_v29 = vrot.slane %v2211_v10, 5  ;;  %v2221_v31 = vshrl.u32 %v6922_v59, 16 }
  0x55   : > { %v2206_v21 = vsel %vm6734_vm4, %v2201_v7, %v2205_v50  ;;  %v411_v39 = vrot.slane %v410_v11, 4  ;;  %v420_v42 = vor.u32 %v419_v13, %v415_v0  ;;  %v2219_v43 = vrot.slane %v2217_v18, 5  ;;  %v224_v50 = vld [vmem:[%s6708_s25 + $0x68] sm:$0x1] }
  0x56   : > { %v5340_v38 = vcombine.low %v2196_v6, %v2206_v21  ;;  %v2214_v44 = vor.u32 %v2213_v29, %v2210_v25  ;;  %v2223_v45 = vrot.slane %v2221_v31, 4  ;;  %v2227_v47 = vshll.u32 %v6929_v9, 16  ;;  %v6967_v29 = vld [vmem:[%s6708_s25 + $0x70] sm:$0xf] }
  0x57   : > { %v428_v26 = vshrl.u32 %v6933_v19, 16  ;;  %v416_v48 = vsel %vm6734_vm4, %v411_v39, %v415_v0  ;;  %v421_v49 = vrot.slane %v420_v42, 4  ;;  %v431_v51 = vshll.u32 %v6933_v19, 16  ;;  %v6954_v0 = vld [vmem:[%s6708_s25 + $0x6c] sm:$0xf] }
  0x58   : > { %6107 = vmatprep.mubr.msk.bf16.mxu0 %vm669_vm3, %v5340_v38  ;;  %v437_v52 = vshll.u32 %v6939_v35, 16  ;;  %v2215_v53 = vrot.slane %v2214_v44, 4  ;;  %v2224_v55 = vor.u32 %v2223_v45, %v2219_v43  ;;  %v2229_v56 = vrot.slane %v2227_v47, 5 }
  0x59   : > { %v430_v57 = vrot.slane %v428_v26, 4  ;;  %v426_v61 = vsel %vm6734_vm4, %v421_v49, %v425_v14  ;;  %v433_v2 = vrot.slane %v431_v51, 5  ;;  %v441_v6 = vshrl.u32 %v6939_v35, 16  ;;  %v225_v26 = vld [vmem:[%s6708_s25 + $0x74] sm:$0x1] }
  0x5a   : > { %v439_v5 = vrot.slane %v437_v52, 5  ;;  %v5114_v7 = vcombine.low %v416_v48, %v426_v61  ;;  %v2220_v17 = vsel %vm6734_vm4, %v2215_v53, %v2219_v43  ;;  %v2225_v10 = vrot.slane %v2224_v55, 4  ;;  %v5367_v48 = vld [vmem:[%s6708_s25 + $0x18] sm:$0xe] }
  0x5b   : > { %v447_v11 = vshll.u32 %v224_v50, 16  ;;  %v434_v14 = vor.u32 %v433_v2, %v430_v57  ;;  %v443_v18 = vrot.slane %v441_v6, 4  ;;  %v5382_v21 = vrot.slane %v5366_v58, 9  ;;  %v6986_v53 = vld [vmem:[%s6708_s25 + $0x78] sm:$0xf] }
  0x5c   : > { %v2785_v25 = vrot.slane %v2783_v62, 4  ;;  %5972 = vmatmul.mubr.msk.bf16.gmra.mrb[12].mxu1 %vm669_vm3, %v5114_v7  ;;  %v2230_v31 = vsel %vm6734_vm4, %v2225_v10, %v2229_v56  ;;  %v452_v39 = vshrl.u32 %v6954_v0, 16  ;;  %v455_v42 = vshll.u32 %v6954_v0, 16  ;;  %v226_v57 = vld [vmem:[%s6708_s25 + $0x80] sm:$0x1] }
  0x5d   : > { %v449_v38 = vrot.slane %v447_v11, 5  ;;  %v5341_v43 = vcombine.low %v2220_v17, %v2230_v31  ;;  %v435_v44 = vrot.slane %v434_v14, 4  ;;  %v444_v45 = vor.u32 %v443_v18, %v439_v5  ;;  %v5368_v10 = vld [vmem:[%s6708_s25 + $0x24] sm:$0xe] }
  0x5e   : > { %v2784_v47 = vsel %vm6960_vm7, %v5382_v21, %v2783_v62  ;;  %v2787_v49 = vsel %vm6960_vm7, %v2785_v25, %v2786_v63  ;;  %v454_v50 = vrot.slane %v452_v39, 4  ;;  %v457_v51 = vrot.slane %v455_v42, 5  ;;  %v7012_v39 = vld [vmem:[%s6708_s25 + $0x84] sm:$0xf] }
  0x5f   : > { %v461_v52 = vshll.u32 %v6967_v29, 16  ;;  %6108 = vmatmul.mubr.msk.bf16.gmra.mrb[12].mxu0 %vm669_vm3, %v5341_v43  ;;  %v440_v15 = vsel %vm6734_vm4, %v435_v44, %v439_v5  ;;  %v445_v62 = vrot.slane %v444_v45, 4  ;;  %v5399_v55 = vcombine.low %v2784_v47, %v2787_v49  ;;  %v7020_v43 = vld [vmem:[%s6708_s25 + $0x88] sm:$0xf] }
  0x60   : > { %v465_v56 = vshrl.u32 %v6967_v29, 16  ;;  %v458_v63 = vor.u32 %v457_v51, %v454_v50  ;;  %v471_v61 = vshll.u32 %v225_v26, 16  ;;  %v5383_v2 = vrot.slane %v5367_v48, 9 }
  0x61   : > { %v463_v58 = vrot.slane %v461_v52, 5  ;;  %v450_v6 = vsel %vm6734_vm4, %v445_v62, %v449_v38  ;;  %6129 = vmatprep.mubr.msk.bf16.mxu0 %vm669_vm3, %v5399_v55  ;;  %v2794_v5 = vsel %vm6960_vm7, %v6777_v30, %v2793_v28  ;;  %v476_v17 = vshrl.u32 %v6986_v53, 16  ;;  %v227_v52 = vld [vmem:[%s6708_s25 + $0x8c] sm:$0x1] }
  0x62   : > { %v467_v7 = vrot.slane %v465_v56, 4  ;;  %v5115_v11 = vcombine.low %v440_v15, %v450_v6  ;;  %v459_v14 = vrot.slane %v458_v63, 4  ;;  %v473_v18 = vrot.slane %v471_v61, 5 }
  0x63   : > { %v2791_v21 = vsel %vm6960_vm7, %v5383_v2, %v2790_v22  ;;  %v478_v38 = vrot.slane %v476_v17, 4  ;;  %v479_v1 = vshll.u32 %v6986_v53, 16  ;;  %v485_v30 = vshll.u32 %v6993_v16, 16  ;;  %v7025_v22 = vld [vmem:[%s8426_s1 + $0xe] sm:$0x3] }
  0x64   : > { %v468_v25 = vor.u32 %v467_v7, %v463_v58  ;;  %v5400_v31 = vcombine.low %v2791_v21, %v2794_v5  ;;  %5975 = vmatprep.mubr.msk.bf16.mxu1 %vm669_vm3, %v5115_v11  ;;  %v464_v28 = vsel %vm6734_vm4, %v459_v14, %v463_v58  ;;  %v489_v60 = vshrl.u32 %v6993_v16, 16  ;;  %v7044_v5 = vld [vmem:[%s6708_s25 + $0x90] sm:$0xf] }
  0x65   : > { %v495_v42 = vshll.u32 %v226_v57, 16  ;;  %v481_v45 = vrot.slane %v479_v1, 5  ;;  %v5384_v47 = vrot.slane %v5368_v10, 9  ;;  %v2797_v26 = vrot.slane %v6784_v46, 5  ;;  %v5369_v57 = vld [vmem:[%s6708_s25 + $0x30] sm:$0xe] }
  0x66   : > { %v469_v44 = vrot.slane %v468_v25, 4  ;;  %v487_v48 = vrot.slane %v485_v30, 5  ;;  %v491_v49 = vrot.slane %v489_v60, 4  ;;  %v2800_v51 = vrot.slane %v6793_v54, 5  ;;  %v7056_v30 = vld [vmem:[%s6708_s25 + $0x94] sm:$0xf] }
  0x67   : > { %v497_v50 = vrot.slane %v495_v42, 5  ;;  %6130 = vmatmul.mubr.msk.bf16.vlgmr.msra.gmra.mrb[0].mxu0 %vm669_vm3, %v5400_v31  ;;  %v482_v62 = vor.u32 %v481_v45, %v478_v38  ;;  %v2798_v55 = vsel %vm6960_vm7, %v5384_v47, %v2797_v26  ;;  %v2799_v56 = vrot.slane %v2797_v26, 4  ;;  %v228_v60 = vld [vmem:[%s6708_s25 + $0x98] sm:$0x1]  ;;  %v5370_v26 = vld [vmem:[%s6708_s25 + $0x3c] sm:$0xe] }
  0x68   : > { %v474_v15 = vsel %vm6734_vm4, %v469_v44, %v473_v18  ;;  %6162 = vmatpush3.bf16.msra.mxu0 %v6744_v41  ;;  %v492_v46 = vor.u32 %v491_v49, %v487_v48  ;;  %v500_v58 = vshrl.u32 %v7012_v39, 16  ;;  %v503_v54 = vshll.u32 %v7012_v39, 16 }
  0x69   : > { %v5116_v63 = vcombine.low %v464_v28, %v474_v15  ;;  %v483_v61 = vrot.slane %v482_v62, 4  ;;  %v2801_v2 = vsel %vm6960_vm7, %v2799_v56, %v2800_v51  ;;  %v509_v6 = vshll.u32 %v7020_v43, 16  ;;  %6529 = vmatprep.subr.msk.bf16.mxu0 %vm718_vm0, %v7025_v22 }
  0x6a   : > { %v513_v7 = vshrl.u32 %v7020_v43, 16  ;;  %v493_v41 = vrot.slane %v492_v46, 4  ;;  %v5401_v17 = vcombine.low %v2798_v55, %v2801_v2  ;;  %v502_v10 = vrot.slane %v500_v58, 4  ;;  %v7076_v46 = vld [vmem:[%s6708_s25 + $0xa0] sm:$0xf] }
  0x6b   : > { %5976 = vmatmul.mubr.msk.bf16.gmra.mrb[16].mxu1 %vm669_vm3, %v5116_v63  ;;  %v505_v11 = vrot.slane %v503_v54, 5  ;;  %v488_v14 = vsel %vm6734_vm4, %v483_v61, %v487_v48  ;;  %v511_v18 = vrot.slane %v509_v6, 5  ;;  %v519_v25 = vshll.u32 %v227_v52, 16  ;;  %v7065_v52 = vld [vmem:[%s6708_s25 + $0x9c] sm:$0xf] }
  0x6c   : > { %v515_v21 = vrot.slane %v513_v7, 4  ;;  %v498_v31 = vsel %vm6734_vm4, %v493_v41, %v497_v50  ;;  %6133 = vmatprep.mubr.msk.bf16.mxu0 %vm669_vm3, %v5401_v17  ;;  %v5385_v1 = vrot.slane %v5369_v57, 9  ;;  %v2804_v28 = vrot.slane %v6813_v33, 5 }
  0x6d   : > { %v506_v38 = vor.u32 %v505_v11, %v502_v10  ;;  %v5117_v42 = vcombine.low %v488_v14, %v498_v31  ;;  %v521_v45 = vrot.slane %v519_v25, 5  ;;  %v2807_v47 = vrot.slane %v6821_v40, 5  ;;  %v229_v10 = vld [vmem:[%s6708_s25 + $0xa4] sm:$0x1]  ;;  %v5371_v11 = vld [vmem:[%s6708_s25 + $0x48] sm:$0xe] }
  0x6e   : > { %v516_v44 = vor.u32 %v515_v21, %v511_v18  ;;  %v2805_v49 = vsel %vm6960_vm7, %v5385_v1, %v2804_v28  ;;  %v2806_v50 = vrot.slane %v2804_v28, 4  ;;  %v524_v51 = vshrl.u32 %v7044_v5, 16 }
  0x6f   : > { %v507_v48 = vrot.slane %v506_v38, 4  ;;  %5979 = vmatprep.mubr.msk.bf16.mxu1 %vm669_vm3, %v5117_v42  ;;  %v527_v15 = vshll.u32 %v7044_v5, 16  ;;  %v533_v62 = vshll.u32 %v7056_v30, 16  ;;  %v537_v40 = vshrl.u32 %v7056_v30, 16 }
  0x70   : > { %v517_v33 = vrot.slane %v516_v44, 4  ;;  %v2808_v56 = vsel %vm6960_vm7, %v2806_v50, %v2807_v47  ;;  %v526_v57 = vrot.slane %v524_v51, 4  ;;  %v543_v63 = vshll.u32 %v228_v60, 16 }
  0x71   : > { %v512_v55 = vsel %vm6734_vm4, %v507_v48, %v511_v18  ;;  %v5402_v54 = vcombine.low %v2805_v49, %v2808_v56  ;;  %v529_v61 = vrot.slane %v527_v15, 5  ;;  %v535_v2 = vrot.slane %v533_v62, 5  ;;  %v7102_v56 = vld [vmem:[%s6708_s25 + $0xac] sm:$0xf] }
  0x72   : > { %v522_v58 = vsel %vm6734_vm4, %v517_v33, %v521_v45  ;;  %v539_v7 = vrot.slane %v537_v40, 4  ;;  %v545_v41 = vrot.slane %v543_v63, 5  ;;  %v5386_v17 = vrot.slane %v5370_v26, 9  ;;  %v7097_v33 = vld [vmem:[%s6708_s25 + $0xa8] sm:$0xf] }
  0x73   : > { %v5118_v6 = vcombine.low %v512_v55, %v522_v58  ;;  %6134 = vmatmul.mubr.msk.bf16.gmra.mrb[4].mxu0 %vm669_vm3, %v5402_v54  ;;  %v530_v14 = vor.u32 %v529_v61, %v526_v57  ;;  %v2811_v18 = vrot.slane %v6838_v20, 5  ;;  %v2814_v21 = vrot.slane %v6843_v34, 5  ;;  %v230_v61 = vld [vmem:[%s6708_s25 + $0xb0] sm:$0x1] }
  0x74   : > { %v548_v25 = vshrl.u32 %v7065_v52, 16  ;;  %v540_v31 = vor.u32 %v539_v7, %v535_v2  ;;  %v551_v38 = vshll.u32 %v7065_v52, 16  ;;  %v557_v1 = vshll.u32 %v7076_v46, 16 }
  0x75   : > { %5980 = vmatmul.mubr.msk.bf16.gmra.mrb[20].mxu1 %vm669_vm3, %v5118_v6  ;;  %v561_v28 = vshrl.u32 %v7076_v46, 16  ;;  %v531_v60 = vrot.slane %v530_v14, 4  ;;  %v2812_v42 = vsel %vm6960_vm7, %v5386_v17, %v2811_v18  ;;  %v2813_v20 = vrot.slane %v2811_v18, 4  ;;  %v7117_v14 = vld [vmem:[%s6708_s25 + $0xb4] sm:$0xf] }
  0x76   : > { %v550_v44 = vrot.slane %v548_v25, 4  ;;  %v541_v34 = vrot.slane %v540_v31, 4  ;;  %v553_v45 = vrot.slane %v551_v38, 5  ;;  %v559_v47 = vrot.slane %v557_v1, 5 }
  0x77   : > { %v563_v26 = vrot.slane %v561_v28, 4  ;;  %v536_v48 = vsel %vm6734_vm4, %v531_v60, %v535_v2  ;;  %v2815_v49 = vsel %vm6960_vm7, %v2813_v20, %v2814_v21  ;;  %v567_v50 = vshll.u32 %v229_v10, 16  ;;  %v5372_v2 = vld [vmem:[%s6708_s25 + $0x54] sm:$0xe] }
  0x78   : > { %v5387_v51 = vrot.slane %v5371_v11, 9  ;;  %v546_v15 = vsel %vm6734_vm4, %v541_v34, %v545_v41  ;;  %v5403_v62 = vcombine.low %v2812_v42, %v2815_v49  ;;  %v554_v40 = vor.u32 %v553_v45, %v550_v44  ;;  %v7126_v42 = vld [vmem:[%s6708_s25 + $0xb8] sm:$0xf]  ;;  %v231_v49 = vld [vmem:[%s6708_s25 + $0xbc] sm:$0x1] }
  0x79   : > { %v564_v55 = vor.u32 %v563_v26, %v559_v47  ;;  %v5119_v57 = vcombine.low %v536_v48, %v546_v15  ;;  %v569_v63 = vrot.slane %v567_v50, 5  ;;  %v2818_v58 = vrot.slane %v6861_v8, 5 }
  0x7a   : > { %v2821_v54 = vrot.slane %v6869_v23, 5  ;;  %6137 = vmatprep.mubr.msk.bf16.mxu0 %vm669_vm3, %v5403_v62  ;;  %v555_v6 = vrot.slane %v554_v40, 4  ;;  %v572_v41 = vshrl.u32 %v7097_v33, 16  ;;  %v575_v17 = vshll.u32 %v7097_v33, 16 }
  0x7b   : > { %v565_v7 = vrot.slane %v564_v55, 4  ;;  %5983 = vmatprep.mubr.msk.bf16.mxu1 %vm669_vm3, %v5119_v57  ;;  %v2819_v10 = vsel %vm6960_vm7, %v5387_v51, %v2818_v58  ;;  %v2820_v11 = vrot.slane %v2818_v58, 4  ;;  %v581_v8 = vshll.u32 %v7102_v56, 16  ;;  %v5373_v55 = vld [vmem:[%s6708_s25 + $0x60] sm:$0xe] }
  0x7c   : > { %v585_v23 = vshrl.u32 %v7102_v56, 16  ;;  %v560_v18 = vsel %vm6734_vm4, %v555_v6, %v559_v47  ;;  %v574_v25 = vrot.slane %v572_v41, 4  ;;  %v577_v31 = vrot.slane %v575_v17, 5  ;;  %v5374_v6 = vld [vmem:[%s6708_s25 + $0x6c] sm:$0xe] }
  0x7d   : > { %v570_v21 = vsel %vm6734_vm4, %v565_v7, %v569_v63  ;;  %v2822_v1 = vsel %vm6960_vm7, %v2820_v11, %v2821_v54  ;;  %v583_v28 = vrot.slane %v581_v8, 5  ;;  %v591_v34 = vshll.u32 %v230_v61, 16  ;;  %v5310_v11 = vld [vmem:[%s6708_s25 + $0x70] sm:$0xf]  ;;  %v5311_v8 = vld [vmem:[%s6708_s25 + $0x74] sm:$0x1] }
  0x7e   : > { %v5120_v38 = vcombine.low %v560_v18, %v570_v21  ;;  %v587_v60 = vrot.slane %v585_v23, 4  ;;  %v5404_v20 = vcombine.low %v2819_v10, %v2822_v1  ;;  %v578_v44 = vor.u32 %v577_v31, %v574_v25 }
  0x7f   : > { %v5388_v45 = vrot.slane %v5372_v2, 9  ;;  %v2825_v26 = vrot.slane %v6892_v4, 5  ;;  %v2828_v48 = vrot.slane %v6898_v12, 5  ;;  %v596_v50 = vshrl.u32 %v7117_v14, 16 }
  0x80   : > { %5984 = vmatmul.mubr.msk.bf16.gmra.mrb[24].mxu1 %vm669_vm3, %v5120_v38  ;;  %v588_v47 = vor.u32 %v587_v60, %v583_v28  ;;  %6138 = vmatmul.mubr.msk.bf16.gmra.mrb[8].mxu0 %vm669_vm3, %v5404_v20  ;;  %v579_v51 = vrot.slane %v578_v44, 4  ;;  %v593_v15 = vrot.slane %v591_v34, 5  ;;  %v599_v62 = vshll.u32 %v7117_v14, 16 }
  0x81   : > { %v605_v40 = vshll.u32 %v7126_v42, 16  ;;  %v2826_v4 = vsel %vm6960_vm7, %v5388_v45, %v2825_v26  ;;  %v2827_v12 = vrot.slane %v2825_v26, 4  ;;  %v598_v63 = vrot.slane %v596_v50, 4 }
  0x82   : > { %v589_v57 = vrot.slane %v588_v47, 4  ;;  %v584_v58 = vsel %vm6734_vm4, %v579_v51, %v583_v28  ;;  %v601_v54 = vrot.slane %v599_v62, 5  ;;  %v609_v2 = vshrl.u32 %v7126_v42, 16  ;;  %v5375_v47 = vld [vmem:[%s6708_s25 + $0x78] sm:$0xe] }
  0x83   : > { %v607_v61 = vrot.slane %v605_v40, 5  ;;  %v2829_v41 = vsel %vm6960_vm7, %v2827_v12, %v2828_v48  ;;  %v615_v17 = vshll.u32 %v231_v49, 16  ;;  %v5389_v10 = vrot.slane %v5373_v55, 9  ;;  %v6588_v51 = vld [vmem:[%s6708_s25] sm:$0xf] }
  0x84   : > { %v594_v7 = vsel %vm6734_vm4, %v589_v57, %v593_v15  ;;  %v5405_v18 = vcombine.low %v2826_v4, %v2829_v41  ;;  %v602_v21 = vor.u32 %v601_v54, %v598_v63  ;;  %v611_v25 = vrot.slane %v609_v2, 4  ;;  %v7164_v15 = vld [vmem:[%s6708_s25 + $0x4] sm:$0xf]  ;;  %v7168_v40 = vld [vmem:[%s6708_s25 + $0x7c] sm:$0xf] }
  0x85   : > { %v5121_v23 = vcombine.low %v584_v58, %v594_v7  ;;  %v617_v31 = vrot.slane %v615_v17, 5  ;;  %v2832_v38 = vrot.slane %v6922_v59, 5  ;;  %v2835_v1 = vrot.slane %v6929_v9, 5  ;;  %v7171_v55 = vld [vmem:[%s6708_s25 + $0x80] sm:$0x1] }
  0x86   : > { %v5390_v28 = vrot.slane %v5374_v6, 9  ;;  %6141 = vmatprep.mubr.msk.bf16.mxu0 %vm669_vm3, %v5405_v18  ;;  %v603_v60 = vrot.slane %v602_v21, 4  ;;  %v612_v20 = vor.u32 %v611_v25, %v607_v61  ;;  %v2839_v44 = vrot.slane %v5310_v11, 5  ;;  %v5316_v57 = vld [vmem:[%s6708_s25 + $0x88] sm:$0xf] }
  0x87   : > { %5987 = vmatprep.mubr.msk.bf16.mxu1 %vm669_vm3, %v5121_v23  ;;  %v2842_v34 = vrot.slane %v5311_v8, 5  ;;  %v2833_v45 = vsel %vm6960_vm7, %v5389_v10, %v2832_v38  ;;  %v2834_v59 = vrot.slane %v2832_v38, 4  ;;  %v5139_v62 = vcombine.low %v6588_v51, %v7164_v15  ;;  %v5317_v54 = vld [vmem:[%s6708_s25 + $0x8c] sm:$0x1]  ;;  %v5319_v17 = vld [vmem:[%s6708_s25 + $0x94] sm:$0xf] }
  0x88   : > { %v608_v9 = vsel %vm6734_vm4, %v603_v60, %v607_v61  ;;  %v613_v26 = vrot.slane %v612_v20, 4  ;;  %v2840_v48 = vsel %vm6960_vm7, %v5390_v28, %v2839_v44  ;;  %v2841_v49 = vrot.slane %v2839_v44, 4  ;;  %v5376_v61 = vld [vmem:[%s6708_s25 + $0x84] sm:$0xe]  ;;  %v5377_v23 = vld [vmem:[%s6708_s25 + $0x90] sm:$0xe] }
  0x89   : > { %v2836_v50 = vsel %vm6960_vm7, %v2834_v59, %v2835_v1  ;;  %v5391_v58 = vrot.slane %v5375_v47, 9  ;;  %v2846_v7 = vrot.slane %v7168_v40, 5  ;;  %v2849_v41 = vrot.slane %v7171_v55, 5  ;;  %v5320_v25 = vld [vmem:[%s6708_s25 + $0x98] sm:$0x1] }
  0x8a   : > { %v618_v4 = vsel %vm6734_vm4, %v613_v26, %v617_v31  ;;  %v5406_v12 = vcombine.low %v2833_v45, %v2836_v50  ;;  %v2843_v63 = vsel %vm6960_vm7, %v2841_v49, %v2842_v34  ;;  %v5392_v10 = vrot.slane %v5376_v61, 9  ;;  %v5322_v31 = vld [vmem:[%s6708_s25 + $0xa0] sm:$0xf]  ;;  %v5323_v60 = vld [vmem:[%s6708_s25 + $0xa4] sm:$0x1] }
  0x8b   : > { %v5122_v2 = vcombine.low %v608_v9, %v618_v4  ;;  %v5407_v6 = vcombine.low %v2840_v48, %v2843_v63  ;;  %v2853_v11 = vrot.slane %v5316_v57, 5  ;;  %v2856_v8 = vrot.slane %v5317_v54, 5  ;;  %v5378_v20 = vld [vmem:[%s6708_s25 + $0x9c] sm:$0xe]  ;;  %v6590_v44 = vld [vmem:[%s6708_s25 + $0xc] sm:$0xf] }
  0x8c   : > { %6142 = vmatmul.mubr.msk.bf16.gmra.mrb[12].mxu0 %vm669_vm3, %v5406_v12  ;;  %v2847_v18 = vsel %vm6960_vm7, %v5391_v58, %v2846_v7  ;;  %v2848_v21 = vrot.slane %v2846_v7, 4  ;;  %v2860_v28 = vrot.slane %v5319_v17, 5  ;;  %v7198_v34 = vld [vmem:[%s6708_s25 + $0x10] sm:$0xf]  ;;  %v6592_v47 = vld [vmem:[%s6708_s25 + $0x18] sm:$0xf] }
  0x8d   : > { %5988 = vmatmul.mubr.msk.bf16.gmra.mrb[28].mxu1 %vm669_vm3, %v5122_v2  ;;  %6145 = vmatprep.mubr.msk.bf16.mxu0 %vm669_vm3, %v5407_v6  ;;  %v2854_v38 = vsel %vm6960_vm7, %v5392_v10, %v2853_v11  ;;  %v2855_v1 = vrot.slane %v2853_v11, 4  ;;  %v5140_v45 = vcombine.low %v6590_v44, %v7198_v34  ;;  %v7205_v9 = vld [vmem:[%s6708_s25 + $0x1c] sm:$0xf]  ;;  %v5393_v48 = vrot.slane %v5377_v23, 9  ;;  %v5325_v57 = vld [vmem:[%s6708_s25 + $0xac] sm:$0xf] }
  0x8e   : > { %5993 = vmatprep.mubr.msk.bf16.mxu1 %vm669_vm3, %v5139_v62  ;;  %v2850_v59 = vsel %vm6960_vm7, %v2848_v21, %v2849_v41  ;;  %v5141_v26 = vcombine.low %v6592_v47, %v7205_v9  ;;  %v2862_v51 = vrot.slane %v2860_v28, 4  ;;  %v2863_v62 = vrot.slane %v5320_v25, 5  ;;  %v6594_v54 = vld [vmem:[%s8426_s1 + $0x4] sm:$0x3]  ;;  %v5328_v2 = vld [vmem:[%s6708_s25 + $0xb8] sm:$0xf] }
  0x8f   : > { %v5408_v49 = vcombine.low %v2847_v18, %v2850_v59  ;;  %v2857_v50 = vsel %vm6960_vm7, %v2855_v1, %v2856_v8  ;;  %v5394_v12 = vrot.slane %v5378_v20, 9  ;;  %v2867_v63 = vrot.slane %v5322_v31, 5  ;;  %v7220_v7 = vld [vmem:[%s8426_s1 + $0x6] sm:$0x3]  ;;  %v5326_v10 = vld [vmem:[%s6708_s25 + $0xb0] sm:$0x1] }
  0x90   : > { %v5409_v4 = vcombine.low %v2854_v38, %v2857_v50  ;;  %v2870_v58 = vrot.slane %v5323_v60, 5  ;;  %v1437_v61 = vsel %vm718_vm0, %v6594_v54, 0  ;;  %v2861_v41 = vsel %vm6960_vm7, %v5393_v48, %v2860_v28  ;;  %v5379_v11 = vld [vmem:[%s6708_s25 + $0xa8] sm:$0xe]  ;;  %v5329_v25 = vld [vmem:[%s6708_s25 + $0xbc] sm:$0x1] }
  0x91   : > { %v2869_v6 = vrot.slane %v2867_v63, 4  ;;  %v2864_v17 = vsel %vm6960_vm7, %v2862_v51, %v2863_v62  ;;  %v2874_v8 = vrot.slane %v5325_v57, 5  ;;  %v2868_v23 = vsel %vm6960_vm7, %v5394_v12, %v2867_v63  ;;  %v5380_v31 = vld [vmem:[%s6708_s25 + $0xb4] sm:$0xe]  ;;  %v6595_v38 = vld [vmem:[%s6708_s25 + $0x24] sm:$0xf] }
  0x92   : > { %v2881_v21 = vrot.slane %v5328_v2, 5  ;;  %v7241_v1 = vld [vmem:[%s6708_s25 + $0x28] sm:$0xf]  ;;  %v5410_v60 = vcombine.low %v2861_v41, %v2864_v17  ;;  %v5395_v44 = vrot.slane %v5379_v11, 9  ;;  %v2877_v59 = vrot.slane %v5326_v10, 5 }
  0x93   : > { %v2871_v18 = vsel %vm6960_vm7, %v2869_v6, %v2870_v58  ;;  %v5142_v28 = vcombine.low %v6595_v38, %v7241_v1  ;;  %v6597_v47 = vld [vmem:[%s6708_s25 + $0x30] sm:$0xf]  ;;  %v2884_v51 = vrot.slane %v5329_v25, 5  ;;  %v5331_v62 = vld [vmem:[%s6708_s25 + $0xc4] sm:$0xf]  ;;  %v2269_v25 = vshrl.u32 %v7168_v40, 16 }
  0x94   : > { %6146 = vmatmul.mubr.msk.bf16.gmra.mrb[16].mxu0 %vm669_vm3, %v5408_v49  ;;  %v5411_v20 = vcombine.low %v2868_v23, %v2871_v18  ;;  %v5396_v49 = vrot.slane %v5380_v31, 9  ;;  %v2883_v50 = vrot.slane %v2881_v21, 4  ;;  %v2875_v57 = vsel %vm6960_vm7, %v5395_v44, %v2874_v8  ;;  %v5381_v12 = vld [vmem:[%s6708_s25 + $0xc0] sm:$0xe]  ;;  %v6599_v41 = vld [vmem:[%s6708_s25 + $0x3c] sm:$0xf] }
  0x95   : > { %5994 = vmatmul.mubr.msk.bf16.vlgmr.msra.gmra.mrb[0].mxu1 %vm669_vm3, %v5140_v45  ;;  %6149 = vmatprep.mubr.msk.bf16.mxu0 %vm669_vm3, %v5409_v4  ;;  %v2876_v45 = vrot.slane %v2874_v8, 4  ;;  %v2888_v63 = vrot.slane %v5331_v62, 5  ;;  %v5397_v6 = vrot.slane %v5381_v12, 9  ;;  %v7266_v17 = vld [vmem:[%s6708_s25 + $0x40] sm:$0xf]  ;;  %v5145_v18 = vcombine.low %v6873_v27, %v6876_v36  ;;  %v6551_v62 = vld [vmem:[%s6708_s25 + $0x24] sm:$0xff]  }
  0x96   : > { %6026 = vmatpush3.bf16.msra.mxu1 %v1437_v61  ;;  %5997 = vmatprep.mubr.msk.bf16.mxu1 %vm669_vm3, %v5141_v26  ;;  %v7246_v26 = vld [vmem:[%s6708_s25 + $0x34] sm:$0xf]  ;;  %v2882_v58 = vsel %vm6960_vm7, %v5396_v49, %v2881_v21  ;;  %v2885_v54 = vsel %vm6960_vm7, %v2883_v50, %v2884_v51  ;;  %v5332_v61 = vld [vmem:[%s6708_s25 + $0xc8] sm:$0x1]  ;;  %v5144_v10 = vcombine.low %v6599_v41, %v7266_v17  ;;  %v2265_v21 = vshll.u32 %v7168_v40, 16 }
  0x97   : > { %6524 = vmatprep.subr.msk.bf16.mxu1 %vm718_vm0, %v7220_v7  ;;  %v5143_v48 = vcombine.low %v6597_v47, %v7246_v26  ;;  %v2878_v4 = vsel %vm6960_vm7, %v2876_v45, %v2877_v59  ;;  %v5413_v11 = vcombine.low %v2882_v58, %v2885_v54  ;;  %v2890_v8 = vrot.slane %v2888_v63, 4  ;;  %v1175_v45 = vld [vmem:[%s6708_s25] sm:$0xe]  ;;  %v1176_v59 = vld [vmem:[%s6708_s25 + $0xc] sm:$0xe] }
  0x98   : > { %v5412_v2 = vcombine.low %v2875_v57, %v2878_v4  ;;  %v2891_v23 = vrot.slane %v5332_v61, 5  ;;  %v2889_v31 = vsel %vm6960_vm7, %v5397_v6, %v2888_v63  ;;  %v7281_v27 = vrot.slane %v2265_v21, 5  ;;  %v1179_v41 = vld [vmem:[%s6708_s25 + $0x30] sm:$0xe] }
  0x99   : > { %v2271_v36 = vrot.slane %v2269_v25, 4  ;;  %v5147_v44 = vcombine.low %v6933_v19, %v6939_v35  ;;  %v2275_v47 = vshll.u32 %v7171_v55, 16  ;;  %v5171_v19 = vrot.slane %v1175_v45, 9 }
  0x9a   : > { %v2892_v38 = vsel %vm6960_vm7, %v2890_v8, %v2891_v23  ;;  %8447 = vst [vmem:[#allocation3_spill] sm:$0xff] %v7281_v27  ;;  %v5172_v35 = vrot.slane %v1176_v59, 9  ;;  %v1242_v4 = vrot.slane %v7205_v9, 5  ;;  %v1249_v12 = vrot.slane %v7241_v1, 5  ;;  %v1180_v8 = vld [vmem:[%s6708_s25 + $0x3c] sm:$0xe] }
  0x9b   : > { %v5414_v40 = vcombine.low %v2889_v31, %v2892_v38  ;;  %v2272_v49 = vor.u32 %v2271_v36, %v7281_v27  ;;  %v7301_v51 = vrot.slane %v2275_v47, 5  ;;  %v5148_v58 = vcombine.low %v6954_v0, %v6967_v29  ;;  %v1181_v31 = vld [vmem:[%s6708_s25 + $0x48] sm:$0xe]  ;;  %v6605_v59 = vld [vmem:[%s6708_s25 + $0x38] sm:$0x1] }
  0x9c   : > { %6150 = vmatmul.mubr.msk.bf16.gmra.mrb[20].mxu0 %vm669_vm3, %v5410_v60  ;;  %v5146_v60 = vcombine.low %v6902_v24, %v6908_v37  ;;  %v6602_v24 = vld [vmem:[%s6708_s25 + $0x14] sm:$0x1]  ;;  %v4077_v54 = vsel %vm718_vm0, %v7025_v22, 0  ;;  %v5149_v61 = vcombine.low %v6986_v53, %v6993_v16  ;;  %v5150_v6 = vcombine.low %v7012_v39, %v7020_v43  ;;  %v6603_v16 = vld [vmem:[%s6708_s25 + $0x20] sm:$0x1] }
  0x9d   : > { %5998 = vmatmul.mubr.msk.bf16.gmra.mrb[4].mxu1 %vm669_vm3, %v5142_v28  ;;  %6153 = vmatprep.mubr.msk.bf16.mxu0 %vm669_vm3, %v5411_v20  ;;  %v1235_v28 = vrot.slane %v7198_v34, 5  ;;  %v6549_v20 = vld [vmem:[%s6708_s25 + $0x18] sm:$0xff]   ;;  %v6601_v34 = vld [vmem:[%s6708_s25 + $0x8] sm:$0x1]  ;;  %v1238_v37 = vrot.slane %v6602_v24, 5  ;;  %8448 = vst [vmem:[#allocation4_spill] sm:$0xff] %v7301_v51  ;;  %v5151_v9 = vcombine.low %v7044_v5, %v7056_v30 }
  0x9e   : > { %6001 = vmatprep.mubr.msk.bf16.mxu1 %vm669_vm3, %v5143_v48  ;;  %v1228_v48 = vrot.slane %v7164_v15, 5  ;;  %v1231_v50 = vrot.slane %v6601_v34, 5  ;;  %v1177_v15 = vld [vmem:[%s6708_s25 + $0x18] sm:$0xe]  ;;  %v7306_v63 = vrot.slane %v2272_v49, 4  ;;  %v1245_v22 = vrot.slane %v6603_v16, 5 }
  0x9f   : > { %v1237_v55 = vrot.slane %v1235_v28, 4  ;;  %v5173_v1 = vrot.slane %v1177_v15, 9  ;;  %v7328_v29 = vsel %vm6960_vm7, %v5172_v35, %v1235_v28  ;;  %v1251_v25 = vrot.slane %v1249_v12, 4  ;;  %v5496_v24 = vld [vmem:[%s6708_s25 + $0x18] sm:$0xf] }
  0xa0   : > { %v1230_v57 = vrot.slane %v1228_v48, 4  ;;  %8449 = vst [vmem:[#allocation5_spill] sm:$0xff] %v7306_v63  ;;  %v7324_v0 = vsel %vm6960_vm7, %v5171_v19, %v1228_v48  ;;  %v1259_v47 = vrot.slane %v6605_v59, 5  ;;  %v7365_v49 = vsel %vm718_vm0, %v7220_v7, 0  ;;  %v5497_v7 = vld [vmem:[%s6708_s25 + $0x1c] sm:$0xf] }
  0xa1   : > { %v7332_v53 = vsel %vm6960_vm7, %v1237_v55, %v1238_v37  ;;  %v7369_v34 = vsel %vm6960_vm7, %v5173_v1, %v1242_v4  ;;  %v6555_v37 = vld [vmem:[%s6708_s25 + $0x3c] sm:$0xff]   ;;  %v5176_v35 = vrot.slane %v1180_v8, 9  ;;  %v6606_v55 = vld [vmem:[%s6708_s25 + $0x44] sm:$0x1]  ;;  %v3598_v8 = vshll.u32 %v5496_v24, 16 }
  0xa2   : > { %v7343_v23 = vsel %vm6960_vm7, %v1230_v57, %v1231_v50  ;;  %v1182_v50 = vld [vmem:[%s6708_s25 + $0x54] sm:$0xe]  ;;  %v1266_v15 = vrot.slane %v6606_v55, 5  ;;  %v5500_v39 = vld [vmem:[%s6708_s25 + $0x28] sm:$0xf] }
  0xa3   : > { %v6613_v5 = vld [vmem:[%s6708_s25 + $0x70] sm:$0xf] }
  0xa4   : > { %6154 = vmatmul.mubr.msk.bf16.gmra.mrb[24].mxu0 %vm669_vm3, %v5412_v2  ;;  %v1178_v2 = vld [vmem:[%s6708_s25 + $0x24] sm:$0xe]  ;;  %v1291_v30 = vrot.slane %v6613_v5, 5 }
  0xa5   : > { %6002 = vmatmul.mubr.msk.bf16.gmra.mrb[8].mxu1 %vm669_vm3, %v5144_v10  ;;  %6157 = vmatprep.mubr.msk.bf16.mxu0 %vm669_vm3, %v5413_v11  ;;  %v1256_v10 = vrot.slane %v7246_v26, 5  ;;  %v6553_v11 = vld [vmem:[%s6708_s25 + $0x30] sm:$0xff]   ;;  %v5174_v21 = vrot.slane %v1178_v2, 9 }
  0xa6   : > { %6005 = vmatprep.mubr.msk.bf16.mxu1 %vm669_vm3, %v5145_v18  ;;  %v7339_v26 = vld [vmem:[%s8426_s1 + $0x10] sm:$0x3]  ;;  %v1244_v18 = vrot.slane %v1242_v4, 4  ;;  %v1293_v48 = vrot.slane %v1291_v30, 4 }
  0xa7   : > { %v1258_v45 = vrot.slane %v1256_v10, 4  ;;  %v7376_v19 = vsel %vm6960_vm7, %v5174_v21, %v1249_v12  ;;  %v3608_v21 = vshrl.u32 %v5497_v7, 16 }
  0xa8   : > { %v7385_v4 = vsel %vm6960_vm7, %v1244_v18, %v1245_v22  ;;  %v3595_v22 = vshrl.u32 %v5496_v24, 16  ;;  %v3604_v18 = vshll.u32 %v5497_v7, 16  ;;  %v5499_v24 = vld [vmem:[%s6708_s25 + $0x24] sm:$0xf] }
  0xa9   : > { %v7398_v1 = vsel %vm6960_vm7, %v1258_v45, %v1259_v47 }
  0xaa   : > { %v3597_v43 = vrot.slane %v3595_v22, 4  ;;  %v7440_v7 = vrot.slane %v3604_v18, 5  ;;  %v3622_v22 = vshll.u32 %v5499_v24, 16  ;;  %v3632_v18 = vshrl.u32 %v5500_v39, 16 }
  0xac   : > { %6158 = vmatmul.mubr.msk.bf16.gmra.mrb[28].mxu0 %vm669_vm3, %v5414_v40  ;;  %v6604_v40 = vld [vmem:[%s6708_s25 + $0x2c] sm:$0x1]  ;;  %v3624_v27 = vrot.slane %v3622_v22, 5 }
  0xad   : > { %6006 = vmatmul.mubr.msk.bf16.gmra.mrb[12].mxu1 %vm669_vm3, %v5146_v60  ;;  %6163 = vmatprep.mubr.msk.bf16.mxu0 %vm669_vm3, %v6549_v20  ;;  %v1252_v28 = vrot.slane %v6604_v40, 5  ;;  %v1263_v60 = vrot.slane %v7266_v17, 5  ;;  %v6609_v40 = vld [vmem:[%s6708_s25 + $0x50] sm:$0x1]  ;;  %v6614_v17 = vld [vmem:[%s6708_s25 + $0x74] sm:$0x1] }
  0xae   : > { %6009 = vmatprep.mubr.msk.bf16.mxu1 %vm669_vm3, %v5147_v44  ;;  %v5175_v44 = vrot.slane %v1179_v41, 9  ;;  %v5178_v41 = vrot.slane %v1182_v50, 9  ;;  %v1183_v50 = vld [vmem:[%s6708_s25 + $0x60] sm:$0xe]  ;;  %v5501_v20 = vld [vmem:[%s6708_s25 + $0x2c] sm:$0x1] }
  0xaf   : > { %v1265_v12 = vrot.slane %v1263_v60, 4  ;;  %v7411_v45 = vsel %vm6960_vm7, %v5176_v35, %v1263_v60  ;;  %v6610_v35 = vld [vmem:[%s6708_s25 + $0x5c] sm:$0x1] }
  0xb0   : > { %v7394_v2 = vsel %vm6960_vm7, %v5175_v44, %v1256_v10  ;;  %v1280_v55 = vrot.slane %v6610_v35, 5  ;;  %v1184_v35 = vld [vmem:[%s6708_s25 + $0x6c] sm:$0xe] }
  0xb1   : > { %v7415_v59 = vsel %vm6960_vm7, %v1265_v12, %v1266_v15  ;;  %v6611_v15 = vld [vmem:[%s6708_s25 + $0x64] sm:$0xf]  ;;  %v3610_v12 = vrot.slane %v3608_v21, 4  ;;  %v5180_v5 = vrot.slane %v1184_v35, 9 }
  0xb2   : > { %v6561_v21 = vld [vmem:[%s6708_s25 + $0x60] sm:$0xff]  }
  0xb4   : > { %6164 = vmatmul.mubr.msk.bf16.vlgmr.msra.gmra.mrb[0].mxu0 %vm669_vm3, %v6551_v62  ;;  %v6607_v62 = vld [vmem:[%s6708_s25 + $0x4c] sm:$0xf] }
  0xb5   : > { %6010 = vmatmul.mubr.msk.bf16.gmra.mrb[16].mxu1 %vm669_vm3, %v5148_v58  ;;  %6196 = vmatpush3.bf16.msra.mxu0 %v4077_v54  ;;  %v1270_v57 = vrot.slane %v6607_v62, 5  ;;  %v7389_v58 = vsel %vm6960_vm7, %v1251_v25, %v1252_v28  ;;  %v5177_v54 = vrot.slane %v1181_v31, 9  ;;  %v1273_v28 = vrot.slane %v6609_v40, 5 }
  0xb6   : > { %6013 = vmatprep.mubr.msk.bf16.mxu1 %vm669_vm3, %v5149_v61  ;;  %6167 = vmatprep.mubr.msk.bf16.mxu0 %vm669_vm3, %v6553_v11  ;;  %v6557_v61 = vld [vmem:[%s6708_s25 + $0x48] sm:$0xff]   ;;  %v6608_v11 = vld [vmem:[%s6708_s25 + $0x58] sm:$0xf]  ;;  %v1284_v62 = vrot.slane %v6611_v15, 5  ;;  %v5503_v15 = vld [vmem:[%s6708_s25 + $0x34] sm:$0xf] }
  0xb7   : > { %6530 = vmatprep.subr.msk.bf16.mxu0 %vm718_vm0, %v7339_v26  ;;  %v1277_v16 = vrot.slane %v6608_v11, 5  ;;  %v1272_v31 = vrot.slane %v1270_v57, 4  ;;  %v7419_v47 = vsel %vm6960_vm7, %v5177_v54, %v1270_v57  ;;  %v5498_v57 = vld [vmem:[%s6708_s25 + $0x20] sm:$0x1]  ;;  %v5502_v54 = vld [vmem:[%s6708_s25 + $0x30] sm:$0xf] }
  0xb8   : > { %v5179_v11 = vrot.slane %v1183_v50, 9  ;;  %v3646_v50 = vshll.u32 %v5502_v54, 16  ;;  %v3614_v25 = vshll.u32 %v5498_v57, 16  ;;  %v3652_v36 = vshll.u32 %v5503_v15, 16 }
  0xb9   : > { %v7430_v60 = vsel %vm6960_vm7, %v5178_v41, %v1277_v16  ;;  %v7446_v41 = vsel %vm6960_vm7, %v1272_v31, %v1273_v28  ;;  %v1286_v31 = vrot.slane %v1284_v62, 4  ;;  %v3643_v28 = vshrl.u32 %v5502_v54, 16 }
  0xba   : > { %v7488_v35 = vrot.slane %v3652_v36, 5 }
  0xbc   : > { %6168 = vmatmul.mubr.msk.bf16.gmra.mrb[4].mxu0 %vm669_vm3, %v6555_v37  ;;  %v1279_v37 = vrot.slane %v1277_v16, 4  ;;  %v6612_v16 = vld [vmem:[%s6708_s25 + $0x68] sm:$0x1] }
  0xbd   : > { %6014 = vmatmul.mubr.msk.bf16.gmra.mrb[20].mxu1 %vm669_vm3, %v5150_v6  ;;  %6171 = vmatprep.mubr.msk.bf16.mxu0 %vm669_vm3, %v6557_v61  ;;  %v3600_v6 = vrot.slane %v3598_v8, 5  ;;  %v6559_v61 = vld [vmem:[%s6708_s25 + $0x54] sm:$0xff]   ;;  %v1287_v40 = vrot.slane %v6612_v16, 5  ;;  %v3628_v8 = vshll.u32 %v5500_v39, 16  ;;  %v3611_v16 = vor.u32 %v3610_v12, %v7440_v7 }
  0xbe   : > { %6017 = vmatprep.mubr.msk.bf16.mxu1 %vm669_vm3, %v5151_v9  ;;  %v3619_v9 = vshrl.u32 %v5499_v24, 16  ;;  %v7455_v44 = vsel %vm6960_vm7, %v1279_v37, %v1280_v55  ;;  %v1294_v24 = vrot.slane %v6614_v17, 5  ;;  %v3656_v39 = vshrl.u32 %v5503_v15, 16 }
  0xbf   : > { %v3601_v10 = vor.u32 %v3600_v6, %v3597_v43  ;;  %v7461_v37 = vrot.slane %v3628_v8, 5  ;;  %v3634_v55 = vrot.slane %v3632_v18, 4  ;;  %v8450_v43 = vcombine.low %v7065_v52, %v7076_v46  ;;  %v6615_v8 = vld [vmem:[%s6708_s25 + $0x7c] sm:$0xf]  ;;  %v7497_v18 = vld [vmem:[%s6708_s25 + $0x38] sm:$0x1] }
  0xc0   : > { %v3621_v38 = vrot.slane %v3619_v9, 4  ;;  %v7470_v17 = vsel %vm6960_vm7, %v5179_v11, %v1284_v62  ;;  %v7474_v57 = vsel %vm6960_vm7, %v1286_v31, %v1287_v40  ;;  %v3645_v6 = vrot.slane %v3643_v28, 4  ;;  %8452 = vst [vmem:[#allocation6_spill] sm:$0xff] %v7497_v18 }
  0xc1   : > { %v3648_v12 = vrot.slane %v3646_v50, 5  ;;  %v8451_v52 = vcombine.low %v7097_v33, %v7102_v56  ;;  %v3602_v46 = vrot.slane %v3601_v10, 4  ;;  %v3612_v54 = vrot.slane %v3611_v16, 4  ;;  %v6563_v33 = vld [vmem:[%s6708_s25 + $0x6c] sm:$0xff]   ;;  %v1186_v16 = vld [vmem:[%s6708_s25 + $0x84] sm:$0xe] }
  0xc2   : > { %v3638_v62 = vshll.u32 %v5501_v20, 16  ;;  %v7482_v11 = vsel %vm6960_vm7, %v5180_v5, %v1291_v30  ;;  %v7486_v40 = vsel %vm6960_vm7, %v1293_v48, %v1294_v24  ;;  %v3658_v9 = vrot.slane %v3656_v39, 4  ;;  %v6564_v48 = vld [vmem:[%s6708_s25 + $0x78] sm:$0xff]  }
  0xc3   : > { %v3625_v10 = vor.u32 %v3624_v27, %v3621_v38  ;;  %v3635_v20 = vor.u32 %v3634_v55, %v7461_v37  ;;  %v1298_v30 = vrot.slane %v6615_v8, 5  ;;  %v3649_v38 = vor.u32 %v3648_v12, %v3645_v6  ;;  %v5505_v5 = vld [vmem:[%s6708_s25 + $0x3c] sm:$0xf] }
  0xc4   : > { %6172 = vmatmul.mubr.msk.bf16.gmra.mrb[8].mxu0 %vm669_vm3, %v6559_v61  ;;  %v3616_v61 = vrot.slane %v3614_v25, 5  ;;  %v1185_v25 = vld [vmem:[%s6708_s25 + $0x78] sm:$0xe]  ;;  %v7513_v50 = vrot.slane %v3638_v62, 5  ;;  %v3659_v39 = vor.u32 %v3658_v9, %v7488_v35  ;;  %v3662_v55 = vshll.u32 %v7497_v18, 16 }
  0xc5   : > { %6018 = vmatmul.mubr.msk.bf16.gmra.mrb[24].mxu1 %vm669_vm3, %v8450_v43  ;;  %6175 = vmatprep.mubr.msk.bf16.mxu0 %vm669_vm3, %v6561_v21  ;;  %v3607_v21 = vsel %vm6734_vm4, %v3602_v46, %v7440_v7  ;;  %v5181_v24 = vrot.slane %v1185_v25, 9  ;;  %v6616_v43 = vld [vmem:[%s6708_s25 + $0x88] sm:$0xf]  ;;  %v7521_v7 = vld [vmem:[%s6708_s25 + $0x40] sm:$0xf]  ;;  %v3626_v12 = vrot.slane %v3625_v10, 4  ;;  %v8454_v62 = vcombine.low %v7117_v14, %v7126_v42 }
  0xc6   : > { %6021 = vmatprep.mubr.msk.bf16.mxu1 %vm669_vm3, %v8451_v52  ;;  %v3617_v31 = vsel %vm6734_vm4, %v3612_v54, %v3616_v61  ;;  %v1305_v6 = vrot.slane %v6616_v43, 5  ;;  %8453 = vst [vmem:[#allocation7_spill] sm:$0xff] %v7521_v7  ;;  %v3636_v52 = vrot.slane %v3635_v20, 4  ;;  %v1300_v46 = vrot.slane %v1298_v30, 4  ;;  %v6617_v54 = vld [vmem:[%s6708_s25 + $0x80] sm:$0x1] }
  0xc7   : > { %v1301_v61 = vrot.slane %v6617_v54, 5  ;;  %v3650_v9 = vrot.slane %v3649_v38, 4  ;;  %v5182_v25 = vrot.slane %v1186_v16, 9  ;;  %v3667_v8 = vshrl.u32 %v5505_v5, 16  ;;  %v6565_v10 = vld [vmem:[%s6708_s25 + $0x84] sm:$0xff]  }
  0xc8   : > { %v3670_v43 = vshll.u32 %v5505_v5, 16  ;;  %v7535_v20 = vcombine.low %v3607_v21, %v3617_v31  ;;  %v7539_v14 = vsel %vm718_vm0, %v7339_v26, 0  ;;  %v3680_v38 = vshrl.u32 %v7521_v7, 16  ;;  %v6566_v21 = vld [vmem:[%s6708_s25 + $0x90] sm:$0xff]   ;;  %v6622_v18 = vld [vmem:[%s6708_s25 + $0xa0] sm:$0xf] }
  0xc9   : > { %v3660_v16 = vrot.slane %v3659_v39, 4  ;;  %v3664_v5 = vrot.slane %v3662_v55, 5  ;;  %v1307_v54 = vrot.slane %v1305_v6, 4  ;;  %v3631_v31 = vsel %vm6734_vm4, %v3626_v12, %v7461_v37 }
  0xca   : > { %v3641_v26 = vsel %vm6734_vm4, %v3636_v52, %v7513_v50  ;;  %v7554_v39 = vsel %vm6960_vm7, %v5181_v24, %v1298_v30  ;;  %v7558_v55 = vsel %vm6960_vm7, %v1300_v46, %v1301_v61  ;;  %v3655_v37 = vsel %vm6734_vm4, %v3650_v9, %v7488_v35  ;;  %v5511_v30 = vld [vmem:[%s6708_s25 + $0x54] sm:$0xf]  ;;  %v7575_v24 = vld [vmem:[%s6708_s25 + $0x58] sm:$0xf]  ;;  %v7580_v61 = vld [vmem:[%s6708_s25 + $0x90] sm:$0xe] }
  0xcb   : > { %v7571_v12 = vsel %vm6960_vm7, %v5182_v25, %v1305_v6  ;;  %v3669_v50 = vrot.slane %v3667_v8, 4  ;;  %v3672_v52 = vrot.slane %v3670_v43, 5  ;;  %v3682_v46 = vrot.slane %v3680_v38, 4 }
  0xcc   : > { %6176 = vmatmul.mubr.msk.bf16.gmra.mrb[12].mxu0 %vm669_vm3, %v6563_v33  ;;  %v8455_v33 = vcombine.low %v7324_v0, %v7343_v23  ;;  %v6618_v0 = vld [vmem:[%s6708_s25 + $0x8c] sm:$0x1]  ;;  %v3665_v36 = vsel %vm6734_vm4, %v3660_v16, %v3664_v5  ;;  %v3715_v25 = vshrl.u32 %v5511_v30, 16  ;;  %v3718_v8 = vshll.u32 %v5511_v30, 16 }
  0xcd   : > { %6022 = vmatmul.mubr.msk.bf16.gmra.mrb[28].mxu1 %vm669_vm3, %v8454_v62  ;;  %6179 = vmatprep.mubr.msk.bf16.mxu0 %vm669_vm3, %v6564_v48  ;;  %v3676_v48 = vshll.u32 %v7521_v7, 16  ;;  %v1308_v23 = vrot.slane %v6618_v0, 5  ;;  %v5508_v62 = vld [vmem:[%s6708_s25 + $0x48] sm:$0xf]  ;;  %v7564_v0 = vld [vmem:[%s6708_s25 + $0x4c] sm:$0xf]  ;;  %v8457_v38 = vcombine.low %v7328_v29, %v7332_v53  ;;  %v7598_v16 = vcombine.low %v3631_v31, %v3641_v26 }
  0xce   : > { %6027 = vmatprep.mubr.msk.bf16.mxu1 %vm669_vm3, %v8455_v33  ;;  %v7561_v33 = vld [vmem:[%s6708_s25 + $0x44] sm:$0x1]  ;;  %v3691_v27 = vshrl.u32 %v5508_v62, 16  ;;  %v3694_v15 = vshll.u32 %v5508_v62, 16  ;;  %v3700_v6 = vshll.u32 %v7564_v0, 16  ;;  %v3704_v9 = vshrl.u32 %v7564_v0, 16 }
  0xcf   : > { %8456 = vst [vmem:[#allocation8_spill] sm:$0xff] %v7561_v33  ;;  %v7577_v28 = vrot.slane %v3676_v48, 5  ;;  %v7586_v35 = vsel %vm6960_vm7, %v1307_v54, %v1308_v23  ;;  %v3724_v43 = vshll.u32 %v7575_v24, 16  ;;  %v3728_v48 = vshrl.u32 %v7575_v24, 16  ;;  %v5514_v31 = vld [vmem:[%s6708_s25 + $0x60] sm:$0xf] }
  0xd0   : > { %v3686_v5 = vshll.u32 %v7561_v33, 16  ;;  %v5183_v54 = vrot.slane %v7580_v61, 9  ;;  %v8458_v23 = vcombine.low %v7369_v34, %v7385_v4  ;;  %v7609_v29 = vcombine.low %v3655_v37, %v3665_v36  ;;  %v6567_v26 = vld [vmem:[%s6708_s25 + $0x9c] sm:$0xff]   ;;  %v6568_v30 = vld [vmem:[%s6708_s25 + $0xa8] sm:$0xff]  }
  0xd1   : > { %v3673_v53 = vor.u32 %v3672_v52, %v3669_v50  ;;  %v3693_v62 = vrot.slane %v3691_v27, 4  ;;  %v7620_v34 = vrot.slane %v3700_v6, 5  ;;  %v3706_v4 = vrot.slane %v3704_v9, 4  ;;  %v6619_v36 = vld [vmem:[%s8426_s1 + $0x8] sm:$0x3] }
  0xd2   : > { %v3717_v27 = vrot.slane %v3715_v25, 4  ;;  %v3720_v37 = vrot.slane %v3718_v8, 5  ;;  %v7629_v50 = vrot.slane %v3724_v43, 5  ;;  %v3730_v52 = vrot.slane %v3728_v48, 4  ;;  %v6620_v6 = vld [vmem:[%s6708_s25 + $0x94] sm:$0xf] }
  0xd3   : > { %v7635_v9 = vld [vmem:[%s6708_s25 + $0x64] sm:$0xf]  ;;  %v3739_v61 = vshrl.u32 %v5514_v31, 16  ;;  %v7637_v22 = vrot.slane %v3673_v53, 4  ;;  %v1319_v25 = vrot.slane %v6622_v18, 5  ;;  %v3707_v43 = vor.u32 %v3706_v4, %v7620_v34 }
  0xd4   : > { %6180 = vmatmul.mubr.msk.bf16.gmra.mrb[16].mxu0 %vm669_vm3, %v6565_v10  ;;  %8459 = vst [vmem:[#allocation9_spill] sm:$0xff] %v7635_v9  ;;  %v3742_v10 = vshll.u32 %v5514_v31, 16  ;;  %v3721_v31 = vor.u32 %v3720_v37, %v3717_v27  ;;  %v3731_v53 = vor.u32 %v3730_v52, %v7629_v50  ;;  %v8460_v18 = vcombine.low %v7376_v19, %v7389_v58  ;;  %v6569_v37 = vld [vmem:[%s6708_s25 + $0xb4] sm:$0xff]  }
  0xd5   : > { %6028 = vmatmul.mubr.msk.bf16.vlgmr.msra.gmra.mrb[0].mxu1 %vm669_vm3, %v8457_v38  ;;  %6183 = vmatprep.mubr.msk.bf16.mxu0 %vm669_vm3, %v6566_v21  ;;  %v3696_v21 = vrot.slane %v3694_v15, 5  ;;  %v7618_v38 = vld [vmem:[%s6708_s25 + $0x50] sm:$0x1]  ;;  %v7627_v15 = vld [vmem:[%s6708_s25 + $0x5c] sm:$0x1]  ;;  %v8461_v27 = vcombine.low %v7394_v2, %v7398_v1  ;;  %v1321_v52 = vrot.slane %v1319_v25, 4 }
  0xd6   : > { %6060 = vmatpush3.bf16.msra.mxu1 %v7365_v49  ;;  %6031 = vmatprep.mubr.msk.bf16.mxu1 %vm669_vm3, %v8458_v23  ;;  %v3683_v49 = vor.u32 %v3682_v46, %v7577_v28  ;;  %v7631_v46 = vrot.slane %v3686_v5, 5  ;;  %v1312_v23 = vrot.slane %v6620_v6, 5  ;;  %v3710_v48 = vshll.u32 %v7618_v38, 16  ;;  %v1188_v5 = vld [vmem:[%s6708_s25 + $0x9c] sm:$0xe] }
  0xd7   : > { %6526 = vmatprep.subr.msk.bf16.mxu1 %vm718_vm0, %v6619_v36  ;;  %v6621_v36 = vld [vmem:[%s6708_s25 + $0x98] sm:$0x1]  ;;  %v3697_v7 = vor.u32 %v3696_v21, %v3693_v62  ;;  %v3734_v6 = vshll.u32 %v7627_v15, 16  ;;  %v3752_v62 = vshrl.u32 %v7635_v9, 16  ;;  %v3744_v4 = vrot.slane %v3742_v10, 5 }
  0xd8   : > { %v1315_v33 = vrot.slane %v6621_v36, 5  ;;  %v3684_v8 = vrot.slane %v3683_v49, 4  ;;  %v3748_v36 = vshll.u32 %v7635_v9, 16  ;;  %v7656_v21 = vsel %vm6960_vm7, %v5183_v54, %v1312_v23  ;;  %v7667_v2 = vld [vmem:[%s6708_s25 + $0x68] sm:$0x1] }
  0xd9   : > { %v3741_v49 = vrot.slane %v3739_v61, 4  ;;  %v3698_v19 = vrot.slane %v3697_v7, 4  ;;  %v5184_v58 = vrot.slane %v1188_v5, 9  ;;  %v3708_v3 = vrot.slane %v3707_v43, 4  ;;  %8462 = vst [vmem:[#allocation10_spill] sm:$0xff] %v7667_v2  ;;  %v6570_v5 = vld [vmem:[%s6708_s25 + $0xc0] sm:$0xff]  }
  0xda   : > { %v3712_v54 = vrot.slane %v3710_v48, 5  ;;  %v3736_v63 = vrot.slane %v3734_v6, 5  ;;  %v1326_v61 = vrot.slane %v7102_v56, 5  ;;  %v3722_v10 = vrot.slane %v3721_v31, 4  ;;  %v1190_v31 = vld [vmem:[%s6708_s25 + $0xb4] sm:$0xe] }
  0xdb   : > { %v3732_v51 = vrot.slane %v3731_v53, 4  ;;  %v7669_v1 = vrot.slane %v3748_v36, 5  ;;  %v3754_v7 = vrot.slane %v3752_v62, 4  ;;  %v3679_v43 = vsel %vm6734_vm4, %v7637_v22, %v7577_v28  ;;  %v6624_v62 = vld [vmem:[%s6708_s25 + $0xb0] sm:$0x1] }
  0xdc   : > { %6184 = vmatmul.mubr.msk.bf16.gmra.mrb[20].mxu0 %vm669_vm3, %v6567_v26  ;;  %v1314_v26 = vrot.slane %v1312_v23, 4  ;;  %v1189_v23 = vld [vmem:[%s6708_s25 + $0xa8] sm:$0xe]  ;;  %v3689_v48 = vsel %vm6734_vm4, %v3684_v8, %v7631_v46  ;;  %v3745_v6 = vor.u32 %v3744_v4, %v3741_v49  ;;  %v3703_v53 = vsel %vm6734_vm4, %v3698_v19, %v7620_v34  ;;  %v5517_v46 = vld [vmem:[%s6708_s25 + $0x6c] sm:$0xf] }
  0xdd   : > { %6032 = vmatmul.mubr.msk.bf16.gmra.mrb[4].mxu1 %vm669_vm3, %v8460_v18  ;;  %6187 = vmatprep.mubr.msk.bf16.mxu0 %vm669_vm3, %v6568_v30  ;;  %v6623_v18 = vld [vmem:[%s6708_s25 + $0xa4] sm:$0x1]  ;;  %v7689_v36 = vsel %vm6960_vm7, %v5184_v58, %v1319_v25  ;;  %v5185_v28 = vrot.slane %v1189_v23, 9  ;;  %v1328_v8 = vrot.slane %v1326_v61, 4  ;;  %v3758_v49 = vshll.u32 %v7667_v2, 16 }
  0xde   : > { %6035 = vmatprep.mubr.msk.bf16.mxu1 %vm669_vm3, %v8461_v27  ;;  %v1322_v30 = vrot.slane %v6623_v18, 5  ;;  %v7681_v56 = vsel %vm6960_vm7, %v1314_v26, %v1315_v33  ;;  %v3713_v33 = vsel %vm6734_vm4, %v3708_v3, %v3712_v54  ;;  %v1329_v26 = vrot.slane %v6624_v62, 5  ;;  %v5520_v18 = vld [vmem:[%s6708_s25 + $0x78] sm:$0xf]  ;;  %v7744_v54 = vld [vmem:[%s6708_s25 + $0xbc] sm:$0x1] }
  0xdf   : > { %v3727_v34 = vsel %vm6734_vm4, %v3722_v10, %v7629_v50  ;;  %v3737_v25 = vsel %vm6734_vm4, %v3732_v51, %v3736_v63  ;;  %v3755_v4 = vor.u32 %v3754_v7, %v7669_v1  ;;  %v5186_v27 = vrot.slane %v1190_v31, 9  ;;  %v7718_v51 = vld [vmem:[%s6708_s25 + $0x70] sm:$0xf]  ;;  %v7748_v10 = vld [vmem:[%s6708_s25 + $0x7c] sm:$0xf] }
  0xe0   : > { %v7693_v22 = vsel %vm6960_vm7, %v1321_v52, %v1322_v30  ;;  %v8464_v3 = vcombine.low %v7411_v45, %v7415_v59  ;;  %v7714_v19 = vrot.slane %v3745_v6, 4  ;;  %v1333_v50 = vrot.slane %v7126_v42, 5  ;;  %8465 = vst [vmem:[#allocation12_spill] sm:$0xff] %v7718_v51  ;;  %8467 = vst [vmem:[#allocation13_spill] sm:$0xff] %v7748_v10  ;;  %v5523_v7 = vld [vmem:[%s6708_s25 + $0x84] sm:$0xf] }
  0xe1   : > { %8463 = vst [vmem:[#allocation11_spill] sm:$0xff] %v7693_v22  ;;  %v3763_v63 = vshrl.u32 %v5517_v46, 16  ;;  %v8466_v45 = vcombine.low %v7419_v47, %v7446_v41  ;;  %v7726_v58 = vcombine.low %v3703_v53, %v3713_v33  ;;  %v7732_v42 = vsel %vm6960_vm7, %v5185_v28, %v1326_v61  ;;  %v6571_v61 = vld [vmem:[%s6708_s25 + $0xcc] sm:$0xff]   ;;  %v7760_v31 = vld [vmem:[%s6708_s25 + $0x88] sm:$0xf] }
  0xe2   : > { %v7735_v30 = vcombine.low %v3727_v34, %v3737_v25  ;;  %v7739_v47 = vsel %vm6960_vm7, %v1328_v8, %v1329_v26  ;;  %v7741_v41 = vrot.slane %v3758_v49, 5  ;;  %v3772_v6 = vshll.u32 %v7718_v51, 16  ;;  %8468 = vst [vmem:[#allocation14_spill] sm:$0xff] %v7760_v31  ;;  %v5526_v62 = vld [vmem:[%s6708_s25 + $0x90] sm:$0xf] }
  0xe3   : > { %v7766_v28 = vrot.slane %v1333_v50, 4  ;;  %v7768_v33 = vrot.slane %v3763_v63, 4  ;;  %v3776_v8 = vshrl.u32 %v7718_v51, 16  ;;  %v3787_v26 = vshrl.u32 %v5520_v18, 16  ;;  %v7775_v25 = vld [vmem:[%s6708_s25 + $0x94] sm:$0xf] }
  0xe4   : > { %6188 = vmatmul.mubr.msk.bf16.gmra.mrb[24].mxu0 %vm669_vm3, %v6569_v37  ;;  %v7712_v37 = vcombine.low %v3679_v43, %v3689_v48  ;;  %v7756_v43 = vsel %vm6960_vm7, %v5186_v27, %v1333_v50  ;;  %v3766_v48 = vshll.u32 %v5517_v46, 16  ;;  %v3790_v49 = vshll.u32 %v5520_v18, 16  ;;  %8469 = vst [vmem:[#allocation15_spill] sm:$0xff] %v7775_v25  ;;  %v7813_v2 = vld [vmem:[%s6708_s25 + $0x8c] sm:$0x1] }
  0xe5   : > { %6036 = vmatmul.mubr.msk.bf16.gmra.mrb[8].mxu1 %vm669_vm3, %v8464_v3  ;;  %6191 = vmatprep.mubr.msk.bf16.mxu0 %vm669_vm3, %v6570_v5  ;;  %v7752_v5 = vrot.slane %v3755_v4, 4  ;;  %v3796_v46 = vshll.u32 %v7748_v10, 16  ;;  %v3800_v34 = vshrl.u32 %v7748_v10, 16  ;;  %v3811_v4 = vshrl.u32 %v5523_v7, 16 }
  0xe6   : > { %6039 = vmatprep.mubr.msk.bf16.mxu1 %vm669_vm3, %v8466_v45  ;;  %v3814_v27 = vshll.u32 %v5523_v7, 16  ;;  %v3820_v3 = vshll.u32 %v7760_v31, 16  ;;  %v3824_v50 = vshrl.u32 %v7760_v31, 16  ;;  %v7785_v45 = vld [vmem:[%s6708_s25 + $0x74] sm:$0x1]  ;;  %v3768_v18 = vrot.slane %v3766_v48, 5 }
  0xe7   : > { %v3835_v52 = vshrl.u32 %v5526_v62, 16  ;;  %v3838_v53 = vshll.u32 %v5526_v62, 16  ;;  %v8470_v7 = vcombine.low %v7430_v60, %v7455_v44  ;;  %v3778_v59 = vrot.slane %v3776_v8, 4  ;;  %v5529_v48 = vld [vmem:[%s6708_s25 + $0x9c] sm:$0xf] }
  0xe8   : > { %v3844_v63 = vshll.u32 %v7775_v25, 16  ;;  %v3848_v23 = vshrl.u32 %v7775_v25, 16  ;;  %v8471_v62 = vcombine.low %v7470_v17, %v7474_v57  ;;  %v7803_v44 = vld [vmem:[%s6708_s25 + $0x80] sm:$0x1]  ;;  %v3789_v60 = vrot.slane %v3787_v26, 4 }
  0xe9   : > { %8472 = vst [vmem:[#allocation16_spill] sm:$0xff] %v7803_v44  ;;  %v3813_v31 = vrot.slane %v3811_v4, 4  ;;  %v3816_v8 = vrot.slane %v3814_v27, 5  ;;  %v7807_v10 = vrot.slane %v3820_v3, 5  ;;  %v3826_v51 = vrot.slane %v3824_v50, 4 }
  0xea   : > { %v7810_v25 = vld [vmem:[%s6708_s25 + $0xa0] sm:$0xf]  ;;  %v3837_v17 = vrot.slane %v3835_v52, 4  ;;  %v3840_v57 = vrot.slane %v3838_v53, 5  ;;  %v3862_v9 = vshll.u32 %v5529_v48, 16  ;;  %v3769_v26 = vor.u32 %v3768_v18, %v7768_v33 }
  0xeb   : > { %v3806_v27 = vshll.u32 %v7803_v44, 16  ;;  %v7822_v3 = vld [vmem:[%s6708_s25 + $0x98] sm:$0x1]  ;;  %v3868_v50 = vshll.u32 %v7810_v25, 16  ;;  %v3872_v52 = vshrl.u32 %v7810_v25, 16  ;;  %v3817_v22 = vor.u32 %v3816_v8, %v3813_v31 }
  0xec   : > { %6192 = vmatmul.mubr.msk.bf16.gmra.mrb[28].mxu0 %vm669_vm3, %v6571_v61  ;;  %v7793_v61 = vrot.slane %v3772_v6, 5  ;;  %v3802_v6 = vrot.slane %v3800_v34, 4  ;;  %v3850_v34 = vrot.slane %v3848_v23, 4  ;;  %v3830_v33 = vshll.u32 %v7813_v2, 16 }
  0xed   : > { %6040 = vmatmul.mubr.msk.bf16.gmra.mrb[12].mxu1 %vm669_vm3, %v8470_v7  ;;  %6197 = vmatprep.mubr.msk.bf16.mxu0 %vm669_vm3, %v7535_v20  ;;  %v3792_v7 = vrot.slane %v3790_v49, 5  ;;  %v7805_v20 = vrot.slane %v3796_v46, 5  ;;  %v3782_v49 = vshll.u32 %v7785_v45, 16  ;;  %v7817_v46 = vrot.slane %v3844_v63, 5 }
  0xee   : > { %6043 = vmatprep.mubr.msk.bf16.mxu1 %vm669_vm3, %v8471_v62  ;;  %v3859_v62 = vshrl.u32 %v5529_v48, 16  ;;  %v3779_v4 = vor.u32 %v3778_v59, %v7793_v61  ;;  %v3827_v23 = vor.u32 %v3826_v51, %v7807_v10  ;;  %v3841_v59 = vor.u32 %v3840_v57, %v3837_v17  ;;  %v7855_v57 = vld [vmem:[%s6708_s25 + $0xa4] sm:$0x1] }
  0xef   : > { %v3793_v53 = vor.u32 %v3792_v7, %v3789_v60  ;;  %v3803_v48 = vor.u32 %v3802_v6, %v7805_v20  ;;  %v3864_v18 = vrot.slane %v3862_v9, 5  ;;  %v8473_v44 = vcombine.low %v7482_v11, %v7486_v40 }
  0xf0   : > { %v3861_v63 = vrot.slane %v3859_v62, 4  ;;  %v8474_v31 = vrot.slane %v7744_v54, 5  ;;  %v3784_v51 = vrot.slane %v3782_v49, 5  ;;  %v3851_v60 = vor.u32 %v3850_v34, %v7817_v46  ;;  %v7858_v34 = vld [vmem:[%s6708_s25 + $0xac] sm:$0xf] }
  0xf1   : > { %v3854_v9 = vshll.u32 %v7822_v3, 16  ;;  %v8475_v11 = vcombine.low %v7554_v39, %v7558_v55  ;;  %v3770_v40 = vrot.slane %v3769_v26, 4  ;;  %v7851_v54 = vrot.slane %v3868_v50, 5 }
  0xf2   : > { %v3794_v7 = vrot.slane %v3793_v53, 4  ;;  %v3804_v6 = vrot.slane %v3803_v48, 4  ;;  %v3808_v8 = vrot.slane %v3806_v27, 5  ;;  %v3832_v17 = vrot.slane %v3830_v33, 5  ;;  %v7868_v48 = vld [vmem:[%s6708_s25 + $0xb0] sm:$0x1] }
  0xf3   : > { %v3818_v39 = vrot.slane %v3817_v22, 4  ;;  %v3828_v55 = vrot.slane %v3827_v23, 4  ;;  %v3842_v62 = vrot.slane %v3841_v59, 4  ;;  %v3865_v49 = vor.u32 %v3864_v18, %v3861_v63 }
  0xf4   : > { %6198 = vmatmul.mubr.msk.bf16.vlgmr.msra.gmra.mrb[0].mxu0 %vm669_vm3, %v7598_v16  ;;  %v7841_v16 = vsel %vm6960_vm7, %v7766_v28, %v8474_v31  ;;  %v3874_v28 = vrot.slane %v3872_v52, 4  ;;  %v3856_v26 = vrot.slane %v3854_v9, 5  ;;  %v3775_v52 = vsel %vm6734_vm4, %v3770_v40, %v7793_v61 }
  0xf5   : > { %6044 = vmatmul.mubr.msk.bf16.gmra.mrb[16].mxu1 %vm669_vm3, %v8473_v44  ;;  %6230 = vmatpush3.bf16.msra.mxu0 %v7539_v14  ;;  %v3780_v14 = vrot.slane %v3779_v4, 4  ;;  %v5532_v44 = vld [vmem:[%s6708_s25 + $0xa8] sm:$0xf]  ;;  %v3878_v22 = vshll.u32 %v7855_v57, 16  ;;  %v3799_v33 = vsel %vm6734_vm4, %v3794_v7, %v7805_v20  ;;  %v3809_v23 = vsel %vm6734_vm4, %v3804_v6, %v3808_v8 }
  0xf6   : > { %6047 = vmatprep.mubr.msk.bf16.mxu1 %vm669_vm3, %v8475_v11  ;;  %6201 = vmatprep.mubr.msk.bf16.mxu0 %vm669_vm3, %v7609_v29  ;;  %v3852_v29 = vrot.slane %v3851_v60, 4  ;;  %v3883_v4 = vshrl.u32 %v5532_v44, 16  ;;  %v3886_v50 = vshll.u32 %v5532_v44, 16  ;;  %v3875_v53 = vor.u32 %v3874_v28, %v7851_v54  ;;  %v5581_v11 = vld [vmem:[%s6708_s25 + $0x48] sm:$0xe] }
  0xf7   : > { %v3785_v27 = vsel %vm6734_vm4, %v3780_v14, %v3784_v51  ;;  %v3892_v59 = vshll.u32 %v7858_v34, 16  ;;  %v3896_v61 = vshrl.u32 %v7858_v34, 16  ;;  %v3823_v63 = vsel %vm6734_vm4, %v3818_v39, %v7807_v10  ;;  %v7933_v39 = vld [vmem:[%s6708_s25 + $0xb8] sm:$0xf] }
  0xf8   : > { %v3833_v18 = vsel %vm6734_vm4, %v3828_v55, %v3832_v17  ;;  %v3847_v20 = vsel %vm6734_vm4, %v3842_v62, %v7817_v46  ;;  %v3866_v31 = vrot.slane %v3865_v49, 4  ;;  %v8476_v51 = vcombine.low %v7571_v12, %v7586_v35 }
  0xf9   : > { %v3885_v10 = vrot.slane %v3883_v4, 4  ;;  %v3888_v60 = vrot.slane %v3886_v50, 5  ;;  %v3902_v9 = vshll.u32 %v7868_v48, 16  ;;  %v8477_v46 = vcombine.low %v7656_v21, %v7681_v56  ;;  %v5535_v21 = vld [vmem:[%s6708_s25 + $0xb4] sm:$0xf] }
  0xfa   : > { %v5202_v12 = vcombine.low %v7732_v42, %v7739_v47  ;;  %v8478_v35 = vsel %vm6734_vm4, %v7752_v5, %v7741_v41  ;;  %v3876_v14 = vrot.slane %v3875_v53, 4  ;;  %v3880_v28 = vrot.slane %v3878_v22, 5  ;;  %v5583_v4 = vld [vmem:[%s6708_s25 + $0x60] sm:$0xe]  ;;  %v5584_v53 = vld [vmem:[%s6708_s25 + $0x6c] sm:$0xe] }
  0xfb   : > { %v5203_v56 = vcombine.low %v7756_v43, %v7841_v16  ;;  %v7916_v44 = vcombine.low %v3775_v52, %v3785_v27  ;;  %v7918_v42 = vrot.slane %v3892_v59, 5  ;;  %v3898_v47 = vrot.slane %v3896_v61, 4  ;;  %v8487_v16 = vld [vmem:[#allocation4_spill] sm:$0xff] }
  0xfc   : > { %6202 = vmatmul.mubr.msk.bf16.gmra.mrb[4].mxu0 %vm669_vm3, %v7712_v37  ;;  %v3857_v37 = vsel %vm6734_vm4, %v3852_v29, %v3856_v26  ;;  %v7920_v41 = vcombine.low %v3799_v33, %v3809_v23  ;;  %v7922_v5 = vcombine.low %v3823_v63, %v3833_v18  ;;  %v3871_v6 = vsel %vm6734_vm4, %v3866_v31, %v7851_v54  ;;  %v8480_v23 = vld [vmem:[#allocation11_spill] sm:$0xff]  ;;  %v5538_v63 = vld [vmem:[%s6708_s25 + $0xc0] sm:$0xf]  ;;  %v8482_v18 = vld [vmem:[#allocation9_spill] sm:$0xff] }
  0xfd   : > { %6048 = vmatmul.mubr.msk.bf16.gmra.mrb[20].mxu1 %vm669_vm3, %v8476_v51  ;;  %6205 = vmatprep.mubr.msk.bf16.mxu0 %vm669_vm3, %v7726_v58  ;;  %v8479_v58 = vsel %vm6734_vm4, %v7714_v19, %v7669_v1  ;;  %v7924_v7 = vcombine.low %v3847_v20, %v3857_v37  ;;  %v5597_v1 = vrot.slane %v5581_v11, 9  ;;  %v5582_v19 = vld [vmem:[%s6708_s25 + $0x54] sm:$0xe]  ;;  %v3889_v8 = vor.u32 %v3888_v60, %v3885_v10  ;;  %v8483_v31 = vld [vmem:[#allocation10_spill] sm:$0xff] }
  0xfe   : > { %6051 = vmatprep.mubr.msk.bf16.mxu1 %vm669_vm3, %v8477_v46  ;;  %v5551_v40 = vcombine.low %v8479_v58, %v8478_v35  ;;  %v7930_v17 = vrot.slane %v3902_v9, 5  ;;  %v3907_v55 = vshrl.u32 %v5535_v21, 16  ;;  %v3881_v62 = vsel %vm6734_vm4, %v3876_v14, %v3880_v28  ;;  %v8484_v9 = vld [vmem:[#allocation12_spill] sm:$0xff]  ;;  %v7982_v35 = vld [vmem:[%s6708_s25 + $0xbc] sm:$0x1] }
  0xff   : > { %v3910_v49 = vshll.u32 %v5535_v21, 16  ;;  %v4366_v29 = vrot.slane %v7564_v0, 5  ;;  %v4369_v26 = vrot.slane %v7618_v38, 5  ;;  %v3899_v50 = vor.u32 %v3898_v47, %v7918_v42  ;;  %v7985_v58 = vld [vmem:[%s6708_s25 + $0xc4] sm:$0xf] }
 0x100   : > { %v5598_v52 = vrot.slane %v5582_v19, 9  ;;  %v4373_v54 = vrot.slane %v7575_v24, 5  ;;  %v4376_v27 = vrot.slane %v7627_v15, 5  ;;  %v3916_v22 = vshll.u32 %v7933_v39, 16  ;;  %v5585_v19 = vld [vmem:[%s6708_s25 + $0x78] sm:$0xe] }
 0x101   : > { %v3920_v33 = vshrl.u32 %v7933_v39, 16  ;;  %v7950_v0 = vsel %vm6960_vm7, %v5597_v1, %v4366_v29  ;;  %v4368_v38 = vrot.slane %v4366_v29, 4  ;;  %v8481_v59 = vcombine.low %v7689_v36, %v8480_v23  ;;  %v8485_v23 = vld [vmem:[#allocation13_spill] sm:$0xff] }
 0x102   : > { %v7957_v24 = vcombine.low %v3871_v6, %v3881_v62  ;;  %v7961_v15 = vsel %vm6960_vm7, %v5598_v52, %v4373_v54  ;;  %v5599_v61 = vrot.slane %v5583_v4, 9  ;;  %v4380_v20 = vrot.slane %v8482_v18, 5  ;;  %v6572_v6 = vld [vmem:[%s6708_s25 + $0xc] sm:$0xff]  }
 0x103   : > { %v7967_v36 = vsel %vm6960_vm7, %v4368_v38, %v4369_v26  ;;  %v4383_v51 = vrot.slane %v8483_v31, 5  ;;  %v5600_v37 = vrot.slane %v5584_v53, 9  ;;  %v4387_v11 = vrot.slane %v8484_v9, 5 }
 0x104   : > { %6206 = vmatmul.mubr.msk.bf16.gmra.mrb[8].mxu0 %vm669_vm3, %v7735_v30  ;;  %v4375_v30 = vrot.slane %v4373_v54, 4  ;;  %v5614_v10 = vcombine.low %v7950_v0, %v7967_v36  ;;  %v4390_v46 = vrot.slane %v7785_v45, 5  ;;  %v7991_v14 = vsel %vm6960_vm7, %v5599_v61, %v4380_v20 }
 0x105   : > { %6052 = vmatmul.mubr.msk.bf16.gmra.mrb[24].mxu1 %vm669_vm3, %v8481_v59  ;;  %6209 = vmatprep.mubr.msk.bf16.mxu0 %vm669_vm3, %v5551_v40  ;;  %v4382_v28 = vrot.slane %v4380_v20, 4  ;;  %v7993_v21 = vrot.slane %v3907_v55, 4  ;;  %v3931_v47 = vshrl.u32 %v5538_v63, 16  ;;  %v7997_v45 = vsel %vm6960_vm7, %v5600_v37, %v4387_v11  ;;  %v5312_v55 = vld [vmem:[%s6708_s25 + $0x78] sm:$0xf]  ;;  %v8486_v59 = vld [vmem:[#allocation16_spill] sm:$0xff] }
 0x106   : > { %6055 = vmatprep.mubr.msk.bf16.mxu1 %vm669_vm3, %v5202_v12  ;;  %v7975_v60 = vsel %vm6960_vm7, %v4375_v30, %v4376_v27  ;;  %v7979_v12 = vrot.slane %v3889_v8, 4  ;;  %v4389_v1 = vrot.slane %v4387_v11, 4  ;;  %v8001_v8 = vrot.slane %v3899_v50, 4 }
 0x107   : > { %v5615_v40 = vcombine.low %v7961_v15, %v7975_v60  ;;  %v8003_v62 = vrot.slane %v3910_v49, 5  ;;  %v3934_v29 = vshll.u32 %v5538_v63, 16  ;;  %v8007_v26 = vsel %vm6960_vm7, %v4382_v28, %v4383_v51  ;;  %v8489_v28 = vld [vmem:[#allocation14_spill] sm:$0xff] }
 0x108   : > { %v8010_v4 = vrot.slane %v3916_v22, 5  ;;  %v8012_v52 = vrot.slane %v3920_v33, 4  ;;  %v5616_v54 = vcombine.low %v7991_v14, %v8007_v26  ;;  %v8018_v27 = vsel %vm6960_vm7, %v4389_v1, %v4390_v46  ;;  %v5586_v33 = vld [vmem:[%s6708_s25 + $0x84] sm:$0xe]  ;;  %v6573_v1 = vld [vmem:[%s6708_s25 + $0x18] sm:$0xff]  }
 0x109   : > { %v3926_v49 = vshll.u32 %v7982_v35, 16  ;;  %v3940_v50 = vshll.u32 %v7985_v58, 16  ;;  %v5617_v53 = vcombine.low %v7997_v45, %v8018_v27  ;;  %v5601_v22 = vrot.slane %v5585_v19, 9  ;;  %v6635_v60 = vld [vmem:[%s6708_s25 + $0xa0] sm:$0xf] }
 0x10a   : > { %v3933_v38 = vrot.slane %v3931_v47, 4  ;;  %v4397_v30 = vrot.slane %v8486_v59, 5  ;;  %v2256_v61 = vshrl.u32 %v5312_v55, 16  ;;  %v3936_v63 = vrot.slane %v3934_v29, 5  ;;  %v5541_v29 = vld [vmem:[%s6708_s25 + $0xcc] sm:$0xf] }
 0x10b   : > { %v3944_v18 = vshrl.u32 %v7985_v58, 16  ;;  %v2259_v43 = vshll.u32 %v5312_v55, 16  ;;  %v5602_v37 = vrot.slane %v5586_v33, 9  ;;  %v3895_v9 = vsel %vm6734_vm4, %v7979_v12, %v7918_v42  ;;  %v8061_v55 = vld [vmem:[%s6708_s25 + $0xd0] sm:$0xf] }
 0x10c   : > { %6210 = vmatmul.mubr.msk.bf16.gmra.mrb[12].mxu0 %vm669_vm3, %v7916_v44  ;;  %v4394_v44 = vrot.slane %v8485_v23, 5  ;;  %v2258_v51 = vrot.slane %v2256_v61, 4  ;;  %v3913_v11 = vor.u32 %v8003_v62, %v7993_v21  ;;  %v4401_v47 = vrot.slane %v8489_v28, 5  ;;  %v6574_v21 = vld [vmem:[%s6708_s25 + $0x24] sm:$0xff]   ;;  %v6639_v27 = vld [vmem:[%s6708_s25 + $0xac] sm:$0xf] }
 0x10d   : > { %6056 = vmatmul.mubr.msk.bf16.gmra.mrb[28].mxu1 %vm669_vm3, %v5203_v56  ;;  %6213 = vmatprep.mubr.msk.bf16.mxu0 %vm669_vm3, %v7920_v41  ;;  %v8488_v56 = vld [vmem:[#allocation5_spill] sm:$0xff]  ;;  %v2261_v46 = vrot.slane %v2259_v43, 5  ;;  %v3905_v19 = vsel %vm6734_vm4, %v8001_v8, %v7930_v17  ;;  %v4404_v12 = vrot.slane %v7813_v2, 5  ;;  %v8069_v62 = vrot.slane %v3940_v50, 5  ;;  %v5587_v8 = vld [vmem:[%s6708_s25 + $0x90] sm:$0xe] }
 0x10e   : > { %6061 = vmatprep.mubr.msk.bf16.mxu1 %vm669_vm3, %v6572_v6  ;;  %v2278_v41 = vsel %vm6734_vm4, %v8488_v56, %v8487_v16  ;;  %v8043_v20 = vsel %vm6960_vm7, %v5601_v22, %v4394_v44  ;;  %v4396_v31 = vrot.slane %v4394_v44, 4  ;;  %v3923_v6 = vor.u32 %v8012_v52, %v8010_v4  ;;  %v8075_v52 = vld [vmem:[%s6708_s25 + $0xc8] sm:$0x1]  ;;  %v8491_v16 = vld [vmem:[#allocation2_spill] sm:$0xff] }
 0x10f   : > { %v3946_v22 = vrot.slane %v3944_v18, 4  ;;  %v2262_v17 = vor.u32 %v2261_v46, %v2258_v51  ;;  %v3928_v23 = vrot.slane %v3926_v49, 5  ;;  %v3937_v44 = vor.u32 %v3936_v63, %v3933_v38  ;;  %v8492_v51 = vld [vmem:[#allocation3_spill] sm:$0xff] }
 0x110   : > { %v8065_v42 = vsel %vm6960_vm7, %v4396_v31, %v4397_v30  ;;  %v8079_v59 = vsel %vm6960_vm7, %v5602_v37, %v4401_v47  ;;  %v4403_v30 = vrot.slane %v4401_v47, 4  ;;  %v3955_v2 = vshrl.u32 %v5541_v29, 16 }
 0x111   : > { %v5618_v33 = vcombine.low %v8043_v20, %v8065_v42  ;;  %v3958_v50 = vshll.u32 %v5541_v29, 16  ;;  %v3964_v61 = vshll.u32 %v8061_v55, 16  ;;  %v2263_v18 = vrot.slane %v2262_v17, 4  ;;  %v6575_v29 = vld [vmem:[%s6708_s25 + $0x30] sm:$0xff]  }
 0x112   : > { %v3968_v49 = vshrl.u32 %v8061_v55, 16  ;;  %v8090_v38 = vsel %vm6960_vm7, %v4403_v30, %v4404_v12  ;;  %v5603_v63 = vrot.slane %v5587_v8, 9  ;;  %v3947_v56 = vor.u32 %v3946_v22, %v8069_v62 }
 0x113   : > { %v3950_v31 = vshll.u32 %v8075_v52, 16  ;;  %v5619_v37 = vcombine.low %v8079_v59, %v8090_v38  ;;  %v5557_v46 = vcombine.low %v3895_v9, %v3905_v19  ;;  %v3914_v28 = vrot.slane %v3913_v11, 4  ;;  %v5588_v11 = vld [vmem:[%s6708_s25 + $0x9c] sm:$0xe] }
 0x114   : > { %6214 = vmatmul.mubr.msk.bf16.gmra.mrb[16].mxu0 %vm669_vm3, %v7922_v5  ;;  %v8490_v5 = vld [vmem:[#allocation15_spill] sm:$0xff]  ;;  %v3924_v47 = vrot.slane %v3923_v6, 4  ;;  %v3938_v12 = vrot.slane %v3937_v44, 4  ;;  %v4411_v8 = vrot.slane %v7822_v3, 5  ;;  %v3957_v30 = vrot.slane %v3955_v2, 4  ;;  %v6576_v19 = vld [vmem:[%s6708_s25 + $0x3c] sm:$0xff]  }
 0x115   : > { %6062 = vmatmul.mubr.msk.bf16.vlgmr.msra.gmra.mrb[0].mxu1 %vm669_vm3, %v6573_v1  ;;  %6217 = vmatprep.mubr.msk.bf16.mxu0 %vm669_vm3, %v7924_v7  ;;  %v4408_v43 = vrot.slane %v8490_v5, 5  ;;  %v2268_v7 = vsel %vm6734_vm4, %v2263_v18, %v8492_v51  ;;  %v3960_v18 = vrot.slane %v3958_v50, 5  ;;  %v8113_v5 = vrot.slane %v3964_v61, 5 }
 0x116   : > { %6264 = vmatpush3.bf16.msra.mxu1 %v8491_v16  ;;  %6065 = vmatprep.mubr.msk.bf16.mxu1 %vm669_vm3, %v6574_v21  ;;  %v8102_v1 = vcombine.low %v2268_v7, %v2278_v41  ;;  %v8106_v21 = vld [vmem:[%s6708_s25 + $0xd4] sm:$0x1]  ;;  %v3970_v9 = vrot.slane %v3968_v49, 4  ;;  %v3948_v41 = vrot.slane %v3947_v56, 4  ;;  %v3952_v6 = vrot.slane %v3950_v31, 5 }
 0x117   : > { %v8110_v22 = vsel %vm6960_vm7, %v5603_v63, %v4408_v43  ;;  %v4410_v17 = vrot.slane %v4408_v43, 4  ;;  %v3919_v63 = vsel %vm6734_vm4, %v3914_v28, %v8010_v4  ;;  %v3929_v2 = vsel %vm6734_vm4, %v3924_v47, %v3928_v23  ;;  %v6626_v16 = vld [vmem:[%s6708_s25 + $0x1c] sm:$0xf]  ;;  %v5589_v28 = vld [vmem:[%s6708_s25 + $0xa8] sm:$0xe] }
 0x118   : > { %v3974_v50 = vshll.u32 %v8106_v21, 16  ;;  %v5604_v61 = vrot.slane %v5588_v11, 9  ;;  %v4415_v49 = vrot.slane %v7810_v25, 5  ;;  %v3943_v4 = vsel %vm6734_vm4, %v3938_v12, %v8069_v62  ;;  %v5577_v62 = vld [vmem:[%s6708_s25 + $0x18] sm:$0xe]  ;;  %v6577_v47 = vld [vmem:[%s6708_s25 + $0x48] sm:$0xff]  }
 0x119   : > { %v8119_v44 = vsel %vm6960_vm7, %v4410_v17, %v4411_v8  ;;  %v3971_v43 = vor.u32 %v3970_v9, %v8113_v5  ;;  %v4418_v23 = vrot.slane %v7855_v57, 5  ;;  %v3953_v25 = vsel %vm6734_vm4, %v3948_v41, %v3952_v6  ;;  %v6627_v11 = vld [vmem:[%s6708_s25 + $0x20] sm:$0x1] }
 0x11a   : > { %v5620_v3 = vcombine.low %v8110_v22, %v8119_v44  ;;  %v4338_v56 = vrot.slane %v6626_v16, 5  ;;  %v8145_v31 = vsel %vm6960_vm7, %v5604_v61, %v4415_v49  ;;  %v4417_v51 = vrot.slane %v4415_v49, 4  ;;  %v5590_v49 = vld [vmem:[%s6708_s25 + $0xb4] sm:$0xe] }
 0x11b   : > { %v5558_v7 = vcombine.low %v3919_v63, %v3929_v2  ;;  %v3972_v17 = vrot.slane %v3971_v43, 4  ;;  %v5605_v41 = vrot.slane %v5589_v28, 9  ;;  %v4422_v6 = vrot.slane %v7858_v34, 5  ;;  %v5578_v2 = vld [vmem:[%s6708_s25 + $0x24] sm:$0xe] }
 0x11c   : > { %6218 = vmatmul.mubr.msk.bf16.gmra.mrb[20].mxu0 %vm669_vm3, %v7957_v24  ;;  %v3961_v24 = vor.u32 %v3960_v18, %v3957_v30  ;;  %v8150_v57 = vsel %vm6960_vm7, %v4417_v51, %v4418_v23  ;;  %v6578_v30 = vld [vmem:[%s6708_s25 + $0x54] sm:$0xff]   ;;  %v5593_v18 = vrot.slane %v5577_v62, 9  ;;  %v4340_v9 = vrot.slane %v4338_v56, 4  ;;  %v6630_v28 = vld [vmem:[%s6708_s25 + $0x2c] sm:$0x1] }
 0x11d   : > { %6066 = vmatmul.mubr.msk.bf16.gmra.mrb[4].mxu1 %vm669_vm3, %v6575_v29  ;;  %6221 = vmatprep.mubr.msk.bf16.mxu0 %vm669_vm3, %v5557_v46  ;;  %v3976_v46 = vrot.slane %v3974_v50, 5  ;;  %v5559_v29 = vcombine.low %v3943_v4, %v3953_v25  ;;  %v5621_v8 = vcombine.low %v8145_v31, %v8150_v57  ;;  %v4425_v63 = vrot.slane %v7868_v48, 5  ;;  %v6628_v50 = vld [vmem:[%s6708_s25 + $0x28] sm:$0xf]  ;;  %v5579_v25 = vld [vmem:[%s6708_s25 + $0x30] sm:$0xe] }
 0x11e   : > { %6069 = vmatprep.mubr.msk.bf16.mxu1 %vm669_vm3, %v6576_v19  ;;  %v3962_v12 = vrot.slane %v3961_v24, 4  ;;  %v4341_v19 = vrot.slane %v6627_v11, 5  ;;  %v4345_v61 = vrot.slane %v6628_v50, 5  ;;  %v8173_v48 = vsel %vm6960_vm7, %v5605_v41, %v4422_v6  ;;  %v6580_v11 = vld [vmem:[%s6708_s25 + $0x6c] sm:$0xff]   ;;  %v8493_v41 = vld [vmem:[#allocation6_spill] sm:$0xff] }
 0x11f   : > { %v3977_v34 = vsel %vm6734_vm4, %v3972_v17, %v3976_v46  ;;  %v4424_v24 = vrot.slane %v4422_v6, 4  ;;  %v4339_v43 = vsel %vm6960_vm7, %v5593_v18, %v4338_v56  ;;  %v5594_v51 = vrot.slane %v5578_v2, 9  ;;  %v5591_v50 = vld [vmem:[%s6708_s25 + $0xc0] sm:$0xe]  ;;  %v6644_v31 = vld [vmem:[%s6708_s25 + $0xc8] sm:$0x1] }
 0x120   : > { %v3967_v4 = vsel %vm6734_vm4, %v3962_v12, %v8113_v5  ;;  %v4342_v23 = vsel %vm6960_vm7, %v4340_v9, %v4341_v19  ;;  %v6629_v5 = vld [vmem:[%s6708_s25 + $0x34] sm:$0xf]  ;;  %v6579_v12 = vld [vmem:[%s6708_s25 + $0x60] sm:$0xff]   ;;  %v5595_v18 = vrot.slane %v5579_v25, 9  ;;  %v4432_v9 = vrot.slane %v7982_v35, 5 }
 0x121   : > { %v4352_v16 = vrot.slane %v6629_v5, 5  ;;  %v8184_v62 = vsel %vm6960_vm7, %v4424_v24, %v4425_v63  ;;  %v5560_v46 = vcombine.low %v3967_v4, %v3977_v34  ;;  %v5610_v17 = vcombine.low %v4339_v43, %v4342_v23  ;;  %v5580_v24 = vld [vmem:[%s6708_s25 + $0x3c] sm:$0xe] }
 0x122   : > { %v5622_v56 = vcombine.low %v8173_v48, %v8184_v62  ;;  %v4355_v6 = vrot.slane %v8493_v41, 5  ;;  %v4346_v35 = vsel %vm6960_vm7, %v5594_v51, %v4345_v61  ;;  %v5607_v5 = vrot.slane %v5591_v50, 9 }
 0x123   : > { %v4354_v19 = vrot.slane %v4352_v16, 4  ;;  %v4353_v23 = vsel %vm6960_vm7, %v5595_v18, %v4352_v16  ;;  %v4439_v51 = vrot.slane %v8075_v52, 5  ;;  %v2419_v57 = vshll.u32 %v6644_v31, 16 }
 0x124   : > { %6222 = vmatmul.mubr.msk.bf16.gmra.mrb[24].mxu0 %vm669_vm3, %v5558_v7  ;;  %v5606_v7 = vrot.slane %v5590_v49, 9 }
 0x125   : > { %6070 = vmatmul.mubr.msk.bf16.gmra.mrb[8].mxu1 %vm669_vm3, %v6577_v47  ;;  %6225 = vmatprep.mubr.msk.bf16.mxu0 %vm669_vm3, %v5559_v29  ;;  %v4348_v47 = vrot.slane %v6630_v28, 5  ;;  %v4429_v29 = vrot.slane %v7933_v39, 5  ;;  %v8494_v39 = vld [vmem:[#allocation7_spill] sm:$0xff]  ;;  %v4356_v25 = vsel %vm6960_vm7, %v4354_v19, %v4355_v6  ;;  %v5596_v28 = vrot.slane %v5580_v24, 9 }
 0x126   : > { %6073 = vmatprep.mubr.msk.bf16.mxu1 %vm669_vm3, %v6578_v30  ;;  %v4347_v30 = vrot.slane %v4345_v61, 4  ;;  %v4359_v49 = vrot.slane %v8494_v39, 5  ;;  %v4436_v61 = vrot.slane %v7985_v58, 5  ;;  %v6631_v39 = vld [vmem:[%s6708_s25 + $0x70] sm:$0xf]  ;;  %v4443_v24 = vrot.slane %v8061_v55, 5 }
 0x127   : > { %v8196_v63 = vsel %vm6960_vm7, %v5606_v7, %v4429_v29  ;;  %v4431_v2 = vrot.slane %v4429_v29, 4  ;;  %v5309_v7 = vld [vmem:[%s6708_s25 + $0x6c] sm:$0xf]  ;;  %v8495_v29 = vld [vmem:[#allocation8_spill] sm:$0xff] }
 0x128   : > { %v4349_v34 = vsel %vm6960_vm7, %v4347_v30, %v4348_v47  ;;  %v4361_v47 = vrot.slane %v4359_v49, 4  ;;  %v6581_v30 = vld [vmem:[%s6708_s25 + $0x78] sm:$0xff]   ;;  %v8227_v16 = vsel %vm6960_vm7, %v5607_v5, %v4436_v61  ;;  %v4438_v18 = vrot.slane %v4436_v61, 4 }
 0x129   : > { %v8203_v4 = vsel %vm6960_vm7, %v4431_v2, %v4432_v9  ;;  %v5612_v9 = vcombine.low %v4353_v23, %v4356_v25  ;;  %v2232_v19 = vshrl.u32 %v5309_v7, 16  ;;  %v2235_v41 = vshll.u32 %v5309_v7, 16 }
 0x12a   : > { %v5623_v43 = vcombine.low %v8196_v63, %v8203_v4  ;;  %v8232_v58 = vsel %vm6960_vm7, %v4438_v18, %v4439_v51  ;;  %v4360_v6 = vsel %vm6960_vm7, %v5596_v28, %v4359_v49  ;;  %v4446_v49 = vrot.slane %v8106_v21, 5  ;;  %v6583_v51 = vld [vmem:[%s6708_s25 + $0x90] sm:$0xff]   ;;  %v6584_v21 = vld [vmem:[%s6708_s25 + $0x9c] sm:$0xff]  }
 0x12b   : > { %v5624_v50 = vcombine.low %v8227_v16, %v8232_v58  ;;  %v2234_v23 = vrot.slane %v2232_v19, 4  ;;  %v2237_v25 = vrot.slane %v2235_v41, 5  ;;  %v4445_v7 = vrot.slane %v4443_v24, 4 }
 0x12c   : > { %6226 = vmatmul.mubr.msk.bf16.gmra.mrb[28].mxu0 %vm669_vm3, %v5560_v46  ;;  %v5611_v46 = vcombine.low %v4346_v35, %v4349_v34  ;;  %v2241_v35 = vshll.u32 %v6631_v39, 16  ;;  %v2245_v34 = vshrl.u32 %v6631_v39, 16 }
 0x12d   : > { %6074 = vmatmul.mubr.msk.bf16.gmra.mrb[12].mxu1 %vm669_vm3, %v6579_v12  ;;  %6231 = vmatprep.mubr.msk.bf16.mxu0 %vm669_vm3, %v5610_v17  ;;  %v4362_v12 = vrot.slane %v8495_v29, 5  ;;  %v5592_v17 = vld [vmem:[%s6708_s25 + $0xcc] sm:$0xe]  ;;  %v8254_v55 = vsel %vm6960_vm7, %v4445_v7, %v4446_v49 }
 0x12e   : > { %6077 = vmatprep.mubr.msk.bf16.mxu1 %vm669_vm3, %v6580_v11  ;;  %v6582_v11 = vld [vmem:[%s6708_s25 + $0x84] sm:$0xff]   ;;  %v5608_v52 = vrot.slane %v5592_v17, 9  ;;  %v2247_v28 = vrot.slane %v2245_v34, 4  ;;  %v6632_v17 = vld [vmem:[%s6708_s25 + $0x74] sm:$0x1] }
 0x12f   : > { %v4363_v2 = vsel %vm6960_vm7, %v4361_v47, %v4362_v12  ;;  %v5315_v47 = vld [vmem:[%s6708_s25 + $0x84] sm:$0xf]  ;;  %v2238_v12 = vor.u32 %v2237_v25, %v2234_v23  ;;  %v6586_v34 = vld [vmem:[%s6708_s25 + $0xb4] sm:$0xff]  }
 0x130   : > { %v8249_v5 = vsel %vm6960_vm7, %v5608_v52, %v4443_v24  ;;  %v5613_v61 = vcombine.low %v4360_v6, %v4363_v2  ;;  %v2283_v18 = vshll.u32 %v5315_v47, 16  ;;  %v5318_v6 = vld [vmem:[%s6708_s25 + $0x90] sm:$0xf]  ;;  %v6585_v2 = vld [vmem:[%s6708_s25 + $0xa8] sm:$0xff]  }
 0x131   : > { %v5625_v29 = vcombine.low %v8249_v5, %v8254_v55  ;;  %v2239_v52 = vrot.slane %v2238_v12, 4  ;;  %v2304_v23 = vshrl.u32 %v5318_v6, 16  ;;  %v2307_v25 = vshll.u32 %v5318_v6, 16 }
 0x132   : > { %v2337_v12 = vshll.u32 %v6635_v60, 16 }
 0x133   : > { %v2309_v14 = vrot.slane %v2307_v25, 5  ;;  %v6638_v25 = vld [vmem:[%s6708_s25 + $0xa4] sm:$0x1] }
 0x134   : > { %6232 = vmatmul.mubr.msk.bf16.vlgmr.msra.gmra.mrb[0].mxu0 %vm669_vm3, %v5611_v46  ;;  %v2243_v46 = vrot.slane %v2241_v35, 5  ;;  %v5321_v35 = vld [vmem:[%s6708_s25 + $0x9c] sm:$0xf]  ;;  %v8296_v6 = vrot.slane %v2337_v12, 5 }
 0x135   : > { %6078 = vmatmul.mubr.msk.bf16.gmra.mrb[16].mxu1 %vm669_vm3, %v6581_v30  ;;  %6235 = vmatprep.mubr.msk.bf16.mxu0 %vm669_vm3, %v5612_v9  ;;  %v2251_v30 = vshll.u32 %v6632_v17, 16  ;;  %v2280_v9 = vshrl.u32 %v5315_v47, 16  ;;  %v2331_v47 = vshll.u32 %v5321_v35, 16  ;;  %v6636_v17 = vld [vmem:[%s6708_s25 + $0x8c] sm:$0x1] }
 0x136   : > { %6081 = vmatprep.mubr.msk.bf16.mxu1 %vm669_vm3, %v6582_v11  ;;  %v2248_v13 = vor.u32 %v2247_v28, %v2243_v46  ;;  %v6633_v11 = vld [vmem:[%s6708_s25 + $0x88] sm:$0xf]  ;;  %v2244_v7 = vsel %vm6734_vm4, %v2239_v52, %v2243_v46 }
 0x137   : > { %v2289_v19 = vshll.u32 %v6633_v11, 16  ;;  %v2293_v41 = vshrl.u32 %v6633_v11, 16  ;;  %v2253_v0 = vrot.slane %v2251_v30, 5  ;;  %v2282_v36 = vrot.slane %v2280_v9, 4 }
 0x138   : > { %v2249_v39 = vrot.slane %v2248_v13, 4  ;;  %v2299_v30 = vshll.u32 %v6636_v17, 16  ;;  %v2306_v9 = vrot.slane %v2304_v23, 4  ;;  %v2333_v11 = vrot.slane %v2331_v47, 5 }
 0x139   : > { %v8273_v24 = vrot.slane %v2289_v19, 5  ;;  %v2295_v49 = vrot.slane %v2293_v41, 4  ;;  %v6587_v19 = vld [vmem:[%s6708_s25 + $0xc0] sm:$0xff]  }
 0x13a   : > { %v2254_v46 = vsel %vm6734_vm4, %v2249_v39, %v2253_v0  ;;  %v5324_v39 = vld [vmem:[%s6708_s25 + $0xa8] sm:$0xf] }
 0x13b   : > { %v2296_v13 = vor.u32 %v2295_v49, %v8273_v24  ;;  %v5342_v41 = vcombine.low %v2244_v7, %v2254_v46  ;;  %v2347_v7 = vshll.u32 %v6638_v25, 16  ;;  %v2355_v45 = vshll.u32 %v5324_v39, 16 }
 0x13c   : > { %6236 = vmatmul.mubr.msk.bf16.gmra.mrb[4].mxu0 %vm669_vm3, %v5613_v61  ;;  %v6634_v61 = vld [vmem:[%s6708_s25 + $0x94] sm:$0xf] }
 0x13d   : > { %6082 = vmatmul.mubr.msk.bf16.gmra.mrb[20].mxu1 %vm669_vm3, %v6583_v51  ;;  %6239 = vmatprep.mubr.msk.bf16.mxu0 %vm669_vm3, %v5614_v10  ;;  %v2285_v10 = vrot.slane %v2283_v18, 5  ;;  %v2313_v51 = vshll.u32 %v6634_v61, 16  ;;  %v2317_v28 = vshrl.u32 %v6634_v61, 16  ;;  %v2297_v0 = vrot.slane %v2296_v13, 4 }
 0x13e   : > { %6085 = vmatprep.mubr.msk.bf16.mxu1 %vm669_vm3, %v6584_v21  ;;  %v2328_v21 = vshrl.u32 %v5321_v35, 16  ;;  %v6637_v35 = vld [vmem:[%s6708_s25 + $0x98] sm:$0x1]  ;;  %v2352_v61 = vshrl.u32 %v5324_v39, 16  ;;  %v5330_v39 = vld [vmem:[%s6708_s25 + $0xc0] sm:$0xf] }
 0x13f   : > { %v2286_v15 = vor.u32 %v2285_v10, %v2282_v36  ;;  %v8293_v26 = vrot.slane %v2313_v51, 5  ;;  %v2301_v36 = vrot.slane %v2299_v30, 5  ;;  %v2310_v10 = vor.u32 %v2309_v14, %v2306_v9  ;;  %v5327_v51 = vld [vmem:[%s6708_s25 + $0xb4] sm:$0xf] }
 0x140   : > { %v2330_v18 = vrot.slane %v2328_v21, 4  ;;  %v2365_v21 = vshrl.u32 %v6639_v27, 16  ;;  %v2376_v20 = vshrl.u32 %v5327_v51, 16  ;;  %v2379_v42 = vshll.u32 %v5327_v51, 16 }
 0x141   : > { %v2287_v52 = vrot.slane %v2286_v15, 4  ;;  %v2302_v46 = vsel %vm6734_vm4, %v2297_v0, %v2301_v36  ;;  %v2311_v15 = vrot.slane %v2310_v10, 4  ;;  %v2349_v30 = vrot.slane %v2347_v7, 5 }
 0x142   : > { %v2334_v23 = vor.u32 %v2333_v11, %v2330_v18  ;;  %v2354_v9 = vrot.slane %v2352_v61, 4  ;;  %v2367_v11 = vrot.slane %v2365_v21, 4  ;;  %v6643_v61 = vld [vmem:[%s6708_s25 + $0xbc] sm:$0x1] }
 0x143   : > { %v2292_v47 = vsel %vm6734_vm4, %v2287_v52, %v8273_v24  ;;  %v2316_v0 = vsel %vm6734_vm4, %v2311_v15, %v8293_v26  ;;  %v2395_v22 = vshll.u32 %v6643_v61, 16 }
 0x144   : > { %6240 = vmatmul.mubr.msk.bf16.gmra.mrb[8].mxu0 %vm669_vm3, %v5615_v40  ;;  %v2341_v40 = vshrl.u32 %v6635_v60, 16  ;;  %v2335_v17 = vrot.slane %v2334_v23, 4  ;;  %v5344_v24 = vcombine.low %v2292_v47, %v2302_v46 }
 0x145   : > { %6086 = vmatmul.mubr.msk.bf16.gmra.mrb[24].mxu1 %vm669_vm3, %v6585_v2  ;;  %6243 = vmatprep.mubr.msk.bf16.mxu0 %vm669_vm3, %v5616_v54  ;;  %v2319_v54 = vrot.slane %v2317_v28, 4 }
 0x146   : > { %6089 = vmatprep.mubr.msk.bf16.mxu1 %vm669_vm3, %v6586_v34  ;;  %v2343_v2 = vrot.slane %v2341_v40, 4  ;;  %v2323_v34 = vshll.u32 %v6637_v35, 16  ;;  %v2340_v10 = vsel %vm6734_vm4, %v2335_v17, %v8296_v6  ;;  %v2421_v17 = vrot.slane %v2419_v57, 5 }
 0x147   : > { %v2320_v49 = vor.u32 %v2319_v54, %v8293_v26  ;;  %v2357_v54 = vrot.slane %v2355_v45, 5  ;;  %v6641_v26 = vld [vmem:[%s6708_s25 + $0xb0] sm:$0x1] }
 0x148   : > { %v2344_v28 = vor.u32 %v2343_v2, %v8296_v6  ;;  %v2325_v60 = vrot.slane %v2323_v34, 5  ;;  %v2371_v35 = vshll.u32 %v6641_v26, 16  ;;  %v2400_v34 = vshrl.u32 %v5330_v39, 16 }
 0x149   : > { %v2321_v13 = vrot.slane %v2320_v49, 4  ;;  %v2358_v38 = vor.u32 %v2357_v54, %v2354_v9  ;;  %v2403_v6 = vshll.u32 %v5330_v39, 16  ;;  %v6642_v49 = vld [vmem:[%s6708_s25 + $0xc4] sm:$0xf] }
 0x14a   : > { %v2345_v14 = vrot.slane %v2344_v28, 4  ;;  %v2409_v23 = vshll.u32 %v6642_v49, 16  ;;  %v2413_v25 = vshrl.u32 %v6642_v49, 16  ;;  %v2373_v45 = vrot.slane %v2371_v35, 5 }
 0x14b   : > { %v2326_v36 = vsel %vm6734_vm4, %v2321_v13, %v2325_v60  ;;  %v2359_v51 = vrot.slane %v2358_v38, 4  ;;  %v2397_v60 = vrot.slane %v2395_v22, 5 }
 0x14c   : > { %6244 = vmatmul.mubr.msk.bf16.gmra.mrb[12].mxu0 %vm669_vm3, %v5617_v53  ;;  %v2361_v53 = vshll.u32 %v6639_v27, 16  ;;  %v2350_v59 = vsel %vm6734_vm4, %v2345_v14, %v2349_v30  ;;  %v5345_v44 = vcombine.low %v2316_v0, %v2326_v36  ;;  %v2402_v27 = vrot.slane %v2400_v34, 4 }
 0x14d   : > { %6090 = vmatmul.mubr.msk.bf16.gmra.mrb[28].mxu1 %vm669_vm3, %v6587_v19  ;;  %6247 = vmatprep.mubr.msk.bf16.mxu0 %vm669_vm3, %v5618_v33  ;;  %v6640_v33 = vld [vmem:[%s6708_s25 + $0xb8] sm:$0xf]  ;;  %v2378_v19 = vrot.slane %v2376_v20, 4  ;;  %v2411_v21 = vrot.slane %v2409_v23, 5  ;;  %v2415_v47 = vrot.slane %v2413_v25, 4 }
 0x14e   : > { %6111 = vmatprep.mubr.msk.bf16.mxu1 %vm669_vm3, %v5342_v41  ;;  %v2385_v12 = vshll.u32 %v6640_v33, 16  ;;  %v2389_v40 = vshrl.u32 %v6640_v33, 16  ;;  %v2363_v18 = vrot.slane %v2361_v53, 5  ;;  %v2381_v41 = vrot.slane %v2379_v42, 5 }
 0x14f   : > { %v2405_v53 = vrot.slane %v2403_v6, 5 }
 0x150   : > { %v2387_v52 = vrot.slane %v2385_v12, 5  ;;  %v2391_v2 = vrot.slane %v2389_v40, 4  ;;  %v2364_v20 = vsel %vm6734_vm4, %v2359_v51, %v2363_v18  ;;  %v2416_v12 = vor.u32 %v2415_v47, %v2411_v21 }
 0x151   : > { %v2406_v33 = vor.u32 %v2405_v53, %v2402_v27 }
 0x152   : > { %v2392_v7 = vor.u32 %v2391_v2, %v2387_v52  ;;  %v2417_v13 = vrot.slane %v2416_v12, 4 }
 0x153   : > { %v2407_v40 = vrot.slane %v2406_v33, 4 }
 0x154   : > { %6248 = vmatmul.mubr.msk.bf16.gmra.mrb[16].mxu0 %vm669_vm3, %v5619_v37  ;;  %v2368_v37 = vor.u32 %v2367_v11, %v2363_v18  ;;  %v2393_v15 = vrot.slane %v2392_v7, 4  ;;  %v2422_v9 = vsel %vm6734_vm4, %v2417_v13, %v2421_v17 }
 0x155   : > { %6112 = vmatmul.mubr.msk.bf16.vlgmr.msra.gmra.mrb[16].mxu1 %vm669_vm3, %v8102_v1  ;;  %6251 = vmatprep.mubr.msk.bf16.mxu0 %vm669_vm3, %v5620_v3  ;;  %v2382_v1 = vor.u32 %v2381_v41, %v2378_v19  ;;  %v5346_v3 = vcombine.low %v2340_v10, %v2350_v59  ;;  %v2412_v30 = vsel %vm6734_vm4, %v2407_v40, %v2411_v21 }
 0x156   : > { %6115 = vmatprep.mubr.msk.bf16.mxu1 %vm669_vm3, %v5344_v24  ;;  %v2369_v28 = vrot.slane %v2368_v37, 4  ;;  %v2398_v48 = vsel %vm6734_vm4, %v2393_v15, %v2397_v60  ;;  %v5349_v14 = vcombine.low %v2412_v30, %v2422_v9 }
 0x157   : > { %v2383_v46 = vrot.slane %v2382_v1, 4 }
 0x158   : > { %v2374_v42 = vsel %vm6734_vm4, %v2369_v28, %v2373_v45 }
 0x159   : > { %v5347_v62 = vcombine.low %v2364_v20, %v2374_v42 }
 0x15c   : > { %6252 = vmatmul.mubr.msk.bf16.gmra.mrb[20].mxu0 %vm669_vm3, %v5621_v8  ;;  %v2388_v8 = vsel %vm6734_vm4, %v2383_v46, %v2387_v52 }
 0x15d   : > { %6116 = vmatmul.mubr.msk.bf16.gmra.mrb[20].mxu1 %vm669_vm3, %v5345_v44  ;;  %6255 = vmatprep.mubr.msk.bf16.mxu0 %vm669_vm3, %v5622_v56  ;;  %v5348_v56 = vcombine.low %v2388_v8, %v2398_v48 }
 0x15e   : > { %6119 = vmatprep.mubr.msk.bf16.mxu1 %vm669_vm3, %v5346_v3 }
 0x164   : > { %6256 = vmatmul.mubr.msk.bf16.gmra.mrb[24].mxu0 %vm669_vm3, %v5623_v43 }
 0x165   : > { %6120 = vmatmul.mubr.msk.bf16.gmra.mrb[24].mxu1 %vm669_vm3, %v5347_v62  ;;  %6259 = vmatprep.mubr.msk.bf16.mxu0 %vm669_vm3, %v5624_v50 }
 0x166   : > { %6123 = vmatprep.mubr.msk.bf16.mxu1 %vm669_vm3, %v5348_v56 }
 0x16c   : > { %6260 = vmatmul.mubr.msk.bf16.gmra.mrb[28].mxu0 %vm669_vm3, %v5625_v29 }
 0x16d   : > { %6124 = vmatmul.mubr.msk.bf16.gmra.mrb[28].mxu1 %vm669_vm3, %v5349_v14 }
 0x1e8   : > { %v6063_v63 = vpop.f32.mrb[0].mxu1 }
 0x1e9   : > { %v1832_v4 = vpop.f32.mrb[1].mxu1 }
 0x1ea   : > { %v6064_v43 = vpop.f32.mrb[2].mxu1 }
 0x1eb   : > { %v1835_v16 = vpop.f32.mrb[3].mxu1 }
 0x1f0   : > { %v6067_v58 = vpop.f32.mrb[4].mxu1 }
 0x1f1   : > { %v1848_v50 = vpop.f32.mrb[5].mxu1 }
 0x1f2   : > { %v6068_v54 = vpop.f32.mrb[6].mxu1 }
 0x1f3   : > { %v1851_v18 = vpop.f32.mrb[7].mxu1 }
 0x1f8   : > { %v6071_v11 = vpop.f32.mrb[8].mxu1 }
 0x1f9   : > { %v1864_v32 = vpop.f32.mrb[9].mxu1 }
 0x1fa   : > { %v6072_v24 = vpop.f32.mrb[10].mxu1 }
 0x1fb   : > { %v1867_v19 = vpop.f32.mrb[11].mxu1 }
 0x200   : > { %v8384_v41 = vpop.f32.mrb[12].mxu1 }
 0x201   : > { %v8386_v5 = vpop.f32.mrb[13].mxu1 }
 0x202   : > { %v8388_v55 = vpop.f32.mrb[14].mxu1 }
 0x203   : > { %v8390_v29 = vpop.f32.mrb[15].mxu1 }
 0x207   : > { %v6233_v52 = vpop.f32.mrb[0].mxu0 }
 0x208   : > { %v6265_v2 = vadd.f32 %v6233_v52, %v6063_v63  ;;  %v4583_v39 = vpop.f32.mrb[1].mxu0 }
 0x209   : > { %v6266_v0 = vadd.f32 %v4583_v39, %v1832_v4  ;;  %v6234_v36 = vpop.f32.mrb[2].mxu0 }
 0x20a   : > { %v6267_v10 = vadd.f32 %v6234_v36, %v6064_v43  ;;  %v4586_v59 = vpop.f32.mrb[3].mxu0  ;;  %v4941_v49 = vmul.f32 %v6265_v2, %v6265_v2 }
 0x20b   : > { %v6268_v38 = vadd.f32 %v4586_v59, %v1835_v16  ;;  %v4939_v26 = vmul.f32 %v6266_v0, %v6266_v0 }
 0x20c   : > { %v5717_v37 = vpack.c.bf16 %v6267_v10, %v6265_v2  ;;  %v4942_v22 = vmul.f32 %v6267_v10, %v6267_v10 }
 0x20d   : > { %v5712_v35 = vpack.c.bf16 %v6268_v38, %v6266_v0  ;;  %v4902_v34 = vadd.f32 %v6268_v38, %v6266_v0  ;;  %v4940_v6 = vmul.f32 %v6268_v38, %v6268_v38 }
 0x20e   : > { %5789 = vst [vmem:[%s8396_s18 + $0x8] sm:$0xff] %v5717_v37  }
 0x20f   : > { %5713 = vst [vmem:[%s8396_s18] sm:$0xff] %v5712_v35   ;;  %v4903_v23 = vadd.f32 %v6265_v2, %v4902_v34  ;;  %v4971_v25 = vadd.f32 %v4940_v6, %v4939_v26  ;;  %v6237_v1 = vpop.f32.mrb[4].mxu0 }
 0x210   : > { %v6269_v7 = vadd.f32 %v6237_v1, %v6067_v58  ;;  %v4599_v61 = vpop.f32.mrb[5].mxu0 }
 0x211   : > { %v4972_v44 = vadd.f32 %v4971_v25, %v4941_v49  ;;  %v6270_v3 = vadd.f32 %v4599_v61, %v1848_v50  ;;  %v4904_v51 = vadd.f32 %v6267_v10, %v4903_v23  ;;  %v6238_v28 = vpop.f32.mrb[6].mxu0 }
 0x212   : > { %v6271_v45 = vadd.f32 %v6238_v28, %v6068_v54  ;;  %v4602_v27 = vpop.f32.mrb[7].mxu0  ;;  %v4945_v12 = vmul.f32 %v6269_v7, %v6269_v7 }
 0x213   : > { %v4905_v53 = vadd.f32 %v6270_v3, %v4904_v51  ;;  %v4943_v21 = vmul.f32 %v6270_v3, %v6270_v3  ;;  %v4973_v47 = vadd.f32 %v4972_v44, %v4942_v22  ;;  %v6272_v46 = vadd.f32 %v4602_v27, %v1851_v18 }
 0x214   : > { %v5727_v15 = vpack.c.bf16 %v6271_v45, %v6269_v7  ;;  %v4946_v56 = vmul.f32 %v6271_v45, %v6271_v45 }
 0x215   : > { %v4974_v60 = vadd.f32 %v4973_v47, %v4943_v21  ;;  %v5722_v20 = vpack.c.bf16 %v6272_v46, %v6270_v3  ;;  %v4906_v42 = vadd.f32 %v6272_v46, %v4905_v53  ;;  %v4944_v33 = vmul.f32 %v6272_v46, %v6272_v46 }
 0x216   : > { %5791 = vst [vmem:[%s8396_s18 + $0x18] sm:$0xff] %v5727_v15  }
 0x217   : > { %5790 = vst [vmem:[%s8396_s18 + $0x10] sm:$0xff] %v5722_v20   ;;  %v4907_v31 = vadd.f32 %v6269_v7, %v4906_v42  ;;  %v4975_v57 = vadd.f32 %v4974_v60, %v4944_v33  ;;  %v6241_v8 = vpop.f32.mrb[8].mxu0 }
 0x218   : > { %v6273_v48 = vadd.f32 %v6241_v8, %v6071_v11  ;;  %v4615_v62 = vpop.f32.mrb[9].mxu0 }
 0x219   : > { %v4976_v40 = vadd.f32 %v4975_v57, %v4945_v12  ;;  %v6274_v13 = vadd.f32 %v4615_v62, %v1864_v32  ;;  %v4908_v17 = vadd.f32 %v6271_v45, %v4907_v31  ;;  %v6242_v30 = vpop.f32.mrb[10].mxu0 }
 0x21a   : > { %v6275_v9 = vadd.f32 %v6242_v30, %v6072_v24  ;;  %v4618_v14 = vpop.f32.mrb[11].mxu0  ;;  %v4949_v11 = vmul.f32 %v6273_v48, %v6273_v48 }
 0x21b   : > { %v4909_v63 = vadd.f32 %v6274_v13, %v4908_v17  ;;  %v4947_v4 = vmul.f32 %v6274_v13, %v6274_v13  ;;  %v4977_v43 = vadd.f32 %v4976_v40, %v4946_v56  ;;  %v6276_v16 = vadd.f32 %v4618_v14, %v1867_v19 }
 0x21c   : > { %v5737_v58 = vpack.c.bf16 %v6275_v9, %v6273_v48  ;;  %v4950_v24 = vmul.f32 %v6275_v9, %v6275_v9 }
 0x21d   : > { %v4978_v50 = vadd.f32 %v4977_v43, %v4947_v4  ;;  %v5732_v54 = vpack.c.bf16 %v6276_v16, %v6274_v13  ;;  %v4910_v18 = vadd.f32 %v6276_v16, %v4909_v63  ;;  %v4948_v52 = vmul.f32 %v6276_v16, %v6276_v16 }
 0x21e   : > { %5793 = vst [vmem:[%s8396_s18 + $0x28] sm:$0xff] %v5737_v58  }
 0x21f   : > { %5792 = vst [vmem:[%s8396_s18 + $0x20] sm:$0xff] %v5732_v54   ;;  %v4911_v2 = vadd.f32 %v6273_v48, %v4910_v18  ;;  %v4979_v39 = vadd.f32 %v4978_v50, %v4948_v52  ;;  %v6245_v32 = vpop.f32.mrb[12].mxu0 }
 0x220   : > { %v6277_v0 = vadd.f32 %v6245_v32, %v8384_v41  ;;  %v4631_v36 = vpop.f32.mrb[13].mxu0 }
 0x221   : > { %v4980_v10 = vadd.f32 %v4979_v39, %v4949_v11  ;;  %v6278_v59 = vadd.f32 %v4631_v36, %v8386_v5  ;;  %v4912_v19 = vadd.f32 %v6275_v9, %v4911_v2  ;;  %v6246_v38 = vpop.f32.mrb[14].mxu0 }
 0x222   : > { %v6279_v37 = vadd.f32 %v6246_v38, %v8388_v55  ;;  %v4634_v26 = vpop.f32.mrb[15].mxu0  ;;  %v4953_v61 = vmul.f32 %v6277_v0, %v6277_v0 }
 0x223   : > { %v4913_v35 = vadd.f32 %v6278_v59, %v4912_v19  ;;  %v4951_v34 = vmul.f32 %v6278_v59, %v6278_v59  ;;  %v4981_v6 = vadd.f32 %v4980_v10, %v4950_v24  ;;  %v6280_v49 = vadd.f32 %v4634_v26, %v8390_v29 }
 0x224   : > { %v5747_v23 = vpack.c.bf16 %v6279_v37, %v6277_v0  ;;  %v4954_v55 = vmul.f32 %v6279_v37, %v6279_v37 }
 0x225   : > { %v4982_v25 = vadd.f32 %v4981_v6, %v4951_v34  ;;  %v5742_v41 = vpack.c.bf16 %v6280_v49, %v6278_v59  ;;  %v4914_v1 = vadd.f32 %v6280_v49, %v4913_v35  ;;  %v4952_v7 = vmul.f32 %v6280_v49, %v6280_v49 }
 0x226   : > { %5795 = vst [vmem:[%s8396_s18 + $0x38] sm:$0xff] %v5747_v23  }
 0x227   : > { %5794 = vst [vmem:[%s8396_s18 + $0x30] sm:$0xff] %v5742_v41   ;;  %v4915_v5 = vadd.f32 %v6277_v0, %v4914_v1  ;;  %v4983_v22 = vadd.f32 %v4982_v25, %v4952_v7  ;;  %v6249_v44 = vpop.f32.mrb[16].mxu0 }
 0x228   : > { %v6113_v3 = vpop.f32.mrb[16].mxu1  ;;  %v4647_v51 = vpop.f32.mrb[17].mxu0 }
 0x229   : > { %v4984_v28 = vadd.f32 %v4983_v22, %v4953_v61  ;;  %v6281_v45 = vadd.f32 %v6249_v44, %v6113_v3  ;;  %v2622_v27 = vpop.f32.mrb[17].mxu1  ;;  %v4916_v53 = vadd.f32 %v6279_v37, %v4915_v5  ;;  %v6250_v29 = vpop.f32.mrb[18].mxu0 }
 0x22a   : > { %v6282_v21 = vadd.f32 %v4647_v51, %v2622_v27  ;;  %v6114_v47 = vpop.f32.mrb[18].mxu1  ;;  %v4650_v46 = vpop.f32.mrb[19].mxu0 }
 0x22b   : > { %v4985_v15 = vadd.f32 %v4984_v28, %v4954_v55  ;;  %v6283_v60 = vadd.f32 %v6250_v29, %v6114_v47  ;;  %v2625_v20 = vpop.f32.mrb[19].mxu1  ;;  %v4957_v40 = vmul.f32 %v6281_v45, %v6281_v45 }
 0x22c   : > { %v4917_v42 = vadd.f32 %v6282_v21, %v4916_v53  ;;  %v4955_v33 = vmul.f32 %v6282_v21, %v6282_v21  ;;  %v6284_v12 = vadd.f32 %v4650_v46, %v2625_v20 }
 0x22d   : > { %v5757_v31 = vpack.c.bf16 %v6283_v60, %v6281_v45  ;;  %v4958_v43 = vmul.f32 %v6283_v60, %v6283_v60 }
 0x22e   : > { %v4986_v57 = vadd.f32 %v4985_v15, %v4955_v33  ;;  %v5752_v8 = vpack.c.bf16 %v6284_v12, %v6282_v21  ;;  %v4918_v48 = vadd.f32 %v6284_v12, %v4917_v42  ;;  %v4956_v62 = vmul.f32 %v6284_v12, %v6284_v12 }
 0x22f   : > { %5797 = vst [vmem:[%s8396_s18 + $0x48] sm:$0xff] %v5757_v31   ;;  %v6253_v56 = vpop.f32.mrb[20].mxu0 }
 0x230   : > { %5796 = vst [vmem:[%s8396_s18 + $0x40] sm:$0xff] %v5752_v8   ;;  %v4919_v13 = vadd.f32 %v6281_v45, %v4918_v48  ;;  %v4987_v17 = vadd.f32 %v4986_v57, %v4956_v62  ;;  %v6117_v30 = vpop.f32.mrb[20].mxu1  ;;  %v4663_v9 = vpop.f32.mrb[21].mxu0 }
 0x231   : > { %v6285_v14 = vadd.f32 %v6253_v56, %v6117_v30  ;;  %v2638_v63 = vpop.f32.mrb[21].mxu1  ;;  %v6254_v4 = vpop.f32.mrb[22].mxu0 }
 0x232   : > { %v4988_v16 = vadd.f32 %v4987_v17, %v4957_v40  ;;  %v6286_v58 = vadd.f32 %v4663_v9, %v2638_v63  ;;  %v4920_v50 = vadd.f32 %v6283_v60, %v4919_v13  ;;  %v6118_v54 = vpop.f32.mrb[22].mxu1  ;;  %v4666_v18 = vpop.f32.mrb[23].mxu0 }
 0x233   : > { %v6287_v52 = vadd.f32 %v6254_v4, %v6118_v54  ;;  %v2641_v11 = vpop.f32.mrb[23].mxu1  ;;  %v4961_v37 = vmul.f32 %v6285_v14, %v6285_v14 }
 0x234   : > { %v4921_v2 = vadd.f32 %v6286_v58, %v4920_v50  ;;  %v4959_v39 = vmul.f32 %v6286_v58, %v6286_v58  ;;  %v4989_v32 = vadd.f32 %v4988_v16, %v4958_v43  ;;  %v6288_v0 = vadd.f32 %v4666_v18, %v2641_v11 }
 0x235   : > { %v5767_v36 = vpack.c.bf16 %v6287_v52, %v6285_v14  ;;  %v4962_v41 = vmul.f32 %v6287_v52, %v6287_v52 }
 0x236   : > { %v4990_v24 = vadd.f32 %v4989_v32, %v4959_v39  ;;  %v5762_v10 = vpack.c.bf16 %v6288_v0, %v6286_v58  ;;  %v4922_v59 = vadd.f32 %v6288_v0, %v4921_v2  ;;  %v4960_v19 = vmul.f32 %v6288_v0, %v6288_v0 }
 0x237   : > { %5799 = vst [vmem:[%s8396_s18 + $0x58] sm:$0xff] %v5767_v36   ;;  %v6257_v38 = vpop.f32.mrb[24].mxu0 }
 0x238   : > { %5798 = vst [vmem:[%s8396_s18 + $0x50] sm:$0xff] %v5762_v10   ;;  %v4923_v26 = vadd.f32 %v6285_v14, %v4922_v59  ;;  %v4991_v35 = vadd.f32 %v4990_v24, %v4960_v19  ;;  %v6121_v34 = vpop.f32.mrb[24].mxu1  ;;  %v4679_v6 = vpop.f32.mrb[25].mxu0 }
 0x239   : > { %v6289_v49 = vadd.f32 %v6257_v38, %v6121_v34  ;;  %v2654_v23 = vpop.f32.mrb[25].mxu1  ;;  %v6258_v25 = vpop.f32.mrb[26].mxu0 }
 0x23a   : > { %v4992_v1 = vadd.f32 %v4991_v35, %v4961_v37  ;;  %v6290_v7 = vadd.f32 %v4679_v6, %v2654_v23  ;;  %v4924_v61 = vadd.f32 %v6287_v52, %v4923_v26  ;;  %v6122_v5 = vpop.f32.mrb[26].mxu1  ;;  %v4682_v22 = vpop.f32.mrb[27].mxu0 }
 0x23b   : > { %v6291_v44 = vadd.f32 %v6258_v25, %v6122_v5  ;;  %v2657_v3 = vpop.f32.mrb[27].mxu1  ;;  %v4965_v15 = vmul.f32 %v6289_v49, %v6289_v49 }
 0x23c   : > { %v4925_v51 = vadd.f32 %v6290_v7, %v4924_v61  ;;  %v4963_v55 = vmul.f32 %v6290_v7, %v6290_v7  ;;  %v4993_v28 = vadd.f32 %v4992_v1, %v4962_v41  ;;  %v6292_v45 = vadd.f32 %v4682_v22, %v2657_v3 }
 0x23d   : > { %v5777_v27 = vpack.c.bf16 %v6291_v44, %v6289_v49  ;;  %v4966_v8 = vmul.f32 %v6291_v44, %v6291_v44 }
 0x23e   : > { %v4994_v53 = vadd.f32 %v4993_v28, %v4963_v55  ;;  %v5772_v29 = vpack.c.bf16 %v6292_v45, %v6290_v7  ;;  %v4926_v21 = vadd.f32 %v6292_v45, %v4925_v51  ;;  %v4964_v47 = vmul.f32 %v6292_v45, %v6292_v45 }
 0x23f   : > { %5801 = vst [vmem:[%s8396_s18 + $0x68] sm:$0xff] %v5777_v27   ;;  %v6261_v46 = vpop.f32.mrb[28].mxu0 }
 0x240   : > { %5800 = vst [vmem:[%s8396_s18 + $0x60] sm:$0xff] %v5772_v29   ;;  %v4927_v60 = vadd.f32 %v6289_v49, %v4926_v21  ;;  %v4995_v20 = vadd.f32 %v4994_v53, %v4964_v47  ;;  %v6125_v42 = vpop.f32.mrb[28].mxu1  ;;  %v4695_v33 = vpop.f32.mrb[29].mxu0 }
 0x241   : > { %v6293_v12 = vadd.f32 %v6261_v46, %v6125_v42  ;;  %v2670_v31 = vpop.f32.mrb[29].mxu1  ;;  %v6262_v57 = vpop.f32.mrb[30].mxu0 }
 0x242   : > { %v4996_v48 = vadd.f32 %v4995_v20, %v4965_v15  ;;  %v6294_v62 = vadd.f32 %v4695_v33, %v2670_v31  ;;  %v4928_v56 = vadd.f32 %v6291_v44, %v4927_v60  ;;  %v6126_v40 = vpop.f32.mrb[30].mxu1  ;;  %v4698_v13 = vpop.f32.mrb[31].mxu0 }
 0x243   : > { %v6295_v17 = vadd.f32 %v6262_v57, %v6126_v40  ;;  %v2673_v30 = vpop.f32.mrb[31].mxu1  ;;  %v4969_v18 = vmul.f32 %v6293_v12, %v6293_v12 }
 0x244   : > { %v4929_v9 = vadd.f32 %v6294_v62, %v4928_v56  ;;  %v4967_v14 = vmul.f32 %v6294_v62, %v6294_v62  ;;  %v4997_v63 = vadd.f32 %v4996_v48, %v4966_v8  ;;  %v6296_v4 = vadd.f32 %v4698_v13, %v2673_v30 }
 0x245   : > { %v5787_v43 = vpack.c.bf16 %v6295_v17, %v6293_v12  ;;  %v4970_v2 = vmul.f32 %v6295_v17, %v6295_v17 }
 0x246   : > { %v4998_v16 = vadd.f32 %v4997_v63, %v4967_v14  ;;  %v5782_v58 = vpack.c.bf16 %v6296_v4, %v6294_v62  ;;  %v4930_v50 = vadd.f32 %v6296_v4, %v4929_v9  ;;  %v4968_v54 = vmul.f32 %v6296_v4, %v6296_v4 }
 0x247   : > { %5803 = vst [vmem:[%s8396_s18 + $0x78] sm:$0xff] %v5787_v43  }
 0x248   : > { %5802 = vst [vmem:[%s8396_s18 + $0x70] sm:$0xff] %v5782_v58   ;;  %v4931_v52 = vadd.f32 %v6293_v12, %v4930_v50  ;;  %v4999_v11 = vadd.f32 %v4998_v16, %v4968_v54 }
 0x24a   : > { %v4932_v39 = vadd.f32 %v6295_v17, %v4931_v52  ;;  %v5000_v32 = vadd.f32 %v4999_v11, %v4969_v18 }
 0x24c   : > { %v4933_v0 = vrot.slane %v4932_v39, 4  ;;  %v5001_v36 = vadd.f32 %v5000_v32, %v4970_v2 }
 0x24e   : > { %v4934_v24 = vadd.f32 %v4933_v0, %v4932_v39  ;;  %v5002_v10 = vrot.slane %v5001_v36, 4 }
 0x250   : > { %v4935_v59 = vrot.slane %v4934_v24, 2  ;;  %v5003_v19 = vadd.f32 %v5002_v10, %v5001_v36 }
 0x252   : > { %v4936_v38 = vadd.f32 %v4935_v59, %v4934_v24  ;;  %v5004_v37 = vrot.slane %v5003_v19, 2 }
 0x254   : > { %v4937_v26 = vrot.slane %v4936_v38, 1  ;;  %v5005_v35 = vadd.f32 %v5004_v37, %v5003_v19 }
 0x256   : > { %v5006_v34 = vrot.slane %v5005_v35, 1  ;;  %v4938_v6 = vadd.f32 %v4937_v26, %v4936_v38 }
 0x258   : > { %v5007_v49 = vadd.f32 %v5006_v34, %v5005_v35 }
 0x25a   : > { %v5009_v23 = vsel %vm5008_vm8, %v4938_v6, %v5007_v49 }
 0x25b   : > { %5010 = vst [vmem:[%s181_s22] sm:$0x3] %v5009_v23 }
 0x25c PF: > { %s14_s12 = sadd.s32 1, %s6651_s12  }
 0x25d   : > { %p11_p4 = scmp.ge.s32.totalorder %s14_s12, 4  }
 0x25f   :  { %13 = sbr.rel (!%p11_p4) target bundleno = 1 (0x1), region = 80 }

</bundles_post_ra>
